<compile_context>
chip_gen: v5e
topology: v5e:2x2
jax: 0.10.0
libtpu: 0.0.40
codegen_flags: <defaults>
</compile_context>

<pallas_src>
import math
from functools import partial

import jax
import jax.numpy as jnp
from jax.experimental import pallas as pl
from jax.experimental.pallas import tpu as pltpu

LN_EPS = 1e-5                     # tt_lib layernorm eps used by the module


def _round_up(x, m):
    return (x + m - 1) // m * m


def _pick_tile(n, candidates):
    for c in candidates:
        if n % c == 0:
            return c
    return n


def _vmem_limit_bytes():
    # generation-aware scoped-VMEM cap: ~80% of physical, capped at 100 MiB
    # (v6e/v5e: ~100 MiB of 128 MiB; v7x: ~51 MiB of 64 MiB).
    try:
        phys = pltpu.get_tpu_info().vmem_capacity_bytes
        return min(int(phys * 0.8), 100 * 1024 * 1024)
    except Exception:
        return 64 * 1024 * 1024


_VMEM_LIMIT = _vmem_limit_bytes()


def _compiler_params(sem):
    return pltpu.CompilerParams(dimension_semantics=sem,
                                vmem_limit_bytes=_VMEM_LIMIT)


def _ln_f32(x_f32, gamma, beta, eps=LN_EPS):
    mu = jnp.mean(x_f32, axis=-1, keepdims=True)
    var = jnp.mean((x_f32 - mu) ** 2, axis=-1, keepdims=True)
    return (x_f32 - mu) * jax.lax.rsqrt(var + eps) * gamma + beta


def _gelu_new(x):
    # nanoGPT "new gelu" (tanh approximation), f32 math (v5e has no bf16 EUP)
    c = math.sqrt(2.0 / math.pi)
    return 0.5 * x * (1.0 + jnp.tanh(c * (x + 0.044715 * x * x * x)))


# ---------------------------------------------------------------------------
# Kernel A: ln1 + fused QKV projection (row-tiled, weights resident)
# ---------------------------------------------------------------------------
def ln_qkv_kernel(x_ref, g_ref, b_ref, w_ref, bias_ref, qkv_ref):
    x = x_ref[...].astype(jnp.float32)                      # (RT, D)
    xn = _ln_f32(x, g_ref[...], b_ref[...])
    qkv = jnp.dot(xn.astype(jnp.bfloat16), w_ref[...],
                  preferred_element_type=jnp.float32) + bias_ref[...]
    qkv_ref[...] = qkv.astype(qkv_ref.dtype)


def run_ln_qkv(x_flat, g, b, w, bias, row_tile):
    N, D = x_flat.shape
    E = w.shape[1]
    return pl.pallas_call(
        ln_qkv_kernel,
        out_shape=jax.ShapeDtypeStruct((N, E), jnp.bfloat16),
        grid=(N // row_tile,),
        in_specs=[
            pl.BlockSpec((row_tile, D), lambda i: (i, 0)),
            pl.BlockSpec((1, D), lambda i: (0, 0)),
            pl.BlockSpec((1, D), lambda i: (0, 0)),
            pl.BlockSpec((D, E), lambda i: (0, 0)),          # resident weight
            pl.BlockSpec((1, E), lambda i: (0, 0)),
        ],
        out_specs=pl.BlockSpec((row_tile, E), lambda i: (i, 0)),
        compiler_params=_compiler_params(("parallel",)),
    )(x_flat, g, b, w, bias)


# ---------------------------------------------------------------------------
# Kernel B: flash-style causal attention, head-major layout.
# grid = (B*H, num_q_tiles, num_k_tiles); online softmax over k tiles,
# causal tile skipping (pl.when(ki <= qi)); K/V index_map clamps above-diagonal
# tiles to the diagonal so skipped steps re-use the resident block.
# ---------------------------------------------------------------------------
def flash_attn_kernel(q_tile, k_tile, scale,
                      q_ref, k_ref, v_ref, o_ref, m_sc, l_sc, acc_sc):
    qi = pl.program_id(1)
    ki = pl.program_id(2)

    @pl.when(ki == 0)
    def _():
        m_sc[...] = jnp.full_like(m_sc, -jnp.inf)
        l_sc[...] = jnp.zeros_like(l_sc)
        acc_sc[...] = jnp.zeros_like(acc_sc)

    @pl.when(ki <= qi)           # tiles above the diagonal contribute nothing
    def _():
        q = q_ref[0]                                         # (QT, hd) bf16
        k = k_ref[0]                                         # (KT, hd) bf16
        v = v_ref[0]                                         # (KT, hd) bf16
        s = jax.lax.dot_general(q, k, (((1,), (1,)), ((), ())),
                                preferred_element_type=jnp.float32) * scale
        q_pos = qi * q_tile + jax.lax.broadcasted_iota(jnp.int32, s.shape, 0)
        k_pos = ki * k_tile + jax.lax.broadcasted_iota(jnp.int32, s.shape, 1)
        s = jnp.where(q_pos >= k_pos, s, -1e30)

        m_prev = m_sc[...]
        m_new = jnp.maximum(m_prev, jnp.max(s, axis=-1, keepdims=True))
        alpha = jnp.exp(m_prev - m_new)
        p = jnp.exp(s - m_new)
        l_sc[...] = alpha * l_sc[...] + jnp.sum(p, axis=-1, keepdims=True)
        acc_sc[...] = alpha * acc_sc[...] + jnp.dot(
            p.astype(jnp.bfloat16), v, preferred_element_type=jnp.float32)
        m_sc[...] = m_new

    @pl.when(ki == qi)           # diagonal tile is the last contributing step
    def _():
        o_ref[0] = (acc_sc[...] *
                    pl.reciprocal(l_sc[...], approx=True)).astype(o_ref.dtype)


def run_flash_attention(q, k, v, q_tile):
    BH, T, hd = q.shape
    k_tile = q_tile
    scale = 1.0 / math.sqrt(hd)
    kv_map = lambda bh, qi, ki: (bh, jnp.minimum(ki, qi), 0)
    return pl.pallas_call(
        partial(flash_attn_kernel, q_tile, k_tile, scale),
        out_shape=jax.ShapeDtypeStruct((BH, T, hd), jnp.bfloat16),
        grid=(BH, T // q_tile, T // k_tile),
        in_specs=[
            pl.BlockSpec((1, q_tile, hd), lambda bh, qi, ki: (bh, qi, 0)),
            pl.BlockSpec((1, k_tile, hd), kv_map),
            pl.BlockSpec((1, k_tile, hd), kv_map),
        ],
        out_specs=pl.BlockSpec((1, q_tile, hd), lambda bh, qi, ki: (bh, qi, 0)),
        scratch_shapes=[pltpu.VMEM((q_tile, 1), jnp.float32),
                        pltpu.VMEM((q_tile, 1), jnp.float32),
                        pltpu.VMEM((q_tile, hd), jnp.float32)],
        compiler_params=_compiler_params(("parallel", "parallel", "arbitrary")),
    )(q, k, v)


# ---------------------------------------------------------------------------
# Kernel C: attention out-projection + residual + ln2 + MLP (gelu-new)
# + residual (row-tiled, weights resident)
# ---------------------------------------------------------------------------
def proj_ln_mlp_kernel(x_ref, y_ref, wao_ref, bao_ref, g_ref, b_ref,
                       wfc_ref, bfc_ref, wmp_ref, bmp_ref, o_ref):
    att = jnp.dot(y_ref[...], wao_ref[...],
                  preferred_element_type=jnp.float32) + bao_ref[...]
    x1 = x_ref[...].astype(jnp.float32) + att                 # residual 1
    xn = _ln_f32(x1, g_ref[...], b_ref[...])
    h = jnp.dot(xn.astype(jnp.bfloat16), wfc_ref[...],
                preferred_element_type=jnp.float32) + bfc_ref[...]
    h = _gelu_new(h)
    m = jnp.dot(h.astype(jnp.bfloat16), wmp_ref[...],
                preferred_element_type=jnp.float32) + bmp_ref[...]
    o_ref[...] = (x1 + m).astype(o_ref.dtype)                 # residual 2


def run_proj_ln_mlp(x_flat, y_flat, w_ao, b_ao, g, b, w_fc, b_fc, w_mp, b_mp,
                    row_tile):
    N, D = x_flat.shape
    Dh = w_fc.shape[1]
    return pl.pallas_call(
        proj_ln_mlp_kernel,
        out_shape=jax.ShapeDtypeStruct((N, D), jnp.bfloat16),
        grid=(N // row_tile,),
        in_specs=[
            pl.BlockSpec((row_tile, D), lambda i: (i, 0)),    # residual input
            pl.BlockSpec((row_tile, D), lambda i: (i, 0)),    # attn heads (concat)
            pl.BlockSpec((D, D), lambda i: (0, 0)),           # w_ao resident
            pl.BlockSpec((1, D), lambda i: (0, 0)),
            pl.BlockSpec((1, D), lambda i: (0, 0)),           # ln2 gamma
            pl.BlockSpec((1, D), lambda i: (0, 0)),           # ln2 beta
            pl.BlockSpec((D, Dh), lambda i: (0, 0)),          # w_fc resident
            pl.BlockSpec((1, Dh), lambda i: (0, 0)),
            pl.BlockSpec((Dh, D), lambda i: (0, 0)),          # w_mp resident
            pl.BlockSpec((1, D), lambda i: (0, 0)),
        ],
        out_specs=pl.BlockSpec((row_tile, D), lambda i: (i, 0)),
        compiler_params=_compiler_params(("parallel",)),
    )(x_flat, y_flat, w_ao, b_ao, g, b, w_fc, b_fc, w_mp, b_mp)


# ---------------------------------------------------------------------------
# Kernel D: final layernorm + lm_head (tied weight, no bias).
# Tiled over (row-tile, vocab-tile); LN result cached in scratch at j == 0.
# Weight is pre-transposed to (D, V_pad); logits emitted in bf16.
# ---------------------------------------------------------------------------
def lnf_lmhead_kernel(x_ref, g_ref, b_ref, wlm_ref, o_ref, xn_scratch):
    @pl.when(pl.program_id(1) == 0)
    def _():
        x = x_ref[...].astype(jnp.float32)
        xn_scratch[...] = _ln_f32(x, g_ref[...], b_ref[...]).astype(jnp.bfloat16)

    o_ref[...] = jnp.dot(xn_scratch[...], wlm_ref[...],
                         preferred_element_type=jnp.float32).astype(o_ref.dtype)


def run_lnf_lmhead(x_flat, g, b, w_lm_t, row_tile, v_tile):
    N, D = x_flat.shape
    Vp = w_lm_t.shape[1]
    return pl.pallas_call(
        lnf_lmhead_kernel,
        out_shape=jax.ShapeDtypeStruct((N, Vp), jnp.bfloat16),
        grid=(N // row_tile, Vp // v_tile),
        in_specs=[
            pl.BlockSpec((row_tile, D), lambda i, j: (i, 0)),
            pl.BlockSpec((1, D), lambda i, j: (0, 0)),
            pl.BlockSpec((1, D), lambda i, j: (0, 0)),
            pl.BlockSpec((D, v_tile), lambda i, j: (0, j)),   # stream vocab tiles
        ],
        out_specs=pl.BlockSpec((row_tile, v_tile), lambda i, j: (i, j)),
        scratch_shapes=[pltpu.VMEM((row_tile, D), jnp.bfloat16)],
        compiler_params=_compiler_params(("parallel", "arbitrary")),
    )(x_flat, g, b, w_lm_t)


# ---------------------------------------------------------------------------
# Full forward (embedding gathers / head-major reshapes are XLA glue;
# all dense compute is Pallas)
# ---------------------------------------------------------------------------
@partial(jax.jit, static_argnames=("n_head", "vocab_size"))
def tt_gpt_forward(idx, params, n_head, vocab_size):
    B, T = idx.shape
    block_size, D = params["wpe"].shape
    V = vocab_size
    H = n_head
    hd = D // H
    assert T <= block_size

    # glue: embedding gathers (token table tied to lm_head weight, per module)
    tok_emb = jnp.take(params["w_lm"], idx, axis=0)            # (B, T, D) bf16
    pos_emb = params["wpe"][:T][None, :, :]                    # (1, T, D) bf16
    x = (tok_emb + pos_emb).astype(jnp.bfloat16)

    # pad sequence so blocks stay (16,128)-friendly; padded rows are discarded
    T_pad = _round_up(T, 16)
    if T_pad != T:
        x = jnp.pad(x, ((0, 0), (0, T_pad - T), (0, 0)))
    N_pad = B * T_pad

    row_tile = _pick_tile(N_pad, (256, 128, 64, 32, 16))
    q_tile = _pick_tile(T_pad, (256, 128, 64, 32, 16))

    x_flat = x.reshape(N_pad, D)
    for lp in params["layers"]:
        qkv = run_ln_qkv(x_flat, lp["ln1_g"], lp["ln1_b"],
                         lp["w_qkv"], lp["b_qkv"], row_tile)   # (N, 3D) bf16

        # head-major split (layout plumbing once per layer, XLA-side)
        qkv_h = qkv.reshape(B, T_pad, 3, H, hd).transpose(2, 0, 3, 1, 4)
        q = qkv_h[0].reshape(B * H, T_pad, hd)
        k = qkv_h[1].reshape(B * H, T_pad, hd)
        v = qkv_h[2].reshape(B * H, T_pad, hd)

        y = run_flash_attention(q, k, v, q_tile)               # (B*H, T, hd)
        y = y.reshape(B, H, T_pad, hd).transpose(0, 2, 1, 3).reshape(N_pad, D)

        x_flat = run_proj_ln_mlp(x_flat, y, lp["w_ao"], lp["b_ao"],
                                 lp["ln2_g"], lp["ln2_b"],
                                 lp["w_fc"], lp["b_fc"],
                                 lp["w_mp"], lp["b_mp"], row_tile)

    v_tile = 512
    logits = run_lnf_lmhead(x_flat, params["lnf_g"], params["lnf_b"],
                            params["w_lm_t"], row_tile, v_tile)
    V_pad = params["w_lm_t"].shape[1]
    return logits.reshape(B, T_pad, V_pad)[:, :T, :V]


# ---------------------------------------------------------------------------
# Deterministic parameter init (synthetic; shapes follow the module's __init__)
# ---------------------------------------------------------------------------
def init_params(key, *, n_layer, n_embd, vocab_size, block_size):
    D, V = n_embd, vocab_size
    V_pad = _round_up(V, 512)
    s = 0.02
    keys = jax.random.split(key, 4 + n_layer)

    def ln_pair(k, width):
        kg, kb = jax.random.split(k)
        return (1.0 + s * jax.random.normal(kg, (1, width), jnp.float32),
                s * jax.random.normal(kb, (1, width), jnp.float32))

    def bf16(x):
        return x.astype(jnp.bfloat16)

    # lm_head / wte tied weight, zero-padded vocab rows (sliced off at the end)
    w_lm = s * jax.random.normal(keys[0], (V, D), jnp.float32)
    w_lm = bf16(jnp.pad(w_lm, ((0, V_pad - V), (0, 0))))       # (V_pad, D) gather
    w_lm_t = jnp.transpose(w_lm)                               # (D, V_pad) lm_head
    wpe = bf16(s * jax.random.normal(keys[1], (block_size, D), jnp.float32))
    lnf_g, lnf_b = ln_pair(keys[2], D)

    layers = []
    for i in range(n_layer):
        lk = jax.random.split(keys[4 + i], 10)
        ln1_g, ln1_b = ln_pair(lk[0], D)
        ln2_g, ln2_b = ln_pair(lk[1], D)
        layers.append(dict(
            ln1_g=ln1_g, ln1_b=ln1_b,
            w_qkv=bf16(s * jax.random.normal(lk[2], (D, 3 * D), jnp.float32)),
            b_qkv=s * jax.random.normal(lk[3], (1, 3 * D), jnp.float32),
            w_ao=bf16(s * jax.random.normal(lk[4], (D, D), jnp.float32)),
            b_ao=s * jax.random.normal(lk[5], (1, D), jnp.float32),
            ln2_g=ln2_g, ln2_b=ln2_b,
            w_fc=bf16(s * jax.random.normal(lk[6], (D, 4 * D), jnp.float32)),
            b_fc=s * jax.random.normal(lk[7], (1, 4 * D), jnp.float32),
            w_mp=bf16(s * jax.random.normal(lk[8], (4 * D, D), jnp.float32)),
            b_mp=s * jax.random.normal(lk[9], (1, D), jnp.float32),
        ))

    return dict(w_lm=w_lm, w_lm_t=w_lm_t, wpe=wpe, lnf_g=lnf_g, lnf_b=lnf_b,
                layers=layers)


if __name__ == "__main__":
    # small config consistent with the module's forward
    B, T = 2, 32
    n_embd, n_head, n_layer = 128, 4, 2
    vocab_size, block_size = 512, 1024

    key = jax.random.PRNGKey(0)
    kp, ki = jax.random.split(key)
    params = init_params(kp, n_layer=n_layer, n_embd=n_embd,
                         vocab_size=vocab_size, block_size=block_size)
    idx = jax.random.randint(ki, (B, T), 0, vocab_size, dtype=jnp.int32)

    logits = tt_gpt_forward(idx, params, n_head, vocab_size)
    logits = jax.block_until_ready(logits)
    assert logits.shape == (B, T, vocab_size)
    assert bool(jnp.all(jnp.isfinite(logits.astype(jnp.float32))))
    print("KERNEL_OK")
</pallas_src>

<mosaic_0001>
module attributes {stable_mosaic.version = 11 : i64} {
  func.func @ln_qkv_kernel(%arg0: i32, %arg1: memref<64x128xbf16, #tpu.memory_space<vmem>>, %arg2: memref<1x128xf32, #tpu.memory_space<vmem>>, %arg3: memref<1x128xf32, #tpu.memory_space<vmem>>, %arg4: memref<128x384xbf16, #tpu.memory_space<vmem>>, %arg5: memref<1x384xf32, #tpu.memory_space<vmem>>, %arg6: memref<64x384xbf16, #tpu.memory_space<vmem>>) attributes {dimension_semantics = [#tpu.dimension_semantics<parallel>], iteration_bounds = array<i64: 1>, scalar_prefetch = 0 : i64, scratch_operands = 0 : i64, tpu.core_type = #tpu.core_type<tc>, window_params = [{transform_indices = @transform_0, window_bounds = array<i64: 64, 128>}, {pipeline_mode = #tpu.pipeline_mode<synchronous>, transform_indices = @transform_1, window_bounds = array<i64: 1, 128>}, {pipeline_mode = #tpu.pipeline_mode<synchronous>, transform_indices = @transform_2, window_bounds = array<i64: 1, 128>}, {pipeline_mode = #tpu.pipeline_mode<synchronous>, transform_indices = @transform_3, window_bounds = array<i64: 128, 384>}, {pipeline_mode = #tpu.pipeline_mode<synchronous>, transform_indices = @transform_4, window_bounds = array<i64: 1, 384>}, {transform_indices = @transform_5, window_bounds = array<i64: 64, 384>}]} {
    %c0 = arith.constant 0 : index
    %c0_0 = arith.constant 0 : index
    %0 = vector.load %arg1[%c0, %c0_0] : memref<64x128xbf16, #tpu.memory_space<vmem>>, vector<64x128xbf16>
    %1 = arith.extf %0 : vector<64x128xbf16> to vector<64x128xf32>
    %c0_1 = arith.constant 0 : index
    %c0_2 = arith.constant 0 : index
    %2 = vector.load %arg2[%c0_1, %c0_2] : memref<1x128xf32, #tpu.memory_space<vmem>>, vector<1x128xf32>
    %c0_3 = arith.constant 0 : index
    %c0_4 = arith.constant 0 : index
    %3 = vector.load %arg3[%c0_3, %c0_4] : memref<1x128xf32, #tpu.memory_space<vmem>>, vector<1x128xf32>
    %cst = arith.constant dense<0.000000e+00> : vector<64xf32>
    %4 = vector.multi_reduction <add>, %1, %cst [1] : vector<64x128xf32> to vector<64xf32>
    %5 = vector.shape_cast %4 : vector<64xf32> to vector<64x1xf32>
    %cst_5 = arith.constant 1.280000e+02 : f32
    %6 = vector.broadcast %cst_5 : f32 to vector<64x1xf32>
    %7 = arith.divf %5, %6 : vector<64x1xf32>
    %8 = vector.broadcast %7 : vector<64x1xf32> to vector<64x128xf32>
    %9 = arith.subf %1, %8 : vector<64x128xf32>
    %10 = arith.mulf %9, %9 : vector<64x128xf32>
    %cst_6 = arith.constant dense<0.000000e+00> : vector<64xf32>
    %11 = vector.multi_reduction <add>, %10, %cst_6 [1] : vector<64x128xf32> to vector<64xf32>
    %12 = vector.shape_cast %11 : vector<64xf32> to vector<64x1xf32>
    %cst_7 = arith.constant 1.280000e+02 : f32
    %13 = vector.broadcast %cst_7 : f32 to vector<64x1xf32>
    %14 = arith.divf %12, %13 : vector<64x1xf32>
    %15 = vector.broadcast %7 : vector<64x1xf32> to vector<64x128xf32>
    %16 = arith.subf %1, %15 : vector<64x128xf32>
    %cst_8 = arith.constant 9.99999974E-6 : f32
    %17 = vector.broadcast %cst_8 : f32 to vector<64x1xf32>
    %18 = arith.addf %14, %17 : vector<64x1xf32>
    %19 = math.rsqrt %18 : vector<64x1xf32>
    %20 = vector.broadcast %19 : vector<64x1xf32> to vector<64x128xf32>
    %21 = arith.mulf %16, %20 : vector<64x128xf32>
    %22 = vector.broadcast %2 : vector<1x128xf32> to vector<64x128xf32>
    %23 = arith.mulf %21, %22 : vector<64x128xf32>
    %24 = vector.broadcast %3 : vector<1x128xf32> to vector<64x128xf32>
    %25 = arith.addf %23, %24 : vector<64x128xf32>
    %26 = arith.truncf %25 : vector<64x128xf32> to vector<64x128xbf16>
    %c0_9 = arith.constant 0 : index
    %c0_10 = arith.constant 0 : index
    %27 = vector.load %arg4[%c0_9, %c0_10] : memref<128x384xbf16, #tpu.memory_space<vmem>>, vector<128x384xbf16>
    %cst_11 = arith.constant dense<0.000000e+00> : vector<64x384xf32>
    %28 = tpu.matmul %26, %27, %cst_11 {dimension_numbers = #tpu.dot_dimension_numbers<[1], [0], [0], [1], [0, 0, 1, 1], [], []>} : vector<64x128xbf16>, vector<128x384xbf16>, vector<64x384xf32> -> vector<64x384xf32>
    %c0_12 = arith.constant 0 : index
    %c0_13 = arith.constant 0 : index
    %29 = vector.load %arg5[%c0_12, %c0_13] : memref<1x384xf32, #tpu.memory_space<vmem>>, vector<1x384xf32>
    %30 = vector.broadcast %29 : vector<1x384xf32> to vector<64x384xf32>
    %31 = arith.addf %28, %30 : vector<64x384xf32>
    %32 = arith.truncf %31 : vector<64x384xf32> to vector<64x384xbf16>
    %c0_14 = arith.constant 0 : index
    %c0_15 = arith.constant 0 : index
    %33 = vector.load %arg6[%c0_14, %c0_15] : memref<64x384xbf16, #tpu.memory_space<vmem>>, vector<64x384xbf16>
    tpu.vector_store %arg6[%c0_14, %c0_15], %32 {strides = array<i32>} : memref<64x384xbf16, #tpu.memory_space<vmem>>, vector<64x384xbf16>,
    return
  }
  func.func @transform_0(%arg0: i32) -> (i32, i32) {
    %c0_i32 = arith.constant 0 : i32
    %c0_i32_0 = arith.constant 0 : i32
    return %arg0, %c0_i32 : i32, i32
  }
  func.func @transform_1(%arg0: i32) -> (i32, i32) {
    %c0_i32 = arith.constant 0 : i32
    %c0_i32_0 = arith.constant 0 : i32
    %c0_i32_1 = arith.constant 0 : i32
    return %c0_i32, %c0_i32_0 : i32, i32
  }
  func.func @transform_2(%arg0: i32) -> (i32, i32) {
    %c0_i32 = arith.constant 0 : i32
    %c0_i32_0 = arith.constant 0 : i32
    %c0_i32_1 = arith.constant 0 : i32
    return %c0_i32, %c0_i32_0 : i32, i32
  }
  func.func @transform_3(%arg0: i32) -> (i32, i32) {
    %c0_i32 = arith.constant 0 : i32
    %c0_i32_0 = arith.constant 0 : i32
    %c0_i32_1 = arith.constant 0 : i32
    return %c0_i32, %c0_i32_0 : i32, i32
  }
  func.func @transform_4(%arg0: i32) -> (i32, i32) {
    %c0_i32 = arith.constant 0 : i32
    %c0_i32_0 = arith.constant 0 : i32
    %c0_i32_1 = arith.constant 0 : i32
    return %c0_i32, %c0_i32_0 : i32, i32
  }
  func.func @transform_5(%arg0: i32) -> (i32, i32) {
    %c0_i32 = arith.constant 0 : i32
    %c0_i32_0 = arith.constant 0 : i32
    return %arg0, %c0_i32 : i32, i32
  }
}

module attributes {stable_mosaic.version = 11 : i64} {
  func.func @flash_attn_kernel(%arg0: i32, %arg1: i32, %arg2: i32, %arg3: memref<1x32x32xbf16, #tpu.memory_space<vmem>>, %arg4: memref<1x32x32xbf16, #tpu.memory_space<vmem>>, %arg5: memref<1x32x32xbf16, #tpu.memory_space<vmem>>, %arg6: memref<1x32x32xbf16, #tpu.memory_space<vmem>>, %arg7: memref<32x1xf32, #tpu.memory_space<vmem>>, %arg8: memref<32x1xf32, #tpu.memory_space<vmem>>, %arg9: memref<32x32xf32, #tpu.memory_space<vmem>>) attributes {dimension_semantics = [#tpu.dimension_semantics<parallel>, #tpu.dimension_semantics<parallel>, #tpu.dimension_semantics<arbitrary>], iteration_bounds = array<i64: 8, 1, 1>, scalar_prefetch = 0 : i64, scratch_operands = 3 : i64, tpu.core_type = #tpu.core_type<tc>, window_params = [{transform_indices = @transform_0, window_bounds = array<i64: 1, 32, 32>}, {transform_indices = @transform_1, window_bounds = array<i64: 1, 32, 32>}, {transform_indices = @transform_2, window_bounds = array<i64: 1, 32, 32>}, {transform_indices = @transform_3, window_bounds = array<i64: 1, 32, 32>}]} {
    %c0_i32 = arith.constant 0 : i32
    %0 = arith.cmpi eq, %arg2, %c0_i32 : i32
    %1 = arith.extui %0 : i1 to i32
    %c0_i32_0 = arith.constant 0 : i32
    %2 = arith.cmpi ne, %1, %c0_i32_0 : i32
    scf.if %2 {
      %cst = arith.constant 0xFF800000 : f32
      %9 = vector.broadcast %cst : f32 to vector<32x1xf32>
      %c0 = arith.constant 0 : index
      %c0_3 = arith.constant 0 : index
      %10 = vector.load %arg7[%c0, %c0_3] : memref<32x1xf32, #tpu.memory_space<vmem>>, vector<32x1xf32>
      tpu.vector_store %arg7[%c0, %c0_3], %9 {strides = array<i32>} : memref<32x1xf32, #tpu.memory_space<vmem>>, vector<32x1xf32>,
      %cst_4 = arith.constant 0.000000e+00 : f32
      %11 = vector.broadcast %cst_4 : f32 to vector<32x1xf32>
      %c0_5 = arith.constant 0 : index
      %c0_6 = arith.constant 0 : index
      %12 = vector.load %arg8[%c0_5, %c0_6] : memref<32x1xf32, #tpu.memory_space<vmem>>, vector<32x1xf32>
      tpu.vector_store %arg8[%c0_5, %c0_6], %11 {strides = array<i32>} : memref<32x1xf32, #tpu.memory_space<vmem>>, vector<32x1xf32>,
      %cst_7 = arith.constant 0.000000e+00 : f32
      %13 = vector.broadcast %cst_7 : f32 to vector<32x32xf32>
      %c0_8 = arith.constant 0 : index
      %c0_9 = arith.constant 0 : index
      %14 = vector.load %arg9[%c0_8, %c0_9] : memref<32x32xf32, #tpu.memory_space<vmem>>, vector<32x32xf32>
      tpu.vector_store %arg9[%c0_8, %c0_9], %13 {strides = array<i32>} : memref<32x32xf32, #tpu.memory_space<vmem>>, vector<32x32xf32>,
    } else {
    }
    %3 = arith.cmpi sle, %arg2, %arg1 : i32
    %4 = arith.extui %3 : i1 to i32
    %c0_i32_1 = arith.constant 0 : i32
    %5 = arith.cmpi ne, %4, %c0_i32_1 : i32
    scf.if %5 {
      %c0 = arith.constant 0 : index
      %c0_3 = arith.constant 0 : index
      %c0_4 = arith.constant 0 : index
      %9 = vector.load %arg3[%c0, %c0_3, %c0_4] : memref<1x32x32xbf16, #tpu.memory_space<vmem>>, vector<1x32x32xbf16>
      %10 = vector.shape_cast %9 : vector<1x32x32xbf16> to vector<32x32xbf16>
      %c0_5 = arith.constant 0 : index
      %c0_6 = arith.constant 0 : index
      %c0_7 = arith.constant 0 : index
      %11 = vector.load %arg4[%c0_5, %c0_6, %c0_7] : memref<1x32x32xbf16, #tpu.memory_space<vmem>>, vector<1x32x32xbf16>
      %12 = vector.shape_cast %11 : vector<1x32x32xbf16> to vector<32x32xbf16>
      %c0_8 = arith.constant 0 : index
      %c0_9 = arith.constant 0 : index
      %c0_10 = arith.constant 0 : index
      %13 = vector.load %arg5[%c0_8, %c0_9, %c0_10] : memref<1x32x32xbf16, #tpu.memory_space<vmem>>, vector<1x32x32xbf16>
      %14 = vector.shape_cast %13 : vector<1x32x32xbf16> to vector<32x32xbf16>
      %cst = arith.constant dense<0.000000e+00> : vector<32x32xf32>
      %15 = tpu.matmul %10, %12, %cst {dimension_numbers = #tpu.dot_dimension_numbers<[1], [1], [0], [0], [0, 0, 1, 0], [], []>} : vector<32x32xbf16>, vector<32x32xbf16>, vector<32x32xf32> -> vector<32x32xf32>
      %cst_11 = arith.constant 0.176776692 : f32
      %16 = vector.broadcast %cst_11 : f32 to vector<32x32xf32>
      %17 = arith.mulf %15, %16 : vector<32x32xf32>
      %c32_i32 = arith.constant 32 : i32
      %18 = arith.muli %arg1, %c32_i32 : i32
      %19 = tpu.iota {dimensions = array<i32: 0>} : vector<32x32xi32>
      %20 = vector.broadcast %18 : i32 to vector<32x32xi32>
      %21 = arith.addi %20, %19 : vector<32x32xi32>
      %c32_i32_12 = arith.constant 32 : i32
      %22 = arith.muli %arg2, %c32_i32_12 : i32
      %23 = tpu.iota {dimensions = array<i32: 1>} : vector<32x32xi32>
      %24 = vector.broadcast %22 : i32 to vector<32x32xi32>
      %25 = arith.addi %24, %23 : vector<32x32xi32>
      %26 = arith.cmpi sge, %21, %25 : vector<32x32xi32>
      %cst_13 = arith.constant -1.000000e+30 : f32
      %27 = vector.broadcast %cst_13 : f32 to vector<32x32xf32>
      %28 = arith.select %26, %17, %27 : vector<32x32xi1>, vector<32x32xf32>
      %c0_14 = arith.constant 0 : index
      %c0_15 = arith.constant 0 : index
      %29 = vector.load %arg7[%c0_14, %c0_15] : memref<32x1xf32, #tpu.memory_space<vmem>>, vector<32x1xf32>
      %cst_16 = arith.constant dense<0xFF800000> : vector<32xf32>
      %30 = vector.multi_reduction <maximumf>, %28, %cst_16 [1] : vector<32x32xf32> to vector<32xf32>
      %31 = vector.shape_cast %30 : vector<32xf32> to vector<32x1xf32>
      %32 = arith.maximumf %29, %31 : vector<32x1xf32>
      %33 = arith.subf %29, %32 : vector<32x1xf32>
      %34 = math.exp %33 : vector<32x1xf32>
      %35 = vector.broadcast %32 : vector<32x1xf32> to vector<32x32xf32>
      %36 = arith.subf %28, %35 : vector<32x32xf32>
      %37 = math.exp %36 : vector<32x32xf32>
      %c0_17 = arith.constant 0 : index
      %c0_18 = arith.constant 0 : index
      %38 = vector.load %arg8[%c0_17, %c0_18] : memref<32x1xf32, #tpu.memory_space<vmem>>, vector<32x1xf32>
      %39 = arith.mulf %34, %38 : vector<32x1xf32>
      %cst_19 = arith.constant dense<0.000000e+00> : vector<32xf32>
      %40 = vector.multi_reduction <add>, %37, %cst_19 [1] : vector<32x32xf32> to vector<32xf32>
      %41 = vector.shape_cast %40 : vector<32xf32> to vector<32x1xf32>
      %42 = arith.addf %39, %41 : vector<32x1xf32>
      %c0_20 = arith.constant 0 : index
      %c0_21 = arith.constant 0 : index
      %43 = vector.load %arg8[%c0_20, %c0_21] : memref<32x1xf32, #tpu.memory_space<vmem>>, vector<32x1xf32>
      tpu.vector_store %arg8[%c0_20, %c0_21], %42 {strides = array<i32>} : memref<32x1xf32, #tpu.memory_space<vmem>>, vector<32x1xf32>,
      %c0_22 = arith.constant 0 : index
      %c0_23 = arith.constant 0 : index
      %44 = vector.load %arg9[%c0_22, %c0_23] : memref<32x32xf32, #tpu.memory_space<vmem>>, vector<32x32xf32>
      %45 = vector.broadcast %34 : vector<32x1xf32> to vector<32x32xf32>
      %46 = arith.mulf %45, %44 : vector<32x32xf32>
      %47 = arith.truncf %37 : vector<32x32xf32> to vector<32x32xbf16>
      %cst_24 = arith.constant dense<0.000000e+00> : vector<32x32xf32>
      %48 = tpu.matmul %47, %14, %cst_24 {dimension_numbers = #tpu.dot_dimension_numbers<[1], [0], [0], [1], [0, 0, 1, 1], [], []>} : vector<32x32xbf16>, vector<32x32xbf16>, vector<32x32xf32> -> vector<32x32xf32>
      %49 = arith.addf %46, %48 : vector<32x32xf32>
      %c0_25 = arith.constant 0 : index
      %c0_26 = arith.constant 0 : index
      %50 = vector.load %arg9[%c0_25, %c0_26] : memref<32x32xf32, #tpu.memory_space<vmem>>, vector<32x32xf32>
      tpu.vector_store %arg9[%c0_25, %c0_26], %49 {strides = array<i32>} : memref<32x32xf32, #tpu.memory_space<vmem>>, vector<32x32xf32>,
      %c0_27 = arith.constant 0 : index
      %c0_28 = arith.constant 0 : index
      %51 = vector.load %arg7[%c0_27, %c0_28] : memref<32x1xf32, #tpu.memory_space<vmem>>, vector<32x1xf32>
      tpu.vector_store %arg7[%c0_27, %c0_28], %32 {strides = array<i32>} : memref<32x1xf32, #tpu.memory_space<vmem>>, vector<32x1xf32>,
    } else {
    }
    %6 = arith.cmpi eq, %arg2, %arg1 : i32
    %7 = arith.extui %6 : i1 to i32
    %c0_i32_2 = arith.constant 0 : i32
    %8 = arith.cmpi ne, %7, %c0_i32_2 : i32
    scf.if %8 {
      %c0 = arith.constant 0 : index
      %c0_3 = arith.constant 0 : index
      %9 = vector.load %arg9[%c0, %c0_3] : memref<32x32xf32, #tpu.memory_space<vmem>>, vector<32x32xf32>
      %c0_4 = arith.constant 0 : index
      %c0_5 = arith.constant 0 : index
      %10 = vector.load %arg8[%c0_4, %c0_5] : memref<32x1xf32, #tpu.memory_space<vmem>>, vector<32x1xf32>
      %11 = tpu.reciprocal %10 {approx = true} : vector<32x1xf32> -> vector<32x1xf32>
      %12 = vector.broadcast %11 : vector<32x1xf32> to vector<32x32xf32>
      %13 = arith.mulf %9, %12 : vector<32x32xf32>
      %14 = arith.truncf %13 : vector<32x32xf32> to vector<32x32xbf16>
      %c0_6 = arith.constant 0 : index
      %c0_7 = arith.constant 0 : index
      %c0_8 = arith.constant 0 : index
      %15 = vector.load %arg6[%c0_6, %c0_7, %c0_8] : memref<1x32x32xbf16, #tpu.memory_space<vmem>>, vector<1x32x32xbf16>
      %16 = vector.shape_cast %15 : vector<1x32x32xbf16> to vector<32x32xbf16>
      %17 = vector.shape_cast %14 : vector<32x32xbf16> to vector<1x32x32xbf16>
      tpu.vector_store %arg6[%c0_6, %c0_7, %c0_8], %17 {strides = array<i32>} : memref<1x32x32xbf16, #tpu.memory_space<vmem>>, vector<1x32x32xbf16>,
    } else {
    }
    return
  }
  func.func @transform_0(%arg0: i32, %arg1: i32, %arg2: i32) -> (i32, i32, i32) {
    %c0_i32 = arith.constant 0 : i32
    %c0_i32_0 = arith.constant 0 : i32
    return %arg0, %arg1, %c0_i32 : i32, i32, i32
  }
  func.func @transform_1(%arg0: i32, %arg1: i32, %arg2: i32) -> (i32, i32, i32) {
    %0 = arith.minsi %arg2, %arg1 : i32
    %c0_i32 = arith.constant 0 : i32
    %c0_i32_0 = arith.constant 0 : i32
    return %arg0, %0, %c0_i32 : i32, i32, i32
  }
  func.func @transform_2(%arg0: i32, %arg1: i32, %arg2: i32) -> (i32, i32, i32) {
    %0 = arith.minsi %arg2, %arg1 : i32
    %c0_i32 = arith.constant 0 : i32
    %c0_i32_0 = arith.constant 0 : i32
    return %arg0, %0, %c0_i32 : i32, i32, i32
  }
  func.func @transform_3(%arg0: i32, %arg1: i32, %arg2: i32) -> (i32, i32, i32) {
    %c0_i32 = arith.constant 0 : i32
    %c0_i32_0 = arith.constant 0 : i32
    return %arg0, %arg1, %c0_i32 : i32, i32, i32
  }
}

module attributes {stable_mosaic.version = 11 : i64} {
  func.func @proj_ln_mlp_kernel(%arg0: i32, %arg1: memref<64x128xbf16, #tpu.memory_space<vmem>>, %arg2: memref<64x128xbf16, #tpu.memory_space<vmem>>, %arg3: memref<128x128xbf16, #tpu.memory_space<vmem>>, %arg4: memref<1x128xf32, #tpu.memory_space<vmem>>, %arg5: memref<1x128xf32, #tpu.memory_space<vmem>>, %arg6: memref<1x128xf32, #tpu.memory_space<vmem>>, %arg7: memref<128x512xbf16, #tpu.memory_space<vmem>>, %arg8: memref<1x512xf32, #tpu.memory_space<vmem>>, %arg9: memref<512x128xbf16, #tpu.memory_space<vmem>>, %arg10: memref<1x128xf32, #tpu.memory_space<vmem>>, %arg11: memref<64x128xbf16, #tpu.memory_space<vmem>>) attributes {dimension_semantics = [#tpu.dimension_semantics<parallel>], iteration_bounds = array<i64: 1>, scalar_prefetch = 0 : i64, scratch_operands = 0 : i64, tpu.core_type = #tpu.core_type<tc>, window_params = [{transform_indices = @transform_0, window_bounds = array<i64: 64, 128>}, {transform_indices = @transform_1, window_bounds = array<i64: 64, 128>}, {pipeline_mode = #tpu.pipeline_mode<synchronous>, transform_indices = @transform_2, window_bounds = array<i64: 128, 128>}, {pipeline_mode = #tpu.pipeline_mode<synchronous>, transform_indices = @transform_3, window_bounds = array<i64: 1, 128>}, {pipeline_mode = #tpu.pipeline_mode<synchronous>, transform_indices = @transform_4, window_bounds = array<i64: 1, 128>}, {pipeline_mode = #tpu.pipeline_mode<synchronous>, transform_indices = @transform_5, window_bounds = array<i64: 1, 128>}, {pipeline_mode = #tpu.pipeline_mode<synchronous>, transform_indices = @transform_6, window_bounds = array<i64: 128, 512>}, {pipeline_mode = #tpu.pipeline_mode<synchronous>, transform_indices = @transform_7, window_bounds = array<i64: 1, 512>}, {pipeline_mode = #tpu.pipeline_mode<synchronous>, transform_indices = @transform_8, window_bounds = array<i64: 512, 128>}, {pipeline_mode = #tpu.pipeline_mode<synchronous>, transform_indices = @transform_9, window_bounds = array<i64: 1, 128>}, {transform_indices = @transform_10, window_bounds = array<i64: 64, 128>}]} {
    %c0 = arith.constant 0 : index
    %c0_0 = arith.constant 0 : index
    %0 = vector.load %arg2[%c0, %c0_0] : memref<64x128xbf16, #tpu.memory_space<vmem>>, vector<64x128xbf16>
    %c0_1 = arith.constant 0 : index
    %c0_2 = arith.constant 0 : index
    %1 = vector.load %arg3[%c0_1, %c0_2] : memref<128x128xbf16, #tpu.memory_space<vmem>>, vector<128x128xbf16>
    %cst = arith.constant dense<0.000000e+00> : vector<64x128xf32>
    %2 = tpu.matmul %0, %1, %cst {dimension_numbers = #tpu.dot_dimension_numbers<[1], [0], [0], [1], [0, 0, 1, 1], [], []>} : vector<64x128xbf16>, vector<128x128xbf16>, vector<64x128xf32> -> vector<64x128xf32>
    %c0_3 = arith.constant 0 : index
    %c0_4 = arith.constant 0 : index
    %3 = vector.load %arg4[%c0_3, %c0_4] : memref<1x128xf32, #tpu.memory_space<vmem>>, vector<1x128xf32>
    %4 = vector.broadcast %3 : vector<1x128xf32> to vector<64x128xf32>
    %5 = arith.addf %2, %4 : vector<64x128xf32>
    %c0_5 = arith.constant 0 : index
    %c0_6 = arith.constant 0 : index
    %6 = vector.load %arg1[%c0_5, %c0_6] : memref<64x128xbf16, #tpu.memory_space<vmem>>, vector<64x128xbf16>
    %7 = arith.extf %6 : vector<64x128xbf16> to vector<64x128xf32>
    %8 = arith.addf %7, %5 : vector<64x128xf32>
    %c0_7 = arith.constant 0 : index
    %c0_8 = arith.constant 0 : index
    %9 = vector.load %arg5[%c0_7, %c0_8] : memref<1x128xf32, #tpu.memory_space<vmem>>, vector<1x128xf32>
    %c0_9 = arith.constant 0 : index
    %c0_10 = arith.constant 0 : index
    %10 = vector.load %arg6[%c0_9, %c0_10] : memref<1x128xf32, #tpu.memory_space<vmem>>, vector<1x128xf32>
    %cst_11 = arith.constant dense<0.000000e+00> : vector<64xf32>
    %11 = vector.multi_reduction <add>, %8, %cst_11 [1] : vector<64x128xf32> to vector<64xf32>
    %12 = vector.shape_cast %11 : vector<64xf32> to vector<64x1xf32>
    %cst_12 = arith.constant 1.280000e+02 : f32
    %13 = vector.broadcast %cst_12 : f32 to vector<64x1xf32>
    %14 = arith.divf %12, %13 : vector<64x1xf32>
    %15 = vector.broadcast %14 : vector<64x1xf32> to vector<64x128xf32>
    %16 = arith.subf %8, %15 : vector<64x128xf32>
    %17 = arith.mulf %16, %16 : vector<64x128xf32>
    %cst_13 = arith.constant dense<0.000000e+00> : vector<64xf32>
    %18 = vector.multi_reduction <add>, %17, %cst_13 [1] : vector<64x128xf32> to vector<64xf32>
    %19 = vector.shape_cast %18 : vector<64xf32> to vector<64x1xf32>
    %cst_14 = arith.constant 1.280000e+02 : f32
    %20 = vector.broadcast %cst_14 : f32 to vector<64x1xf32>
    %21 = arith.divf %19, %20 : vector<64x1xf32>
    %22 = vector.broadcast %14 : vector<64x1xf32> to vector<64x128xf32>
    %23 = arith.subf %8, %22 : vector<64x128xf32>
    %cst_15 = arith.constant 9.99999974E-6 : f32
    %24 = vector.broadcast %cst_15 : f32 to vector<64x1xf32>
    %25 = arith.addf %21, %24 : vector<64x1xf32>
    %26 = math.rsqrt %25 : vector<64x1xf32>
    %27 = vector.broadcast %26 : vector<64x1xf32> to vector<64x128xf32>
    %28 = arith.mulf %23, %27 : vector<64x128xf32>
    %29 = vector.broadcast %9 : vector<1x128xf32> to vector<64x128xf32>
    %30 = arith.mulf %28, %29 : vector<64x128xf32>
    %31 = vector.broadcast %10 : vector<1x128xf32> to vector<64x128xf32>
    %32 = arith.addf %30, %31 : vector<64x128xf32>
    %33 = arith.truncf %32 : vector<64x128xf32> to vector<64x128xbf16>
    %c0_16 = arith.constant 0 : index
    %c0_17 = arith.constant 0 : index
    %34 = vector.load %arg7[%c0_16, %c0_17] : memref<128x512xbf16, #tpu.memory_space<vmem>>, vector<128x512xbf16>
    %cst_18 = arith.constant dense<0.000000e+00> : vector<64x512xf32>
    %35 = tpu.matmul %33, %34, %cst_18 {dimension_numbers = #tpu.dot_dimension_numbers<[1], [0], [0], [1], [0, 0, 1, 1], [], []>} : vector<64x128xbf16>, vector<128x512xbf16>, vector<64x512xf32> -> vector<64x512xf32>
    %c0_19 = arith.constant 0 : index
    %c0_20 = arith.constant 0 : index
    %36 = vector.load %arg8[%c0_19, %c0_20] : memref<1x512xf32, #tpu.memory_space<vmem>>, vector<1x512xf32>
    %37 = vector.broadcast %36 : vector<1x512xf32> to vector<64x512xf32>
    %38 = arith.addf %35, %37 : vector<64x512xf32>
    %cst_21 = arith.constant 5.000000e-01 : f32
    %39 = vector.broadcast %cst_21 : f32 to vector<64x512xf32>
    %40 = arith.mulf %39, %38 : vector<64x512xf32>
    %cst_22 = arith.constant 4.471500e-02 : f32
    %41 = vector.broadcast %cst_22 : f32 to vector<64x512xf32>
    %42 = arith.mulf %41, %38 : vector<64x512xf32>
    %43 = arith.mulf %42, %38 : vector<64x512xf32>
    %44 = arith.mulf %43, %38 : vector<64x512xf32>
    %45 = arith.addf %38, %44 : vector<64x512xf32>
    %cst_23 = arith.constant 0.797884583 : f32
    %46 = vector.broadcast %cst_23 : f32 to vector<64x512xf32>
    %47 = arith.mulf %46, %45 : vector<64x512xf32>
    %48 = math.tanh %47 : vector<64x512xf32>
    %cst_24 = arith.constant 1.000000e+00 : f32
    %49 = vector.broadcast %cst_24 : f32 to vector<64x512xf32>
    %50 = arith.addf %49, %48 : vector<64x512xf32>
    %51 = arith.mulf %40, %50 : vector<64x512xf32>
    %52 = arith.truncf %51 : vector<64x512xf32> to vector<64x512xbf16>
    %c0_25 = arith.constant 0 : index
    %c0_26 = arith.constant 0 : index
    %53 = vector.load %arg9[%c0_25, %c0_26] : memref<512x128xbf16, #tpu.memory_space<vmem>>, vector<512x128xbf16>
    %cst_27 = arith.constant dense<0.000000e+00> : vector<64x128xf32>
    %54 = tpu.matmul %52, %53, %cst_27 {dimension_numbers = #tpu.dot_dimension_numbers<[1], [0], [0], [1], [0, 0, 1, 1], [], []>} : vector<64x512xbf16>, vector<512x128xbf16>, vector<64x128xf32> -> vector<64x128xf32>
    %c0_28 = arith.constant 0 : index
    %c0_29 = arith.constant 0 : index
    %55 = vector.load %arg10[%c0_28, %c0_29] : memref<1x128xf32, #tpu.memory_space<vmem>>, vector<1x128xf32>
    %56 = vector.broadcast %55 : vector<1x128xf32> to vector<64x128xf32>
    %57 = arith.addf %54, %56 : vector<64x128xf32>
    %58 = arith.addf %8, %57 : vector<64x128xf32>
    %59 = arith.truncf %58 : vector<64x128xf32> to vector<64x128xbf16>
    %c0_30 = arith.constant 0 : index
    %c0_31 = arith.constant 0 : index
    %60 = vector.load %arg11[%c0_30, %c0_31] : memref<64x128xbf16, #tpu.memory_space<vmem>>, vector<64x128xbf16>
    tpu.vector_store %arg11[%c0_30, %c0_31], %59 {strides = array<i32>} : memref<64x128xbf16, #tpu.memory_space<vmem>>, vector<64x128xbf16>,
    return
  }
  func.func @transform_0(%arg0: i32) -> (i32, i32) {
    %c0_i32 = arith.constant 0 : i32
    %c0_i32_0 = arith.constant 0 : i32
    return %arg0, %c0_i32 : i32, i32
  }
  func.func @transform_1(%arg0: i32) -> (i32, i32) {
    %c0_i32 = arith.constant 0 : i32
    %c0_i32_0 = arith.constant 0 : i32
    return %arg0, %c0_i32 : i32, i32
  }
  func.func @transform_2(%arg0: i32) -> (i32, i32) {
    %c0_i32 = arith.constant 0 : i32
    %c0_i32_0 = arith.constant 0 : i32
    %c0_i32_1 = arith.constant 0 : i32
    return %c0_i32, %c0_i32_0 : i32, i32
  }
  func.func @transform_3(%arg0: i32) -> (i32, i32) {
    %c0_i32 = arith.constant 0 : i32
    %c0_i32_0 = arith.constant 0 : i32
    %c0_i32_1 = arith.constant 0 : i32
    return %c0_i32, %c0_i32_0 : i32, i32
  }
  func.func @transform_4(%arg0: i32) -> (i32, i32) {
    %c0_i32 = arith.constant 0 : i32
    %c0_i32_0 = arith.constant 0 : i32
    %c0_i32_1 = arith.constant 0 : i32
    return %c0_i32, %c0_i32_0 : i32, i32
  }
  func.func @transform_5(%arg0: i32) -> (i32, i32) {
    %c0_i32 = arith.constant 0 : i32
    %c0_i32_0 = arith.constant 0 : i32
    %c0_i32_1 = arith.constant 0 : i32
    return %c0_i32, %c0_i32_0 : i32, i32
  }
  func.func @transform_6(%arg0: i32) -> (i32, i32) {
    %c0_i32 = arith.constant 0 : i32
    %c0_i32_0 = arith.constant 0 : i32
    %c0_i32_1 = arith.constant 0 : i32
    return %c0_i32, %c0_i32_0 : i32, i32
  }
  func.func @transform_7(%arg0: i32) -> (i32, i32) {
    %c0_i32 = arith.constant 0 : i32
    %c0_i32_0 = arith.constant 0 : i32
    %c0_i32_1 = arith.constant 0 : i32
    return %c0_i32, %c0_i32_0 : i32, i32
  }
  func.func @transform_8(%arg0: i32) -> (i32, i32) {
    %c0_i32 = arith.constant 0 : i32
    %c0_i32_0 = arith.constant 0 : i32
    %c0_i32_1 = arith.constant 0 : i32
    return %c0_i32, %c0_i32_0 : i32, i32
  }
  func.func @transform_9(%arg0: i32) -> (i32, i32) {
    %c0_i32 = arith.constant 0 : i32
    %c0_i32_0 = arith.constant 0 : i32
    %c0_i32_1 = arith.constant 0 : i32
    return %c0_i32, %c0_i32_0 : i32, i32
  }
  func.func @transform_10(%arg0: i32) -> (i32, i32) {
    %c0_i32 = arith.constant 0 : i32
    %c0_i32_0 = arith.constant 0 : i32
    return %arg0, %c0_i32 : i32, i32
  }
}

module attributes {stable_mosaic.version = 11 : i64} {
  func.func @lnf_lmhead_kernel(%arg0: i32, %arg1: i32, %arg2: memref<64x128xbf16, #tpu.memory_space<vmem>>, %arg3: memref<1x128xf32, #tpu.memory_space<vmem>>, %arg4: memref<1x128xf32, #tpu.memory_space<vmem>>, %arg5: memref<128x512xbf16, #tpu.memory_space<vmem>>, %arg6: memref<64x512xbf16, #tpu.memory_space<vmem>>, %arg7: memref<64x128xbf16, #tpu.memory_space<vmem>>) attributes {dimension_semantics = [#tpu.dimension_semantics<parallel>, #tpu.dimension_semantics<arbitrary>], iteration_bounds = array<i64: 1, 1>, scalar_prefetch = 0 : i64, scratch_operands = 1 : i64, tpu.core_type = #tpu.core_type<tc>, window_params = [{transform_indices = @transform_0, window_bounds = array<i64: 64, 128>}, {pipeline_mode = #tpu.pipeline_mode<synchronous>, transform_indices = @transform_1, window_bounds = array<i64: 1, 128>}, {pipeline_mode = #tpu.pipeline_mode<synchronous>, transform_indices = @transform_2, window_bounds = array<i64: 1, 128>}, {transform_indices = @transform_3, window_bounds = array<i64: 128, 512>}, {transform_indices = @transform_4, window_bounds = array<i64: 64, 512>}]} {
    %c0_i32 = arith.constant 0 : i32
    %0 = arith.cmpi eq, %arg1, %c0_i32 : i32
    %1 = arith.extui %0 : i1 to i32
    %c0_i32_0 = arith.constant 0 : i32
    %2 = arith.cmpi ne, %1, %c0_i32_0 : i32
    scf.if %2 {
      %c0_6 = arith.constant 0 : index
      %c0_7 = arith.constant 0 : index
      %8 = vector.load %arg2[%c0_6, %c0_7] : memref<64x128xbf16, #tpu.memory_space<vmem>>, vector<64x128xbf16>
      %9 = arith.extf %8 : vector<64x128xbf16> to vector<64x128xf32>
      %c0_8 = arith.constant 0 : index
      %c0_9 = arith.constant 0 : index
      %10 = vector.load %arg3[%c0_8, %c0_9] : memref<1x128xf32, #tpu.memory_space<vmem>>, vector<1x128xf32>
      %c0_10 = arith.constant 0 : index
      %c0_11 = arith.constant 0 : index
      %11 = vector.load %arg4[%c0_10, %c0_11] : memref<1x128xf32, #tpu.memory_space<vmem>>, vector<1x128xf32>
      %cst_12 = arith.constant dense<0.000000e+00> : vector<64xf32>
      %12 = vector.multi_reduction <add>, %9, %cst_12 [1] : vector<64x128xf32> to vector<64xf32>
      %13 = vector.shape_cast %12 : vector<64xf32> to vector<64x1xf32>
      %cst_13 = arith.constant 1.280000e+02 : f32
      %14 = vector.broadcast %cst_13 : f32 to vector<64x1xf32>
      %15 = arith.divf %13, %14 : vector<64x1xf32>
      %16 = vector.broadcast %15 : vector<64x1xf32> to vector<64x128xf32>
      %17 = arith.subf %9, %16 : vector<64x128xf32>
      %18 = arith.mulf %17, %17 : vector<64x128xf32>
      %cst_14 = arith.constant dense<0.000000e+00> : vector<64xf32>
      %19 = vector.multi_reduction <add>, %18, %cst_14 [1] : vector<64x128xf32> to vector<64xf32>
      %20 = vector.shape_cast %19 : vector<64xf32> to vector<64x1xf32>
      %cst_15 = arith.constant 1.280000e+02 : f32
      %21 = vector.broadcast %cst_15 : f32 to vector<64x1xf32>
      %22 = arith.divf %20, %21 : vector<64x1xf32>
      %23 = vector.broadcast %15 : vector<64x1xf32> to vector<64x128xf32>
      %24 = arith.subf %9, %23 : vector<64x128xf32>
      %cst_16 = arith.constant 9.99999974E-6 : f32
      %25 = vector.broadcast %cst_16 : f32 to vector<64x1xf32>
      %26 = arith.addf %22, %25 : vector<64x1xf32>
      %27 = math.rsqrt %26 : vector<64x1xf32>
      %28 = vector.broadcast %27 : vector<64x1xf32> to vector<64x128xf32>
      %29 = arith.mulf %24, %28 : vector<64x128xf32>
      %30 = vector.broadcast %10 : vector<1x128xf32> to vector<64x128xf32>
      %31 = arith.mulf %29, %30 : vector<64x128xf32>
      %32 = vector.broadcast %11 : vector<1x128xf32> to vector<64x128xf32>
      %33 = arith.addf %31, %32 : vector<64x128xf32>
      %34 = arith.truncf %33 : vector<64x128xf32> to vector<64x128xbf16>
      %c0_17 = arith.constant 0 : index
      %c0_18 = arith.constant 0 : index
      %35 = vector.load %arg7[%c0_17, %c0_18] : memref<64x128xbf16, #tpu.memory_space<vmem>>, vector<64x128xbf16>
      tpu.vector_store %arg7[%c0_17, %c0_18], %34 {strides = array<i32>} : memref<64x128xbf16, #tpu.memory_space<vmem>>, vector<64x128xbf16>,
    } else {
    }
    %c0 = arith.constant 0 : index
    %c0_1 = arith.constant 0 : index
    %3 = vector.load %arg7[%c0, %c0_1] : memref<64x128xbf16, #tpu.memory_space<vmem>>, vector<64x128xbf16>
    %c0_2 = arith.constant 0 : index
    %c0_3 = arith.constant 0 : index
    %4 = vector.load %arg5[%c0_2, %c0_3] : memref<128x512xbf16, #tpu.memory_space<vmem>>, vector<128x512xbf16>
    %cst = arith.constant dense<0.000000e+00> : vector<64x512xf32>
    %5 = tpu.matmul %3, %4, %cst {dimension_numbers = #tpu.dot_dimension_numbers<[1], [0], [0], [1], [0, 0, 1, 1], [], []>} : vector<64x128xbf16>, vector<128x512xbf16>, vector<64x512xf32> -> vector<64x512xf32>
    %6 = arith.truncf %5 : vector<64x512xf32> to vector<64x512xbf16>
    %c0_4 = arith.constant 0 : index
    %c0_5 = arith.constant 0 : index
    %7 = vector.load %arg6[%c0_4, %c0_5] : memref<64x512xbf16, #tpu.memory_space<vmem>>, vector<64x512xbf16>
    tpu.vector_store %arg6[%c0_4, %c0_5], %6 {strides = array<i32>} : memref<64x512xbf16, #tpu.memory_space<vmem>>, vector<64x512xbf16>,
    return
  }
  func.func @transform_0(%arg0: i32, %arg1: i32) -> (i32, i32) {
    %c0_i32 = arith.constant 0 : i32
    %c0_i32_0 = arith.constant 0 : i32
    return %arg0, %c0_i32 : i32, i32
  }
  func.func @transform_1(%arg0: i32, %arg1: i32) -> (i32, i32) {
    %c0_i32 = arith.constant 0 : i32
    %c0_i32_0 = arith.constant 0 : i32
    %c0_i32_1 = arith.constant 0 : i32
    return %c0_i32, %c0_i32_0 : i32, i32
  }
  func.func @transform_2(%arg0: i32, %arg1: i32) -> (i32, i32) {
    %c0_i32 = arith.constant 0 : i32
    %c0_i32_0 = arith.constant 0 : i32
    %c0_i32_1 = arith.constant 0 : i32
    return %c0_i32, %c0_i32_0 : i32, i32
  }
  func.func @transform_3(%arg0: i32, %arg1: i32) -> (i32, i32) {
    %c0_i32 = arith.constant 0 : i32
    %c0_i32_0 = arith.constant 0 : i32
    return %c0_i32, %arg1 : i32, i32
  }
  func.func @transform_4(%arg0: i32, %arg1: i32) -> (i32, i32) {
    %c0_i32 = arith.constant 0 : i32
    return %arg0, %arg1 : i32, i32
  }
}

</mosaic_0001>

<bundles_post_ra>
// kernel: tt_gpt_forward.8
= control target key start
LH: loop header
LB: loop body
LE: loop exit
PB: predicated region body
PF: predicated region fallthrough
CT: control target
= control target key end

     0   :  { %s937_s12 = smov 0   ;;  %s939_s13 = smov 0   ;;  %s1032_s0 = inlined_call_operand.vmem [shape: bf16[8,32,32], index: 0, kind: input, shape index: {}]   ;;  %s1033_s1 = inlined_call_operand.vmem [shape: bf16[8,32,32], index: 1, kind: input, shape index: {}]   ;;  %s1034_s2 = inlined_call_operand.vmem [shape: bf16[8,32,32], index: 2, kind: input, shape index: {}]   ;;  %s1035_s3 = inlined_call_operand.vmem [shape: bf16[8,32,32], index: 3, kind: output, shape index: {}]  }
   0x1   :  { %s941_s14 = smov 0  }
   0x2 LB: > { %s32_s15 = sadd.s32 1, %s908_s13  ;;  %p783_p0 = scmp.ge.s32.totalorder %s912_s14, 1  ;;  %s912_s14 = sphi %s941_s14, %s13_s14   ;;  %s908_s13 = sphi %s939_s13, %s1037_s13   ;;  %s904_s12 = sphi %s937_s12, %s1036_s12  }
   0x3   : > { %p34_p1 = scmp.ge.s32.totalorder %s32_s15, 8  ;;  %p215_p2 = scmp.lt.s32.totalorder %s912_s14, 9 }
   0x5   : > { %s1039_s15 = smov (%p34_p1, %s32_s15), 0  ;;  %p216_p3 = pnand %p783_p0, %p215_p2 }
   0x6   : > { %p270_p4 = scmp.lt.s32.totalorder (!%p216_p3), %s904_s12, 7 }
   0x7   : > { %219 = sbr.rel (%p216_p3) target bundleno = 709 (0x2c5), region = 32 }
   0xc   : > { %s1041_s12 = smov (!%p270_p4, %s904_s12), 7  ;;  %vm331_vm0 = vcmask 261120   ;;  %vm322_vm1 = vcmask 7168   ;;  %v914_v6 = vmov -inf   ;;  %v409_v7 = vlaneseq }
   0xd   : > { %s955_s16 = sshll.u32 %s1041_s12, 4  ;;  %323 = vst.msk [vmem:[#allocation2] sm:$0xff] %vm322_vm1, %v914_v6  ;;  %v915_v29 = vmov 0   ;;  %v916_v30 = vmov 0.0   ;;  %vm648_vm6 = vcmask 257024  }
   0xe   : > { %s289_s19 = scalar_lea.vmem %s1033_s1, %s955_s16  ;;  %s277_s22 = scalar_lea.vmem %s1032_s0, %s955_s16  ;;  %324 = vst.msk [vmem:[#allocation2 + $0x8] sm:$0xff] %vm322_vm1, %v914_v6  ;;  %v410_v8 = vshrl.u32 %v409_v7, 7  ;;  %v421_v9 = vand.u32 127, %v409_v7  ;;  %864 = vset.pattern.permute.xlu0 %v915_v29  ;;  %863 = vset.pattern.permute.xlu2 %v915_v29 }
   0xf   : > { %v829_v0 = vld [vmem:[%s289_s19 + $0x8] sm:$0xff]  ;;  %v828_v2 = vld [vmem:[%s289_s19] sm:$0xff]  ;;  %325 = vst.msk [vmem:[#allocation2 + $0x10] sm:$0xff] %vm322_vm1, %v914_v6  ;;  %865 = vset.pattern.permute.xlu1 %v915_v29  ;;  %s303_s25 = scalar_lea.vmem %s1034_s2, %s955_s16  ;;  %s315_s28 = scalar_lea.vmem %s1035_s3, %s955_s16 }
  0x10   : > { %v383_v1 = vsel %vm331_vm0, %v829_v0, 0  ;;  %v380_v3 = vsel %vm331_vm0, %v828_v2, 0  ;;  %v826_v4 = vld [vmem:[%s277_s22] sm:$0xff]  ;;  %v827_v5 = vld [vmem:[%s277_s22 + $0x8] sm:$0xff]  ;;  %326 = vst.msk [vmem:[#allocation2 + $0x18] sm:$0xff] %vm322_vm1, %v914_v6  ;;  %vm424_vm2 = vcmp.ge.s32.totalorder %v410_v8, %v421_v9  ;;  %v412_v12 = vadd.s32 16, %v410_v8 }
  0x11   : > { %391 = vmatpush.bf16.xpose.msra.mxu0 %v383_v1  ;;  %832 = vmatpush.bf16.xpose.msra.mxu2 %v383_v1  ;;  %v411_v15 = vadd.s32 8, %v410_v8  ;;  %v413_v22 = vadd.s32 24, %v410_v8  ;;  %329 = vst.msk [vmem:[#allocation3 + $0x10] sm:$0xff] %vm322_vm1, %v916_v30  ;;  %v831_v47 = vld [vmem:[%s303_s25 + $0x8] sm:$0xff]  ;;  %v830_v48 = vld [vmem:[%s303_s25] sm:$0xff] }
  0x12   : > { %vm426_vm3 = vcmp.ge.s32.totalorder %v412_v12, %v421_v9  ;;  %327 = vst.msk [vmem:[#allocation3] sm:$0xff] %vm322_vm1, %v916_v30  ;;  %834 = vmatpush.bf16.msra.mxu3 %v831_v47  ;;  %579 = vmatpush.bf16.msra.mxu1 %v831_v47 }
  0x13   : > { %vm425_vm4 = vcmp.ge.s32.totalorder %v411_v15, %v421_v9  ;;  %vm427_vm5 = vcmp.ge.s32.totalorder %v413_v22, %v421_v9  ;;  %328 = vst.msk [vmem:[#allocation3 + $0x8] sm:$0xff] %vm322_vm1, %v916_v30 }
  0x14   : > { %330 = vst.msk [vmem:[#allocation3 + $0x18] sm:$0xff] %vm322_vm1, %v916_v30  ;;  %v432_v31 = vld [vmem:[#allocation2] sm:$0xff] }
  0x15   : > { %332 = vst.msk [vmem:[#allocation4] sm:$0xff] %vm331_vm0, %v916_v30  ;;  %v433_v37 = vld [vmem:[#allocation2 + $0x8] sm:$0xff] }
  0x16   : > { %333 = vst.msk [vmem:[#allocation4 + $0x8] sm:$0xff] %vm331_vm0, %v916_v30  ;;  %v434_v35 = vld [vmem:[#allocation2 + $0x10] sm:$0xff]  ;;  %835 = vmatpush.bf16.msra.mxu3 %v830_v48  ;;  %580 = vmatpush.bf16.msra.mxu1 %v830_v48 }
  0x17   : > { %334 = vst.msk [vmem:[#allocation4 + $0x10] sm:$0xff] %vm331_vm0, %v916_v30  ;;  %v435_v43 = vld [vmem:[#allocation2 + $0x18] sm:$0xff] }
  0x18   : > { %335 = vst.msk [vmem:[#allocation4 + $0x18] sm:$0xff] %vm331_vm0, %v916_v30 }
  0x19   : > { %392 = vmatpush.bf16.xpose.msra.mxu0 %v380_v3  ;;  %833 = vmatpush.bf16.xpose.msra.mxu2 %v380_v3 }
  0x1b   : > { %v499_v48 = vld [vmem:[#allocation3 + $0x18] sm:$0xff] }
  0x20   : > { %808 = vmatmul.msk.bf16.vlgmr.msra.gmra.mxu0 %vm331_vm0, %v826_v4  ;;  %809 = vmatmul.msk.bf16.vlgmr.msra.gmra.mxu2 %vm331_vm0, %v827_v5 }
  0x9d   : > { %v394_v10 = vpop.f32.mrf.mxu0 }
  0x9e   : > { %v404_v11 = vmul.f32 0.17677669, %v394_v10 }
  0xa0   : > { %v973_v13 = vsel %vm424_vm2, %v404_v11, -1e+30 }
  0xa1   : > { %v436_v14 = vsel %vm331_vm0, %v973_v13, -inf }
  0xa2   : > { %437 = vmax.xlane.f32.xlu1 %v436_v14  ;;  %v498_v14 = vld [vmem:[#allocation3 + $0x10] sm:$0xff] }
  0xa3   : > { %v399_v16 = vpop.f32.mrf.mxu2 }
  0xa4   : > { %v406_v17 = vmul.f32 0.17677669, %v399_v16 }
  0xa5   : > { %v396_v18 = vpop.f32.mrf.mxu0 }
  0xa6   : > { %v405_v19 = vmul.f32 0.17677669, %v396_v18  ;;  %v430_v20 = vsel %vm426_vm3, %v406_v17, -1e+30 }
  0xa7   : > { %v442_v21 = vsel %vm331_vm0, %v430_v20, -inf }
  0xa8   : > { %443 = vmax.xlane.f32.xlu0 %v442_v21  ;;  %v978_v23 = vsel %vm425_vm4, %v405_v19, -1e+30 }
  0xa9   : > { %v439_v24 = vsel %vm331_vm0, %v978_v23, -inf }
  0xaa   : > { %440 = vmax.xlane.f32.xlu1 %v439_v24 }
  0xab   : > { %v401_v25 = vpop.f32.mrf.mxu2 }
  0xac   : > { %v407_v26 = vmul.f32 0.17677669, %v401_v25  ;;  %v497_v25 = vld [vmem:[#allocation3 + $0x8] sm:$0xff] }
  0xae   : > { %v431_v27 = vsel %vm427_vm5, %v407_v26, -1e+30 }
  0xaf   : > { %v445_v28 = vsel %vm331_vm0, %v431_v27, -inf }
  0xb0   : > { %446 = vmax.xlane.f32.xlu0 %v445_v28 }
 0x115   : > { %v438_v32 = vpop.xlane.xlu1 %437 }
 0x116   : > { %v448_v33 = vmax.f32 %v432_v31, %v438_v32  ;;  %v525_v32 = vld [vmem:[#allocation4] sm:$0xff] }
 0x118   : > { %v452_v34 = vsub.f32 %v432_v31, %v448_v33  ;;  %600 = vst.msk [vmem:[#allocation2] sm:$0xff] %vm322_vm1, %v448_v33  ;;  %466 = vperm.xlu0 %864, %v448_v33   ;;  %v527_v31 = vld [vmem:[#allocation4 + $0x10] sm:$0xff] }
 0x11a   : > { %v456_v6 = vmul.f32 1.442695, %v452_v34 }
 0x11b   : > { %v444_v36 = vpop.xlane.xlu0 %443 }
 0x11c   : > { %v450_v38 = vmax.f32 %v434_v35, %v444_v36 }
 0x11d   : > { %v441_v39 = vpop.xlane.xlu1 %440 }
 0x11e   : > { %v454_v40 = vsub.f32 %v434_v35, %v450_v38  ;;  %602 = vst.msk [vmem:[#allocation2 + $0x10] sm:$0xff] %vm322_vm1, %v450_v38  ;;  %v449_v41 = vmax.f32 %v433_v37, %v441_v39  ;;  %476 = vperm.xlu2 %863, %v450_v38  }
 0x120   : > { %v453_v42 = vsub.f32 %v433_v37, %v449_v41  ;;  %601 = vst.msk [vmem:[#allocation2 + $0x8] sm:$0xff] %vm322_vm1, %v449_v41  ;;  %471 = vperm.xlu1 %865, %v449_v41   ;;  %v460_v7 = vmul.f32 1.442695, %v454_v40 }
 0x122   : > { %v458_v8 = vmul.f32 1.442695, %v453_v42 }
 0x123   : > { %v447_v44 = vpop.xlane.xlu0 %446 }
 0x124   : > { %v451_v45 = vmax.f32 %v435_v43, %v447_v44 }
 0x126   : > { %v455_v46 = vsub.f32 %v435_v43, %v451_v45  ;;  %603 = vst.msk [vmem:[#allocation2 + $0x18] sm:$0xff] %vm322_vm1, %v451_v45  ;;  %481 = vperm.xlu2 %863, %v451_v45   ;;  %v526_v43 = vld [vmem:[#allocation4 + $0x8] sm:$0xff] }
 0x178   : > { %v477_v49 = vpop.permute.xlu2 %476 }
 0x179   : > { %v486_v50 = vsub.f32 %v430_v20, %v477_v49  ;;  %v496_v20 = vld [vmem:[#allocation3] sm:$0xff] }
 0x17b   : > { %v492_v51 = vmul.f32 1.442695, %v486_v50 }
 0x17d   : > { %866 = vpow2.f32 %v492_v51 }
 0x180   : > { %v482_v52 = vpop.permute.xlu2 %481 }
 0x181   : > { %v487_v53 = vsub.f32 %v431_v27, %v482_v52  ;;  %v528_v52 = vld [vmem:[#allocation4 + $0x18] sm:$0xff] }
 0x183   : > { %v867_v54 = vpop.eup %866  ;;  %v494_v55 = vmul.f32 1.442695, %v487_v53 }
 0x184   : > { %v510_v56 = vsel %vm331_vm0, %v867_v54, 0.0 }
 0x185   : > { %868 = vpow2.f32 %v494_v55  ;;  %511 = vadd.xlane.f32.xlu0 %v510_v56 }
 0x18a   : > { %v467_v57 = vpop.permute.xlu0 %466 }
 0x18b   : > { %v869_v58 = vpop.eup %868  ;;  %v484_v59 = vsub.f32 %v973_v13, %v467_v57  ;;  %v462_v13 = vmul.f32 1.442695, %v455_v46 }
 0x18c   : > { %v554_v60 = vpack.c.bf16 %v869_v58, %v867_v54  ;;  %v513_v12 = vsel %vm331_vm0, %v869_v58, 0.0 }
 0x18d   : > { %v488_v61 = vmul.f32 1.442695, %v484_v59 }
 0x18e   : > { %819 = vmatmul.msk.bf16.vlgmr.msra.gmra.mxu3 %vm331_vm0, %v554_v60 }
 0x18f   : > { %870 = vpow2.f32 %v488_v61 }
 0x192   : > { %v472_v62 = vpop.permute.xlu1 %471 }
 0x193   : > { %v485_v63 = vsub.f32 %v978_v23, %v472_v62 }
 0x195   : > { %v871_v0 = vpop.eup %870  ;;  %v490_v1 = vmul.f32 1.442695, %v485_v63 }
 0x196   : > { %v504_v2 = vsel %vm331_vm0, %v871_v0, 0.0 }
 0x197   : > { %872 = vpow2.f32 %v490_v1  ;;  %505 = vadd.xlane.f32.xlu2 %v504_v2 }
 0x198   : > { %874 = vpow2.f32 %v456_v6 }
 0x199   : > { %876 = vpow2.f32 %v460_v7 }
 0x19a   : > { %878 = vpow2.f32 %v458_v8 }
 0x19b   : > { %880 = vpow2.f32 %v462_v13 }
 0x19d   : > { %v873_v3 = vpop.eup %872 }
 0x19e   : > { %v507_v4 = vsel %vm331_vm0, %v873_v3, 0.0  ;;  %v553_v5 = vpack.c.bf16 %v873_v3, %v871_v0  ;;  %v875_v9 = vpop.eup %874 }
 0x19f   : > { %508 = vadd.xlane.f32.xlu1 %v507_v4  ;;  %v877_v10 = vpop.eup %876  ;;  %v500_v22 = vmul.f32 %v875_v9, %v496_v20 }
 0x1a0   : > { %818 = vmatmul.msk.bf16.vlgmr.msra.gmra.mxu1 %vm331_vm0, %v553_v5  ;;  %v879_v11 = vpop.eup %878  ;;  %v502_v16 = vmul.f32 %v877_v10, %v498_v14 }
 0x1a1   : > { %v881_v15 = vpop.eup %880  ;;  %v501_v26 = vmul.f32 %v879_v11, %v497_v25 }
 0x1a2   : > { %v503_v49 = vmul.f32 %v881_v15, %v499_v48 }
 0x1af   : > { %531 = vperm.xlu2 %863, %v875_v9  }
 0x1b7   : > { %541 = vperm.xlu2 %863, %v877_v10  }
 0x1b8   : > { %536 = vperm.xlu1 %865, %v879_v11  }
 0x1e0   : > { %514 = vadd.xlane.f32.xlu2 %v513_v12 }
 0x1f8   : > { %v512_v17 = vpop.xlane.xlu0 %511  ;;  %546 = vperm.xlu2 %863, %v881_v15  }
 0x1f9   : > { %v518_v18 = vadd.f32 %v512_v17, %v502_v16 }
 0x1fb   : > { %523 = vst.msk [vmem:[#allocation3 + $0x10] sm:$0xff] %vm322_vm1, %v518_v18 }
 0x202   : > { %v614_v19 = vld [vmem:[#allocation3 + $0x10] sm:$0xff] }
 0x203   : > { %882 = vrcp.f32 %v614_v19 }
 0x209   : > { %v883_v21 = vpop.eup %882 }
 0x20a   : > { %v506_v23 = vpop.xlane.xlu2 %505  ;;  %632 = vperm.xlu1 %865, %v883_v21  }
 0x20b   : > { %v516_v24 = vadd.f32 %v506_v23, %v500_v22 }
 0x20d   : > { %521 = vst.msk [vmem:[#allocation3] sm:$0xff] %vm322_vm1, %v516_v24 }
 0x211   : > { %v587_v36 = vpop.f32.mrf.mxu3 }
 0x212   : > { %v532_v27 = vpop.permute.xlu2 %531  ;;  %v509_v28 = vpop.xlane.xlu1 %508 }
 0x213   : > { %v517_v29 = vadd.f32 %v509_v28, %v501_v26  ;;  %v549_v37 = vmul.f32 %v532_v27, %v525_v32 }
 0x214   : > { %v612_v30 = vld [vmem:[#allocation3] sm:$0xff] }
 0x215   : > { %522 = vst.msk [vmem:[#allocation3 + $0x8] sm:$0xff] %vm322_vm1, %v517_v29  ;;  %884 = vrcp.f32 %v612_v30 }
 0x219   : > { %v589_v55 = vpop.f32.mrf.mxu3 }
 0x21a   : > { %v542_v33 = vpop.permute.xlu2 %541 }
 0x21b   : > { %v885_v34 = vpop.eup %884  ;;  %v551_v35 = vmul.f32 %v542_v33, %v527_v31 }
 0x21c   : > { %622 = vperm.xlu0 %864, %v885_v34   ;;  %v613_v38 = vld [vmem:[#allocation3 + $0x8] sm:$0xff] }
 0x21d   : > { %v594_v39 = vadd.f32 %v587_v36, %v551_v35  ;;  %v582_v40 = vpop.f32.mrf.mxu1  ;;  %886 = vrcp.f32 %v613_v38 }
 0x21e   : > { %v592_v41 = vadd.f32 %v582_v40, %v549_v37 }
 0x21f   : > { %598 = vst.msk [vmem:[#allocation4 + $0x10] sm:$0xff] %vm331_vm0, %v594_v39 }
 0x220   : > { %596 = vst.msk [vmem:[#allocation4] sm:$0xff] %vm331_vm0, %v592_v41 }
 0x223   : > { %v887_v42 = vpop.eup %886 }
 0x224   : > { %627 = vperm.xlu2 %863, %v887_v42  }
 0x225   : > { %v584_v46 = vpop.f32.mrf.mxu1 }
 0x226   : > { %v610_v59 = vld [vmem:[#allocation4 + $0x10] sm:$0xff] }
 0x227   : > { %v608_v4 = vld [vmem:[#allocation4] sm:$0xff] }
 0x22a   : > { %v537_v44 = vpop.permute.xlu1 %536 }
 0x22b   : > { %v550_v45 = vmul.f32 %v537_v44, %v526_v43 }
 0x22d   : > { %v593_v47 = vadd.f32 %v584_v46, %v550_v45 }
 0x22f   : > { %597 = vst.msk [vmem:[#allocation4 + $0x8] sm:$0xff] %vm331_vm0, %v593_v47 }
 0x236   : > { %v609_v62 = vld [vmem:[#allocation4 + $0x8] sm:$0xff] }
 0x253   : > { %v515_v50 = vpop.xlane.xlu2 %514 }
 0x254   : > { %v519_v51 = vadd.f32 %v515_v50, %v503_v49 }
 0x256   : > { %524 = vst.msk [vmem:[#allocation3 + $0x18] sm:$0xff] %vm322_vm1, %v519_v51 }
 0x25b   : > { %v547_v53 = vpop.permute.xlu2 %546 }
 0x25c   : > { %v552_v54 = vmul.f32 %v547_v53, %v528_v52 }
 0x25d   : > { %v615_v56 = vld [vmem:[#allocation3 + $0x18] sm:$0xff] }
 0x25e   : > { %v595_v57 = vadd.f32 %v589_v55, %v552_v54  ;;  %888 = vrcp.f32 %v615_v56 }
 0x260   : > { %599 = vst.msk [vmem:[#allocation4 + $0x18] sm:$0xff] %vm331_vm0, %v595_v57 }
 0x264   : > { %v889_v58 = vpop.eup %888 }
 0x265   : > { %637 = vperm.xlu2 %863, %v889_v58  }
 0x267   : > { %v611_v7 = vld [vmem:[#allocation4 + $0x18] sm:$0xff] }
 0x27c   : > { %v633_v60 = vpop.permute.xlu1 %632 }
 0x27d   : > { %v642_v61 = vmul.f32 %v633_v60, %v610_v59 }
 0x27e   : > { %v628_v63 = vpop.permute.xlu2 %627 }
 0x27f   : > { %v646_v0 = vpack.c.bf16 %v642_v61, %v642_v61  ;;  %v641_v1 = vmul.f32 %v628_v63, %v609_v62 }
 0x281   : > { %651 = vst.msk [vmem:[%s315_s28 + $0x8] sm:$0xf] %vm648_vm6, %v646_v0  ;;  %v645_v2 = vpack.c.bf16 %v641_v1, %v641_v1 }
 0x283   : > { %650 = vst.msk [vmem:[%s315_s28 + $0x4] sm:$0xf] %vm648_vm6, %v645_v2 }
 0x28e   : > { %v623_v3 = vpop.permute.xlu0 %622 }
 0x28f   : > { %v640_v5 = vmul.f32 %v623_v3, %v608_v4 }
 0x291   : > { %v644_v6 = vpack.c.bf16 %v640_v5, %v640_v5 }
 0x293   : > { %649 = vst.msk [vmem:[%s315_s28] sm:$0xf] %vm648_vm6, %v644_v6 }
 0x2bf   : > { %v638_v8 = vpop.permute.xlu2 %637 }
 0x2c0   : > { %v643_v9 = vmul.f32 %v638_v8, %v611_v7 }
 0x2c2   : > { %v647_v10 = vpack.c.bf16 %v643_v9, %v643_v9 }
 0x2c4   : > { %652 = vst.msk [vmem:[%s315_s28 + $0xc] sm:$0xf] %vm648_vm6, %v647_v10 }
 0x2c5 PF: > { %s13_s14 = sadd.s32 1, %s912_s14   ;;  %s1036_s12 = smov %s908_s13 }
 0x2c6   : > { %p10_p5 = scmp.ge.s32.totalorder %s13_s14, 10   ;;  %s1037_s13 = smov %s1039_s15 }
 0x2c8   :  { %12 = sbr.rel (!%p10_p5) target bundleno = 2 (0x2), region = 80 }

// kernel: tt_gpt_forward.7
= control target key start
LH: loop header
LB: loop body
LE: loop exit
PB: predicated region body
PF: predicated region fallthrough
CT: control target
= control target key end

     0   :  { %v690_v11 = vmov 128.0   ;;  %s1055_s0 = inlined_call_operand.vmem [shape: bf16[64,128], index: 0, kind: input, shape index: {}]   ;;  %s1056_s1 = inlined_call_operand.vmem [shape: f32[1,128], index: 1, kind: input, shape index: {}]   ;;  %s1057_s2 = inlined_call_operand.vmem [shape: f32[1,128], index: 2, kind: input, shape index: {}]   ;;  %s1058_s3 = inlined_call_operand.vmem [shape: bf16[128,384], index: 3, kind: input, shape index: {}]   ;;  %s1059_s4 = inlined_call_operand.vmem [shape: f32[1,384], index: 4, kind: input, shape index: {}]   ;;  %s1060_s5 = inlined_call_operand.vmem [shape: bf16[64,384], index: 5, kind: output, shape index: {}]  }
   0x1   :  { %v659_v0 = vld [vmem:[%s1055_s0 + $0x10] sm:$0xff]   ;;  %v658_v1 = vld [vmem:[%s1055_s0 + $0x8] sm:$0xff]   ;;  %v643_v2 = vld [vmem:[%s1055_s0] sm:$0xff]   ;;  %672 = vrcp.f32 %v690_v11 }
   0x2   :  { %v652_v3 = vunpack.c.l.bf16 %v659_v0  ;;  %v648_v4 = vunpack.c.l.bf16 %v658_v1  ;;  %v644_v5 = vunpack.c.l.bf16 %v643_v2  ;;  %v653_v6 = vunpack.c.h.bf16 %v659_v0  ;;  %v733_v9 = vld [vmem:[%s1055_s0 + $0x18] sm:$0xff]   ;;  %v608_v47 = vld [vmem:[%s1058_s3 + $0xa8] sm:$0xf]  ;;  %v640_v48 = vld [vmem:[%s1058_s3 + $0xb0] sm:$0xf0] }
   0x3   :  { %v649_v7 = vunpack.c.h.bf16 %v658_v1  ;;  %v645_v8 = vunpack.c.h.bf16 %v643_v2  ;;  %v656_v10 = vunpack.c.l.bf16 %v733_v9  ;;  %v657_v33 = vunpack.c.h.bf16 %v733_v9  ;;  %v639_v49 = vld [vmem:[%s1058_s3 + $0xac] sm:$0xf]  ;;  %v610_v51 = vld [vmem:[%s1058_s3 + $0xb4] sm:$0xf0]  ;;  %v616_v52 = vld [vmem:[%s1058_s3 + $0xb0] sm:$0xf] }
   0x4   :  { %46 = vadd.xlane.f32.xlu2 %v652_v3  ;;  %42 = vadd.xlane.f32.xlu1 %v648_v4  ;;  %v609_v50 = vor.u32 %v640_v48, %v608_v47  ;;  %v641_v53 = vld [vmem:[%s1058_s3 + $0xb8] sm:$0xf0]  ;;  %v613_v54 = vor.u32 %v639_v49, %v610_v51  ;;  %v596_v56 = vld [vmem:[%s1058_s3 + $0x90] sm:$0xf]  ;;  %v636_v58 = vld [vmem:[%s1058_s3 + $0x94] sm:$0xf] }
   0x5   :  { %38 = vadd.xlane.f32.xlu0 %v644_v5  ;;  %v617_v55 = vor.u32 %v641_v53, %v616_v52  ;;  %v637_v57 = vld [vmem:[%s1058_s3 + $0x98] sm:$0xf0]  ;;  %v598_v60 = vld [vmem:[%s1058_s3 + $0x9c] sm:$0xf0]  ;;  %v604_v61 = vld [vmem:[%s1058_s3 + $0x98] sm:$0xf] }
   0x6   :  { %399 = vmatpush.bf16.msra.mxu0 %v609_v50  ;;  %661 = vmatpush.bf16.msra.mxu3 %v609_v50  ;;  %v597_v59 = vor.u32 %v637_v57, %v596_v56  ;;  %v638_v62 = vld [vmem:[%s1058_s3 + $0xa0] sm:$0xf0]  ;;  %v601_v63 = vor.u32 %v636_v58, %v598_v60  ;;  %v584_v1 = vld [vmem:[%s1058_s3 + $0x78] sm:$0xf]  ;;  %v572_v11 = vld [vmem:[%s1058_s3 + $0x60] sm:$0xf] }
   0x7   :  { %v673_v12 = vpop.eup %672  ;;  %428 = vmatpush.bf16.msra.mxu1 %v613_v54  ;;  %457 = vmatpush.bf16.msra.mxu2 %v617_v55  ;;  %v605_v0 = vor.u32 %v638_v62, %v604_v61  ;;  %v634_v2 = vld [vmem:[%s1058_s3 + $0x80] sm:$0xf0]  ;;  %v536_v47 = vld [vmem:[%s1058_s3 + $0x18] sm:$0xf]  ;;  %v621_v49 = vld [vmem:[%s1058_s3 + $0x1c] sm:$0xf] }
   0x8   :  { %v55_v13 = vmul.f32 128.0, %v673_v12  ;;  %vm59_vm0 = vweird.f32 %v673_v12  ;;  %v622_v48 = vld [vmem:[%s1058_s3 + $0x20] sm:$0xf0]  ;;  %v538_v51 = vld [vmem:[%s1058_s3 + $0x24] sm:$0xf0] }
   0x9   :  { %v537_v50 = vor.u32 %v622_v48, %v536_v47  ;;  %v544_v52 = vld [vmem:[%s1058_s3 + $0x20] sm:$0xf]  ;;  %v623_v53 = vld [vmem:[%s1058_s3 + $0x28] sm:$0xf0]  ;;  %v541_v55 = vor.u32 %v621_v49, %v538_v51  ;;  %v618_v60 = vld [vmem:[%s1058_s3 + $0x4] sm:$0xf] }
   0xa   :  { %v56_v14 = vsub.f32 1.0, %v55_v13  ;;  %400 = vmatpush.bf16.msra.mxu0 %v597_v59  ;;  %662 = vmatpush.bf16.msra.mxu3 %v597_v59  ;;  %v630_v13 = vld [vmem:[%s1058_s3 + $0x64] sm:$0xf]  ;;  %v545_v56 = vor.u32 %v623_v53, %v544_v52  ;;  %v524_v58 = vld [vmem:[%s1058_s3] sm:$0xf] }
   0xb   :  { %429 = vmatpush.bf16.msra.mxu1 %v601_v63  ;;  %458 = vmatpush.bf16.msra.mxu2 %v605_v0  ;;  %v619_v59 = vld [vmem:[%s1058_s3 + $0x8] sm:$0xf0]  ;;  %v526_v63 = vld [vmem:[%s1058_s3 + $0xc] sm:$0xf0]  ;;  %v532_v0 = vld [vmem:[%s1058_s3 + $0x8] sm:$0xf] }
   0xc   :  { %48 = vadd.xlane.f32.xlu2 %v653_v6  ;;  %44 = vadd.xlane.f32.xlu1 %v649_v7  ;;  %v57_v15 = vmul.f32 %v673_v12, %v56_v14  ;;  %v525_v62 = vor.u32 %v619_v59, %v524_v58 }
   0xd   :  { %40 = vadd.xlane.f32.xlu0 %v645_v8 }
   0xe   :  { %v58_v16 = vadd.f32 %v673_v12, %v57_v15  ;;  %v574_v15 = vld [vmem:[%s1058_s3 + $0x6c] sm:$0xf0] }
  0x10   :  { %v736_v17 = vsel %vm59_vm0, %v673_v12, %v58_v16  ;;  %v631_v12 = vld [vmem:[%s1058_s3 + $0x68] sm:$0xf0]  ;;  %v580_v16 = vld [vmem:[%s1058_s3 + $0x68] sm:$0xf] }
  0x11   :  { %v573_v14 = vor.u32 %v631_v12, %v572_v11 }
  0x14   :  { %50 = vadd.xlane.f32.xlu2 %v656_v10 }
  0x77   :  { %v47_v18 = vpop.xlane.xlu2 %46  ;;  %v43_v19 = vpop.xlane.xlu1 %42 }
  0x78   :  { %v39_v20 = vpop.xlane.xlu0 %38  ;;  %v65_v30 = vmul.f32 %v736_v17, %v47_v18  ;;  %v63_v31 = vmul.f32 %v736_v17, %v43_v19  ;;  %v632_v18 = vld [vmem:[%s1058_s3 + $0x70] sm:$0xf0]  ;;  %v577_v19 = vor.u32 %v630_v13, %v574_v15 }
  0x79   :  { %v61_v21 = vmul.f32 %v736_v17, %v39_v20  ;;  %v581_v20 = vor.u32 %v632_v18, %v580_v16 }
  0x7a   :  { %v756_v36 = vsub.f32 %v652_v3, %v65_v30  ;;  %v758_v37 = vsub.f32 %v648_v4, %v63_v31  ;;  %v633_v3 = vld [vmem:[%s1058_s3 + $0x7c] sm:$0xf]  ;;  %v585_v4 = vor.u32 %v634_v2, %v584_v1  ;;  %v529_v1 = vor.u32 %v618_v60, %v526_v63  ;;  %v620_v2 = vld [vmem:[%s1058_s3 + $0x10] sm:$0xf0] }
  0x7b   :  { %v739_v22 = vsub.f32 %v644_v5, %v61_v21  ;;  %v586_v5 = vld [vmem:[%s1058_s3 + $0x84] sm:$0xf0] }
  0x7c   :  { %v81_v42 = vmul.f32 %v756_v36, %v756_v36  ;;  %v79_v43 = vmul.f32 %v758_v37, %v758_v37  ;;  %401 = vmatpush.bf16.msra.mxu0 %v585_v4  ;;  %663 = vmatpush.bf16.msra.mxu3 %v585_v4  ;;  %v560_v21 = vld [vmem:[%s1058_s3 + $0x48] sm:$0xf] }
  0x7d   :  { %v77_v23 = vmul.f32 %v739_v22, %v739_v22 }
  0x7f   :  { %85 = vadd.xlane.f32.xlu0 %v77_v23  ;;  %v49_v24 = vpop.xlane.xlu2 %48  ;;  %v45_v25 = vpop.xlane.xlu1 %44  ;;  %v628_v23 = vld [vmem:[%s1058_s3 + $0x50] sm:$0xf0] }
  0x80   :  { %v64_v26 = vmul.f32 %v736_v17, %v45_v25  ;;  %v41_v27 = vpop.xlane.xlu0 %40  ;;  %v66_v41 = vmul.f32 %v736_v17, %v49_v24  ;;  %402 = vmatpush.bf16.msra.mxu0 %v573_v14  ;;  %664 = vmatpush.bf16.msra.mxu3 %v573_v14  ;;  %v627_v24 = vld [vmem:[%s1058_s3 + $0x4c] sm:$0xf]  ;;  %v561_v25 = vor.u32 %v628_v23, %v560_v21 }
  0x81   :  { %v62_v28 = vmul.f32 %v736_v17, %v41_v27  ;;  %v568_v27 = vld [vmem:[%s1058_s3 + $0x50] sm:$0xf] }
  0x82   :  { %v745_v29 = vsub.f32 %v649_v7, %v64_v26  ;;  %v772_v45 = vsub.f32 %v653_v6, %v66_v41  ;;  %v592_v6 = vld [vmem:[%s1058_s3 + $0x80] sm:$0xf]  ;;  %v635_v7 = vld [vmem:[%s1058_s3 + $0x88] sm:$0xf0]  ;;  %v562_v26 = vld [vmem:[%s1058_s3 + $0x54] sm:$0xf0] }
  0x83   :  { %v749_v32 = vsub.f32 %v645_v8, %v62_v28  ;;  %v589_v8 = vor.u32 %v633_v3, %v586_v5  ;;  %v629_v28 = vld [vmem:[%s1058_s3 + $0x58] sm:$0xf0]  ;;  %v565_v30 = vor.u32 %v627_v24, %v562_v26  ;;  %v550_v41 = vld [vmem:[%s1058_s3 + $0x3c] sm:$0xf0]  ;;  %v533_v3 = vor.u32 %v620_v2, %v532_v0 }
  0x84   :  { %v80_v34 = vmul.f32 %v745_v29, %v745_v29  ;;  %v82_v46 = vmul.f32 %v772_v45, %v772_v45  ;;  %v569_v31 = vor.u32 %v629_v28, %v568_v27  ;;  %403 = vmatpush.bf16.msra.mxu0 %v561_v25  ;;  %665 = vmatpush.bf16.msra.mxu3 %v561_v25 }
  0x85   :  { %v78_v35 = vmul.f32 %v749_v32, %v749_v32  ;;  %430 = vmatpush.bf16.msra.mxu1 %v589_v8 }
  0x86   :  { %91 = vadd.xlane.f32.xlu2 %v80_v34  ;;  %v548_v34 = vld [vmem:[%s1058_s3 + $0x30] sm:$0xf] }
  0x87   :  { %52 = vadd.xlane.f32.xlu0 %v657_v33  ;;  %87 = vadd.xlane.f32.xlu1 %v78_v35  ;;  %v51_v38 = vpop.xlane.xlu2 %50  ;;  %v625_v35 = vld [vmem:[%s1058_s3 + $0x38] sm:$0xf0] }
  0x88   :  { %v67_v39 = vmul.f32 %v736_v17, %v51_v38  ;;  %v624_v38 = vld [vmem:[%s1058_s3 + $0x34] sm:$0xf] }
  0x89   :  { %431 = vmatpush.bf16.msra.mxu1 %v577_v19 }
  0x8a   :  { %v763_v40 = vsub.f32 %v656_v10, %v67_v39  ;;  %v593_v10 = vor.u32 %v635_v7, %v592_v6  ;;  %v549_v39 = vor.u32 %v625_v35, %v548_v34 }
  0x8c   :  { %v83_v44 = vmul.f32 %v763_v40, %v763_v40  ;;  %459 = vmatpush.bf16.msra.mxu2 %v593_v10  ;;  %404 = vmatpush.bf16.msra.mxu0 %v549_v39 }
  0x8d   :  { %432 = vmatpush.bf16.msra.mxu1 %v565_v30  ;;  %666 = vmatpush.bf16.msra.mxu3 %v549_v39 }
  0x8e   :  { %97 = vadd.xlane.f32.xlu2 %v83_v44  ;;  %v553_v44 = vor.u32 %v624_v38, %v550_v41 }
  0x8f   :  { %93 = vadd.xlane.f32.xlu0 %v81_v42  ;;  %89 = vadd.xlane.f32.xlu1 %v79_v43  ;;  %v556_v42 = vld [vmem:[%s1058_s3 + $0x38] sm:$0xf]  ;;  %v626_v43 = vld [vmem:[%s1058_s3 + $0x40] sm:$0xf0] }
  0x90   :  { %460 = vmatpush.bf16.msra.mxu2 %v581_v20  ;;  %405 = vmatpush.bf16.msra.mxu0 %v537_v50 }
  0x91   :  { %433 = vmatpush.bf16.msra.mxu1 %v553_v44  ;;  %667 = vmatpush.bf16.msra.mxu3 %v537_v50  ;;  %v940_v50 = vld [vmem:[%s1056_s1] ss:$0 sm:$0xff] }
  0x94   :  { %461 = vmatpush.bf16.msra.mxu2 %v569_v31  ;;  %406 = vmatpush.bf16.msra.mxu0 %v525_v62 }
  0x95   :  { %434 = vmatpush.bf16.msra.mxu1 %v541_v55  ;;  %668 = vmatpush.bf16.msra.mxu3 %v525_v62  ;;  %v948_v62 = vld [vmem:[%s1057_s2] ss:$0 sm:$0xff] }
  0x97   :  { %95 = vadd.xlane.f32.xlu1 %v82_v46  ;;  %v557_v46 = vor.u32 %v626_v43, %v556_v42 }
  0x99   :  { %462 = vmatpush.bf16.msra.mxu2 %v557_v46  ;;  %435 = vmatpush.bf16.msra.mxu1 %v529_v1 }
  0x9d   :  { %463 = vmatpush.bf16.msra.mxu2 %v545_v56 }
  0xa1   :  { %464 = vmatpush.bf16.msra.mxu2 %v533_v3 }
  0xf2   :  { %v86_v54 = vpop.xlane.xlu0 %85 }
  0xf3   :  { %v101_v57 = vmul.f32 %v86_v54, %v736_v17 }
  0xf5   :  { %v109_v61 = vadd.f32 1e-05, %v101_v57 }
  0xf7   :  { %674 = vrsqrt.f32 %v109_v61  ;;  %vm123_vm2 = vweird.f32 %v109_v61 }
  0xf9   :  { %v92_v4 = vpop.xlane.xlu2 %91 }
  0xfa   :  { %v104_v5 = vmul.f32 %v92_v4, %v736_v17  ;;  %v88_v6 = vpop.xlane.xlu1 %87  ;;  %v53_v7 = vpop.xlane.xlu0 %52 }
  0xfb   :  { %v102_v8 = vmul.f32 %v88_v6, %v736_v17  ;;  %v68_v10 = vmul.f32 %v736_v17, %v53_v7 }
  0xfc   :  { %v112_v11 = vadd.f32 1e-05, %v104_v5 }
  0xfd   :  { %v675_v12 = vpop.eup %674  ;;  %v110_v13 = vadd.f32 1e-05, %v102_v8  ;;  %v926_v14 = vsub.f32 %v657_v33, %v68_v10 }
  0xfe   :  { %v118_v15 = vmul.f32 %v675_v12, %v109_v61  ;;  %676 = vrsqrt.f32 %v112_v11  ;;  %vm124_vm1 = vweird.f32 %v675_v12  ;;  %vm153_vm6 = vweird.f32 %v112_v11 }
  0xff   :  { %678 = vrsqrt.f32 %v110_v13  ;;  %v84_v16 = vmul.f32 %v926_v14, %v926_v14  ;;  %vm125_vm3 = vmor %vm123_vm2, %vm124_vm1  ;;  %vm133_vm4 = vweird.f32 %v110_v13 }
 0x100   :  { %v119_v18 = vmul.f32 %v675_v12, %v118_v15 }
 0x101   :  { %99 = vadd.xlane.f32.xlu0 %v84_v16 }
 0x102   :  { %v120_v19 = vmul.f32 0.5, %v119_v18  ;;  %v90_v20 = vpop.xlane.xlu1 %89  ;;  %v94_v21 = vpop.xlane.xlu0 %93 }
 0x103   :  { %v103_v23 = vmul.f32 %v90_v20, %v736_v17  ;;  %v105_v24 = vmul.f32 %v94_v21, %v736_v17 }
 0x104   :  { %v677_v25 = vpop.eup %676  ;;  %v121_v26 = vsub.f32 1.5, %v120_v19 }
 0x105   :  { %v679_v9 = vpop.eup %678  ;;  %v148_v33 = vmul.f32 %v677_v25, %v112_v11  ;;  %v111_v27 = vadd.f32 1e-05, %v103_v23  ;;  %v932_v28 = vadd.f32 1e-05, %v105_v24  ;;  %vm154_vm7 = vweird.f32 %v677_v25 }
 0x106   :  { %v122_v30 = vmul.f32 %v675_v12, %v121_v26  ;;  %v128_v31 = vmul.f32 %v679_v9, %v110_v13  ;;  %vm134_vm5 = vweird.f32 %v679_v9  ;;  %vm155_vm9 = vmor %vm153_vm6, %vm154_vm7 }
 0x107   :  { %v149_v34 = vmul.f32 %v677_v25, %v148_v33  ;;  %680 = vrsqrt.f32 %v111_v27  ;;  %vm135_vm8 = vmor %vm133_vm4, %vm134_vm5  ;;  %vm143_vm10 = vweird.f32 %v111_v27  ;;  %vm163_vm15 = vweird.f32 %v932_v28 }
 0x108   :  { %v129_v35 = vmul.f32 %v679_v9, %v128_v31  ;;  %682 = vrsqrt.f32 %v932_v28  ;;  %v126_v39 = vsel %vm125_vm3, %v675_v12, %v122_v30  ;;  %v98_v31 = vpop.xlane.xlu2 %97 }
 0x109   :  { %v150_v38 = vmul.f32 0.5, %v149_v34  ;;  %v197_v48 = vmul.f32 %v126_v39, %v739_v22  ;;  %v107_v34 = vmul.f32 %v98_v31, %v736_v17 }
 0x10a   :  { %v130_v41 = vmul.f32 0.5, %v129_v35  ;;  %v96_v42 = vpop.xlane.xlu1 %95 }
 0x10b   :  { %v151_v43 = vsub.f32 1.5, %v150_v38  ;;  %v106_v44 = vmul.f32 %v96_v42, %v736_v17  ;;  %v208_v22 = vmul.f32 %v940_v50, %v197_v48 }
 0x10c   :  { %v131_v46 = vsub.f32 1.5, %v130_v41 }
 0x10d   :  { %v681_v47 = vpop.eup %680  ;;  %v114_v49 = vadd.f32 1e-05, %v106_v44  ;;  %v152_v52 = vmul.f32 %v677_v25, %v151_v43  ;;  %v219_v5 = vadd.f32 %v948_v62, %v208_v22 }
 0x10e   :  { %v683_v51 = vpop.eup %682  ;;  %v132_v53 = vmul.f32 %v679_v9, %v131_v46  ;;  %v138_v54 = vmul.f32 %v681_v47, %v111_v27  ;;  %vm144_vm11 = vweird.f32 %v681_v47 }
 0x10f   :  { %v158_v55 = vmul.f32 %v683_v51, %v932_v28  ;;  %684 = vrsqrt.f32 %v114_v49  ;;  %v156_v59 = vsel %vm155_vm9, %v677_v25, %v152_v52  ;;  %vm145_vm12 = vmor %vm143_vm10, %vm144_vm11  ;;  %vm173_vm13 = vweird.f32 %v114_v49 }
 0x110   :  { %v136_v56 = vsel %vm135_vm8, %v679_v9, %v132_v53  ;;  %v139_v57 = vmul.f32 %v681_v47, %v138_v54  ;;  %v200_v1 = vmul.f32 %v156_v59, %v745_v29  ;;  %vm164_vm0 = vweird.f32 %v683_v51 }
 0x111   :  { %v198_v58 = vmul.f32 %v136_v56, %v749_v32  ;;  %v159_v61 = vmul.f32 %v683_v51, %v158_v55  ;;  %vm165_vm2 = vmor %vm163_vm15, %vm164_vm0 }
 0x112   :  { %v140_v60 = vmul.f32 0.5, %v139_v57  ;;  %v211_v12 = vmul.f32 %v940_v50, %v200_v1 }
 0x113   :  { %v209_v63 = vmul.f32 %v940_v50, %v198_v58  ;;  %v160_v4 = vmul.f32 0.5, %v159_v61  ;;  %v263_v61 = vld [vmem:[%s1059_s4] sm:$0x7] }
 0x114   :  { %v141_v0 = vsub.f32 1.5, %v140_v60 }
 0x115   :  { %v220_v32 = vadd.f32 %v948_v62, %v209_v63  ;;  %v685_v2 = vpop.eup %684  ;;  %v161_v13 = vsub.f32 1.5, %v160_v4  ;;  %v979_v63 = vperm.slane %v263_v61, 1 }
 0x116   :  { %v142_v3 = vmul.f32 %v681_v47, %v141_v0  ;;  %v168_v6 = vmul.f32 %v685_v2, %v114_v49  ;;  %vm174_vm14 = vweird.f32 %v685_v2 }
 0x117   :  { %v227_v8 = vpack.c.bf16 %v220_v32, %v219_v5  ;;  %v162_v19 = vmul.f32 %v683_v51, %v161_v13  ;;  %vm175_vm1 = vmor %vm173_vm13, %vm174_vm14 }
 0x118   :  { %v146_v7 = vsel %vm145_vm12, %v681_v47, %v142_v3  ;;  %v169_v11 = vmul.f32 %v685_v2, %v168_v6 }
 0x119   :  { %v199_v10 = vmul.f32 %v146_v7, %v758_v37  ;;  %407 = vmatmul.bf16.vlgmr.msra.gmra.mxu0 %v227_v8  ;;  %436 = vmatmul.bf16.vlgmr.msra.gmra.mxu1 %v227_v8  ;;  %v222_v37 = vadd.f32 %v948_v62, %v211_v12  ;;  %v166_v24 = vsel %vm165_vm2, %v683_v51, %v162_v19 }
 0x11a   :  { %v170_v29 = vmul.f32 0.5, %v169_v11  ;;  %465 = vmatmul.bf16.vlgmr.msra.gmra.mxu2 %v227_v8  ;;  %v201_v26 = vmul.f32 %v166_v24, %v756_v36 }
 0x11b   :  { %v210_v15 = vmul.f32 %v940_v50, %v199_v10 }
 0x11c   :  { %v171_v16 = vsub.f32 1.5, %v170_v29  ;;  %v212_v33 = vmul.f32 %v940_v50, %v201_v26 }
 0x11d   :  { %v221_v18 = vadd.f32 %v948_v62, %v210_v15 }
 0x11e   :  { %v172_v20 = vmul.f32 %v685_v2, %v171_v16  ;;  %v223_v28 = vadd.f32 %v948_v62, %v212_v33 }
 0x11f   :  { %v228_v21 = vpack.c.bf16 %v222_v37, %v221_v18 }
 0x120   :  { %v176_v23 = vsel %vm175_vm1, %v685_v2, %v172_v20 }
 0x121   :  { %412 = vmatmul.bf16.vlgmr.msra.gmra.mxu3 %v228_v21  ;;  %v202_v25 = vmul.f32 %v176_v23, %v772_v45  ;;  %v115_v45 = vadd.f32 1e-05, %v107_v34 }
 0x123   :  { %v213_v9 = vmul.f32 %v940_v50, %v202_v25  ;;  %686 = vrsqrt.f32 %v115_v45  ;;  %vm183_vm3 = vweird.f32 %v115_v45 }
 0x125   :  { %v224_v27 = vadd.f32 %v948_v62, %v213_v9 }
 0x127   :  { %v229_v30 = vpack.c.bf16 %v224_v27, %v223_v28 }
 0x129   :  { %441 = vmatmul.bf16.gmra.mxu1 %v228_v21  ;;  %v687_v36 = vpop.eup %686 }
 0x12a   :  { %470 = vmatmul.bf16.gmra.mxu2 %v228_v21  ;;  %v178_v35 = vmul.f32 %v687_v36, %v115_v45  ;;  %vm184_vm4 = vweird.f32 %v687_v36 }
 0x12b   :  { %vm185_vm5 = vmor %vm183_vm3, %vm184_vm4 }
 0x12c   :  { %v179_v38 = vmul.f32 %v687_v36, %v178_v35 }
 0x12e   :  { %v180_v43 = vmul.f32 0.5, %v179_v38 }
 0x130   :  { %v181_v44 = vsub.f32 1.5, %v180_v43 }
 0x131   :  { %417 = vmatmul.bf16.gmra.mxu3 %v229_v30 }
 0x132   :  { %v182_v47 = vmul.f32 %v687_v36, %v181_v44 }
 0x134   :  { %v186_v51 = vsel %vm185_vm5, %v687_v36, %v182_v47 }
 0x135   :  { %v203_v54 = vmul.f32 %v186_v51, %v763_v40  ;;  %v977_v40 = vperm.slane %v263_v61, 0 }
 0x137   :  { %v214_v57 = vmul.f32 %v940_v50, %v203_v54 }
 0x139   :  { %446 = vmatmul.bf16.gmra.mxu1 %v229_v30  ;;  %v225_v22 = vadd.f32 %v948_v62, %v214_v57 }
 0x13a   :  { %475 = vmatmul.bf16.gmra.mxu2 %v229_v30 }
 0x174   :  { %v100_v39 = vpop.xlane.xlu0 %99 }
 0x175   :  { %v108_v41 = vmul.f32 %v100_v39, %v736_v17 }
 0x177   :  { %v116_v42 = vadd.f32 1e-05, %v108_v41 }
 0x179   :  { %688 = vrsqrt.f32 %v116_v42  ;;  %vm193_vm7 = vweird.f32 %v116_v42 }
 0x17f   :  { %v689_v46 = vpop.eup %688 }
 0x180   :  { %v188_v48 = vmul.f32 %v689_v46, %v116_v42  ;;  %vm194_vm6 = vweird.f32 %v689_v46 }
 0x181   :  { %vm195_vm8 = vmor %vm193_vm7, %vm194_vm6 }
 0x182   :  { %v189_v49 = vmul.f32 %v689_v46, %v188_v48 }
 0x184   :  { %v190_v52 = vmul.f32 0.5, %v189_v49 }
 0x186   :  { %v191_v53 = vsub.f32 1.5, %v190_v52 }
 0x188   :  { %v192_v55 = vmul.f32 %v689_v46, %v191_v53 }
 0x18a   :  { %v196_v17 = vsel %vm195_vm8, %v689_v46, %v192_v55 }
 0x18b   :  { %v204_v56 = vmul.f32 %v196_v17, %v926_v14 }
 0x18d   :  { %v215_v58 = vmul.f32 %v940_v50, %v204_v56 }
 0x18f   :  { %v226_v59 = vadd.f32 %v948_v62, %v215_v58  ;;  %v983_v62 = vperm.slane %v263_v61, 2 }
 0x191   :  { %v230_v60 = vpack.c.bf16 %v226_v59, %v225_v22 }
 0x193   :  { %422 = vmatmul.bf16.gmra.mxu3 %v230_v60  ;;  %451 = vmatmul.bf16.gmra.mxu1 %v230_v60 }
 0x194   :  { %480 = vmatmul.bf16.gmra.mxu2 %v230_v60 }
 0x196   :  { %v408_v14 = vpop.f32.mrf.mxu0  ;;  %v437_v0 = vpop.f32.mrf.mxu1 }
 0x197   :  { %v409_v50 = vadd.f32 %v408_v14, %v977_v40  ;;  %v438_v1 = vadd.f32 %v437_v0, %v979_v63 }
 0x199   :  { %v486_v32 = vpack.c.bf16 %v438_v1, %v409_v50 }
 0x19b   :  { %502 = vst [vmem:[%s1060_s5] sm:$0xff] %v486_v32 }
 0x19d   :  { %v466_v2 = vpop.f32.mrf.mxu2 }
 0x19e   :  { %v467_v3 = vadd.f32 %v466_v2, %v983_v62  ;;  %v410_v4 = vpop.f32.mrf.mxu0  ;;  %v439_v5 = vpop.f32.mrf.mxu1 }
 0x19f   :  { %v411_v6 = vadd.f32 %v410_v4, %v977_v40  ;;  %v440_v7 = vadd.f32 %v439_v5, %v979_v63 }
 0x1a0   :  { %v487_v8 = vpack.c.bf16 %v467_v3, %v467_v3 }
 0x1a1   :  { %v488_v10 = vpack.c.bf16 %v440_v7, %v411_v6 }
 0x1a2   :  { %503 = vst [vmem:[%s1060_s5 + $0x8] sm:$0xf] %v487_v8 }
 0x1a3   :  { %504 = vst [vmem:[%s1060_s5 + $0xc] sm:$0xff] %v488_v10 }
 0x1a4   :  { %v413_v11 = vpop.f32.mrf.mxu3 }
 0x1a5   :  { %v468_v12 = vpop.f32.mrf.mxu2  ;;  %v414_v15 = vadd.f32 %v413_v11, %v977_v40 }
 0x1a6   :  { %v469_v13 = vadd.f32 %v468_v12, %v983_v62  ;;  %v442_v29 = vpop.f32.mrf.mxu1 }
 0x1a7   :  { %v443_v16 = vadd.f32 %v442_v29, %v979_v63 }
 0x1a8   :  { %v489_v18 = vpack.c.bf16 %v469_v13, %v469_v13 }
 0x1a9   :  { %v490_v37 = vpack.c.bf16 %v443_v16, %v414_v15 }
 0x1aa   :  { %505 = vst [vmem:[%s1060_s5 + $0x14] sm:$0xf] %v489_v18 }
 0x1ab   :  { %506 = vst [vmem:[%s1060_s5 + $0x18] sm:$0xff] %v490_v37 }
 0x1ac   :  { %v415_v19 = vpop.f32.mrf.mxu3 }
 0x1ad   :  { %v471_v20 = vpop.f32.mrf.mxu2  ;;  %v416_v24 = vadd.f32 %v415_v19, %v977_v40 }
 0x1ae   :  { %v472_v21 = vadd.f32 %v471_v20, %v983_v62  ;;  %v444_v23 = vpop.f32.mrf.mxu1 }
 0x1af   :  { %v445_v25 = vadd.f32 %v444_v23, %v979_v63 }
 0x1b0   :  { %v491_v26 = vpack.c.bf16 %v472_v21, %v472_v21 }
 0x1b1   :  { %v492_v9 = vpack.c.bf16 %v445_v25, %v416_v24 }
 0x1b2   :  { %507 = vst [vmem:[%s1060_s5 + $0x20] sm:$0xf] %v491_v26 }
 0x1b3   :  { %508 = vst [vmem:[%s1060_s5 + $0x24] sm:$0xff] %v492_v9 }
 0x1b4   :  { %v418_v33 = vpop.f32.mrf.mxu3 }
 0x1b5   :  { %v473_v27 = vpop.f32.mrf.mxu2  ;;  %v419_v31 = vadd.f32 %v418_v33, %v977_v40 }
 0x1b6   :  { %v474_v28 = vadd.f32 %v473_v27, %v983_v62  ;;  %v447_v30 = vpop.f32.mrf.mxu1 }
 0x1b7   :  { %v448_v34 = vadd.f32 %v447_v30, %v979_v63 }
 0x1b8   :  { %v493_v45 = vpack.c.bf16 %v474_v28, %v474_v28 }
 0x1b9   :  { %v494_v36 = vpack.c.bf16 %v448_v34, %v419_v31 }
 0x1ba   :  { %509 = vst [vmem:[%s1060_s5 + $0x2c] sm:$0xf] %v493_v45 }
 0x1bb   :  { %510 = vst [vmem:[%s1060_s5 + $0x30] sm:$0xff] %v494_v36 }
 0x1bc   :  { %v420_v35 = vpop.f32.mrf.mxu3 }
 0x1bd   :  { %v476_v38 = vpop.f32.mrf.mxu2  ;;  %v421_v42 = vadd.f32 %v420_v35, %v977_v40 }
 0x1be   :  { %v477_v39 = vadd.f32 %v476_v38, %v983_v62  ;;  %v449_v41 = vpop.f32.mrf.mxu1 }
 0x1bf   :  { %v450_v43 = vadd.f32 %v449_v41, %v979_v63 }
 0x1c0   :  { %v495_v44 = vpack.c.bf16 %v477_v39, %v477_v39 }
 0x1c1   :  { %v496_v46 = vpack.c.bf16 %v450_v43, %v421_v42 }
 0x1c2   :  { %511 = vst [vmem:[%s1060_s5 + $0x38] sm:$0xf] %v495_v44 }
 0x1c3   :  { %512 = vst [vmem:[%s1060_s5 + $0x3c] sm:$0xff] %v496_v46 }
 0x1c5   :  { %v478_v47 = vpop.f32.mrf.mxu2 }
 0x1c6   :  { %v479_v48 = vadd.f32 %v478_v47, %v983_v62 }
 0x1c8   :  { %v497_v49 = vpack.c.bf16 %v479_v48, %v479_v48 }
 0x1ca   :  { %513 = vst [vmem:[%s1060_s5 + $0x44] sm:$0xf] %v497_v49 }
 0x210   :  { %v452_v51 = vpop.f32.mrf.mxu1 }
 0x211   :  { %v453_v53 = vadd.f32 %v452_v51, %v979_v63 }
 0x216   :  { %v423_v52 = vpop.f32.mrf.mxu3 }
 0x217   :  { %v424_v54 = vadd.f32 %v423_v52, %v977_v40  ;;  %v481_v55 = vpop.f32.mrf.mxu2 }
 0x218   :  { %v482_v17 = vadd.f32 %v481_v55, %v983_v62  ;;  %v454_v58 = vpop.f32.mrf.mxu1 }
 0x219   :  { %v498_v56 = vpack.c.bf16 %v453_v53, %v424_v54  ;;  %v455_v59 = vadd.f32 %v454_v58, %v979_v63 }
 0x21a   :  { %v499_v57 = vpack.c.bf16 %v482_v17, %v482_v17 }
 0x21b   :  { %514 = vst [vmem:[%s1060_s5 + $0x48] sm:$0xff] %v498_v56 }
 0x21c   :  { %515 = vst [vmem:[%s1060_s5 + $0x50] sm:$0xf] %v499_v57 }
 0x21e   :  { %v425_v22 = vpop.f32.mrf.mxu3 }
 0x21f   :  { %v426_v60 = vadd.f32 %v425_v22, %v977_v40  ;;  %v483_v61 = vpop.f32.mrf.mxu2 }
 0x220   :  { %v484_v14 = vadd.f32 %v483_v61, %v983_v62 }
 0x221   :  { %v500_v0 = vpack.c.bf16 %v455_v59, %v426_v60 }
 0x222   :  { %v501_v50 = vpack.c.bf16 %v484_v14, %v484_v14 }
 0x223   :  { %516 = vst [vmem:[%s1060_s5 + $0x54] sm:$0xff] %v500_v0 }
 0x224   :  { %517 = vst [vmem:[%s1060_s5 + $0x5c] sm:$0xf] %v501_v50 }

// kernel: tt_gpt_forward.13
= control target key start
LH: loop header
LB: loop body
LE: loop exit
PB: predicated region body
PF: predicated region fallthrough
CT: control target
= control target key end

     0   :  { %s1251_s0 = inlined_call_operand.vmem [shape: bf16[64,128], index: 0, kind: input, shape index: {}]   ;;  %s1252_s1 = inlined_call_operand.vmem [shape: f32[1,128], index: 1, kind: input, shape index: {}]   ;;  %s1253_s2 = inlined_call_operand.vmem [shape: f32[1,128], index: 2, kind: input, shape index: {}]   ;;  %s1254_s3 = inlined_call_operand.vmem [shape: bf16[128,512], index: 3, kind: input, shape index: {}]   ;;  %s1255_s4 = inlined_call_operand.hbm [shape: bf16[64,512], index: 4, kind: output, shape index: {}]  }
   0x1   :  { %v852_v0 = vld [vmem:[%s1251_s0 + $0x10] sm:$0xff]   ;;  %v851_v1 = vld [vmem:[%s1251_s0 + $0x8] sm:$0xff]   ;;  %v816_v2 = vld [vmem:[%s1251_s0] sm:$0xff]  }
   0x2   :  { %v825_v3 = vunpack.c.l.bf16 %v852_v0  ;;  %v821_v4 = vunpack.c.l.bf16 %v851_v1  ;;  %v817_v5 = vunpack.c.l.bf16 %v816_v2 }
   0x3   :  { %9 = vsyncpa [#allocation4], 0  ;;  %v826_v6 = vunpack.c.h.bf16 %v852_v0  ;;  %v822_v7 = vunpack.c.h.bf16 %v851_v1  ;;  %v818_v8 = vunpack.c.h.bf16 %v816_v2  ;;  %v948_v9 = vld [vmem:[%s1251_s0 + $0x18] sm:$0xff]   ;;  %v907_v11 = vmov 128.0   ;;  %v765_v47 = vld [vmem:[%s1254_s3 + $0xe0] sm:$0xf] }
   0x4   :  { %48 = vadd.xlane.f32.xlu2 %v825_v3  ;;  %44 = vadd.xlane.f32.xlu1 %v821_v4  ;;  %v829_v10 = vunpack.c.l.bf16 %v948_v9  ;;  %863 = vrcp.f32 %v907_v11  ;;  %v830_v33 = vunpack.c.h.bf16 %v948_v9  ;;  %v813_v48 = vld [vmem:[%s1254_s3 + $0xec] sm:$0xf0]  ;;  %v811_v49 = vld [vmem:[%s1254_s3 + $0xe4] sm:$0xf]  ;;  %v767_v51 = vld [vmem:[%s1254_s3 + $0xf0] sm:$0xf0] }
   0x5   :  { %40 = vadd.xlane.f32.xlu0 %v817_v5  ;;  %v766_v50 = vor.u32 %v813_v48, %v765_v47  ;;  %v773_v52 = vld [vmem:[%s1254_s3 + $0xe8] sm:$0xf]  ;;  %v814_v53 = vld [vmem:[%s1254_s3 + $0xf4] sm:$0xf0]  ;;  %v770_v54 = vor.u32 %v811_v49, %v767_v51  ;;  %v812_v56 = vld [vmem:[%s1254_s3 + $0xec] sm:$0xf] }
   0x6   :  { %v774_v55 = vor.u32 %v814_v53, %v773_v52  ;;  %v775_v57 = vld [vmem:[%s1254_s3 + $0xf8] sm:$0xf0]  ;;  %v749_v59 = vld [vmem:[%s1254_s3 + $0xc0] sm:$0xf]  ;;  %v809_v60 = vld [vmem:[%s1254_s3 + $0xcc] sm:$0xf0] }
   0x7   :  { %469 = vmatpush.bf16.msra.mxu0 %v766_v50  ;;  %v778_v58 = vor.u32 %v812_v56, %v775_v57  ;;  %498 = vmatpush.bf16.msra.mxu1 %v770_v54  ;;  %v807_v61 = vld [vmem:[%s1254_s3 + $0xc4] sm:$0xf]  ;;  %v750_v62 = vor.u32 %v809_v60, %v749_v59  ;;  %v751_v63 = vld [vmem:[%s1254_s3 + $0xd0] sm:$0xf0]  ;;  %v757_v0 = vld [vmem:[%s1254_s3 + $0xc8] sm:$0xf] }
   0x8   :  { %527 = vmatpush.bf16.msra.mxu2 %v774_v55  ;;  %v810_v1 = vld [vmem:[%s1254_s3 + $0xd4] sm:$0xf0]  ;;  %v754_v2 = vor.u32 %v807_v61, %v751_v63  ;;  %v709_v47 = vld [vmem:[%s1254_s3 + $0x68] sm:$0xf]  ;;  %v796_v52 = vld [vmem:[%s1254_s3 + $0x6c] sm:$0xf] }
   0x9   :  { %556 = vmatpush.bf16.msra.mxu3 %v778_v58  ;;  %v798_v48 = vld [vmem:[%s1254_s3 + $0x74] sm:$0xf0]  ;;  %v711_v53 = vld [vmem:[%s1254_s3 + $0x78] sm:$0xf0]  ;;  %v685_v56 = vld [vmem:[%s1254_s3 + $0x40] sm:$0xf] }
   0xa   :  { %v864_v12 = vpop.eup %863  ;;  %v710_v51 = vor.u32 %v798_v48, %v709_v47  ;;  %v714_v54 = vor.u32 %v796_v52, %v711_v53  ;;  %v793_v57 = vld [vmem:[%s1254_s3 + $0x4c] sm:$0xf0]  ;;  %v791_v59 = vld [vmem:[%s1254_s3 + $0x44] sm:$0xf]  ;;  %v687_v60 = vld [vmem:[%s1254_s3 + $0x50] sm:$0xf0] }
   0xb   :  { %v57_v13 = vmul.f32 128.0, %v864_v12  ;;  %vm61_vm0 = vweird.f32 %v864_v12  ;;  %470 = vmatpush.bf16.msra.mxu0 %v750_v62  ;;  %499 = vmatpush.bf16.msra.mxu1 %v754_v2  ;;  %v686_v58 = vor.u32 %v793_v57, %v685_v56  ;;  %v693_v61 = vld [vmem:[%s1254_s3 + $0x48] sm:$0xf]  ;;  %v690_v62 = vor.u32 %v791_v59, %v687_v60  ;;  %v794_v63 = vld [vmem:[%s1254_s3 + $0x54] sm:$0xf0]  ;;  %s623_s21 = sshll.u32 %s1255_s4, 4  ;;  %s624_s21 = int_to_ptr.hbm [resolvable:$true] %s623_s21 }
   0xc   :  { %50 = vadd.xlane.f32.xlu2 %v826_v6  ;;  %46 = vadd.xlane.f32.xlu1 %v822_v7  ;;  %v694_v2 = vor.u32 %v794_v63, %v693_v61  ;;  %v783_v9 = vld [vmem:[%s1254_s3 + $0x4] sm:$0xf]  ;;  %v663_v47 = vld [vmem:[%s1254_s3 + $0x18] sm:$0xf0]  ;;  %s909_s22 = smov 256   ;;  %s910_s0 = smov 16  }
   0xd   :  { %42 = vadd.xlane.f32.xlu0 %v818_v8  ;;  %v58_v14 = vsub.f32 1.0, %v57_v13  ;;  %v741_v13 = vld [vmem:[%s1254_s3 + $0xa8] sm:$0xf] }
   0xf   :  { %v59_v15 = vmul.f32 %v864_v12, %v58_v14  ;;  %v806_v14 = vld [vmem:[%s1254_s3 + $0xb4] sm:$0xf0] }
  0x11   :  { %v60_v16 = vadd.f32 %v864_v12, %v59_v15 }
  0x13   :  { %v951_v17 = vsel %vm61_vm0, %v864_v12, %v60_v16  ;;  %v735_v12 = vld [vmem:[%s1254_s3 + $0xb0] sm:$0xf0]  ;;  %v742_v16 = vor.u32 %v806_v14, %v741_v13  ;;  %v677_v14 = vld [vmem:[%s1254_s3 + $0x28] sm:$0xf] }
  0x14   :  { %52 = vadd.xlane.f32.xlu2 %v829_v10  ;;  %v671_v13 = vld [vmem:[%s1254_s3 + $0x30] sm:$0xf0] }
  0x77   :  { %v49_v18 = vpop.xlane.xlu2 %48  ;;  %v45_v19 = vpop.xlane.xlu1 %44 }
  0x78   :  { %v41_v20 = vpop.xlane.xlu0 %40  ;;  %v67_v30 = vmul.f32 %v951_v17, %v49_v18  ;;  %v65_v31 = vmul.f32 %v951_v17, %v45_v19  ;;  %v804_v18 = vld [vmem:[%s1254_s3 + $0xac] sm:$0xf]  ;;  %v743_v19 = vld [vmem:[%s1254_s3 + $0xb8] sm:$0xf0] }
  0x79   :  { %v63_v21 = vmul.f32 %v951_v17, %v41_v20  ;;  %v746_v20 = vor.u32 %v804_v18, %v743_v19 }
  0x7a   :  { %v971_v36 = vsub.f32 %v825_v3, %v67_v30  ;;  %v973_v37 = vsub.f32 %v821_v4, %v65_v31  ;;  %v758_v3 = vor.u32 %v810_v1, %v757_v0  ;;  %v808_v4 = vld [vmem:[%s1254_s3 + $0xcc] sm:$0xf]  ;;  %v695_v1 = vld [vmem:[%s1254_s3 + $0x58] sm:$0xf0] }
  0x7b   :  { %v954_v22 = vsub.f32 %v817_v5, %v63_v21  ;;  %v759_v5 = vld [vmem:[%s1254_s3 + $0xd8] sm:$0xf0]  ;;  %v717_v21 = vld [vmem:[%s1254_s3 + $0x80] sm:$0xf]  ;;  %v792_v0 = vld [vmem:[%s1254_s3 + $0x4c] sm:$0xf] }
  0x7c   :  { %v83_v42 = vmul.f32 %v971_v36, %v971_v36  ;;  %v81_v43 = vmul.f32 %v973_v37, %v973_v37  ;;  %528 = vmatpush.bf16.msra.mxu2 %v758_v3  ;;  %v698_v3 = vor.u32 %v792_v0, %v695_v1 }
  0x7d   :  { %v79_v23 = vmul.f32 %v954_v22, %v954_v22 }
  0x7f   :  { %87 = vadd.xlane.f32.xlu0 %v79_v23  ;;  %v51_v24 = vpop.xlane.xlu2 %50  ;;  %v47_v25 = vpop.xlane.xlu1 %46  ;;  %v801_v23 = vld [vmem:[%s1254_s3 + $0x8c] sm:$0xf0] }
  0x80   :  { %v66_v26 = vmul.f32 %v951_v17, %v47_v25  ;;  %v43_v27 = vpop.xlane.xlu0 %42  ;;  %v68_v41 = vmul.f32 %v951_v17, %v51_v24  ;;  %529 = vmatpush.bf16.msra.mxu2 %v742_v16  ;;  %v799_v24 = vld [vmem:[%s1254_s3 + $0x84] sm:$0xf]  ;;  %v718_v25 = vor.u32 %v801_v23, %v717_v21  ;;  %v788_v21 = vld [vmem:[%s1254_s3 + $0x2c] sm:$0xf]  ;;  %v679_v23 = vld [vmem:[%s1254_s3 + $0x38] sm:$0xf0] }
  0x81   :  { %v64_v28 = vmul.f32 %v951_v17, %v43_v27  ;;  %v725_v27 = vld [vmem:[%s1254_s3 + $0x88] sm:$0xf] }
  0x82   :  { %v960_v29 = vsub.f32 %v822_v7, %v66_v26  ;;  %v987_v45 = vsub.f32 %v826_v6, %v68_v41  ;;  %v762_v6 = vor.u32 %v808_v4, %v759_v5  ;;  %v733_v7 = vld [vmem:[%s1254_s3 + $0xa0] sm:$0xf]  ;;  %v719_v26 = vld [vmem:[%s1254_s3 + $0x90] sm:$0xf0]  ;;  %v797_v41 = vld [vmem:[%s1254_s3 + $0x6c] sm:$0xf0] }
  0x83   :  { %v964_v32 = vsub.f32 %v818_v8, %v64_v28  ;;  %v805_v8 = vld [vmem:[%s1254_s3 + $0xac] sm:$0xf0]  ;;  %v802_v28 = vld [vmem:[%s1254_s3 + $0x94] sm:$0xf0]  ;;  %v722_v30 = vor.u32 %v799_v24, %v719_v26  ;;  %v669_v5 = vld [vmem:[%s1254_s3 + $0x20] sm:$0xf] }
  0x84   :  { %v82_v34 = vmul.f32 %v960_v29, %v960_v29  ;;  %v84_v46 = vmul.f32 %v987_v45, %v987_v45  ;;  %557 = vmatpush.bf16.msra.mxu3 %v762_v6  ;;  %v734_v11 = vor.u32 %v805_v8, %v733_v7  ;;  %v726_v31 = vor.u32 %v802_v28, %v725_v27  ;;  %v789_v6 = vld [vmem:[%s1254_s3 + $0x2c] sm:$0xf0]  ;;  %v787_v7 = vld [vmem:[%s1254_s3 + $0x24] sm:$0xf] }
  0x85   :  { %v80_v35 = vmul.f32 %v964_v32, %v964_v32  ;;  %v674_v19 = vor.u32 %v787_v7, %v671_v13  ;;  %v1208_v7 = vld [vmem:[%s1252_s1] ss:$0 sm:$0xff] }
  0x86   :  { %93 = vadd.xlane.f32.xlu2 %v82_v34  ;;  %471 = vmatpush.bf16.msra.mxu0 %v734_v11  ;;  %v800_v34 = vld [vmem:[%s1254_s3 + $0x8c] sm:$0xf] }
  0x87   :  { %54 = vadd.xlane.f32.xlu0 %v830_v33  ;;  %89 = vadd.xlane.f32.xlu1 %v80_v35  ;;  %v53_v38 = vpop.xlane.xlu2 %52  ;;  %v727_v35 = vld [vmem:[%s1254_s3 + $0x98] sm:$0xf0] }
  0x88   :  { %v69_v39 = vmul.f32 %v951_v17, %v53_v38  ;;  %558 = vmatpush.bf16.msra.mxu3 %v746_v20  ;;  %v730_v38 = vor.u32 %v800_v34, %v727_v35  ;;  %530 = vmatpush.bf16.msra.mxu2 %v726_v31  ;;  %v785_v31 = vld [vmem:[%s1254_s3 + $0xc] sm:$0xf0]  ;;  %v661_v35 = vld [vmem:[%s1254_s3 + $0x8] sm:$0xf] }
  0x8a   :  { %v978_v40 = vsub.f32 %v829_v10, %v69_v39  ;;  %v803_v10 = vld [vmem:[%s1254_s3 + $0xa4] sm:$0xf]  ;;  %472 = vmatpush.bf16.msra.mxu0 %v718_v25  ;;  %v701_v39 = vld [vmem:[%s1254_s3 + $0x60] sm:$0xf]  ;;  %v682_v25 = vor.u32 %v788_v21, %v679_v23 }
  0x8b   :  { %v738_v15 = vor.u32 %v803_v10, %v735_v12  ;;  %v670_v12 = vor.u32 %v789_v6, %v669_v5 }
  0x8c   :  { %v85_v44 = vmul.f32 %v978_v40, %v978_v40  ;;  %559 = vmatpush.bf16.msra.mxu3 %v730_v38  ;;  %531 = vmatpush.bf16.msra.mxu2 %v710_v51 }
  0x8d   :  { %500 = vmatpush.bf16.msra.mxu1 %v738_v15  ;;  %v790_v15 = vld [vmem:[%s1254_s3 + $0x34] sm:$0xf0] }
  0x8e   :  { %99 = vadd.xlane.f32.xlu2 %v85_v44  ;;  %v702_v44 = vor.u32 %v797_v41, %v701_v39  ;;  %v678_v20 = vor.u32 %v790_v15, %v677_v14  ;;  %v786_v41 = vld [vmem:[%s1254_s3 + $0x14] sm:$0xf0] }
  0x8f   :  { %95 = vadd.xlane.f32.xlu0 %v83_v42  ;;  %91 = vadd.xlane.f32.xlu1 %v81_v43  ;;  %v795_v42 = vld [vmem:[%s1254_s3 + $0x64] sm:$0xf] }
  0x90   :  { %473 = vmatpush.bf16.msra.mxu0 %v702_v44  ;;  %560 = vmatpush.bf16.msra.mxu3 %v714_v54 }
  0x91   :  { %501 = vmatpush.bf16.msra.mxu1 %v722_v30  ;;  %532 = vmatpush.bf16.msra.mxu2 %v694_v2  ;;  %v653_v30 = vld [vmem:[%s1254_s3] sm:$0xf] }
  0x92   :  { %v654_v39 = vor.u32 %v785_v31, %v653_v30 }
  0x94   :  { %474 = vmatpush.bf16.msra.mxu0 %v686_v58  ;;  %561 = vmatpush.bf16.msra.mxu3 %v698_v3 }
  0x95   :  { %533 = vmatpush.bf16.msra.mxu2 %v678_v20 }
  0x97   :  { %97 = vadd.xlane.f32.xlu1 %v84_v46  ;;  %v703_v46 = vld [vmem:[%s1254_s3 + $0x70] sm:$0xf0] }
  0x98   :  { %v706_v50 = vor.u32 %v795_v42, %v703_v46  ;;  %475 = vmatpush.bf16.msra.mxu0 %v670_v12  ;;  %562 = vmatpush.bf16.msra.mxu3 %v682_v25  ;;  %v784_v42 = vld [vmem:[%s1254_s3 + $0xc] sm:$0xf]  ;;  %v662_v46 = vor.u32 %v786_v41, %v661_v35 }
  0x99   :  { %v666_v48 = vor.u32 %v784_v42, %v663_v47 }
  0x9a   :  { %502 = vmatpush.bf16.msra.mxu1 %v706_v50  ;;  %534 = vmatpush.bf16.msra.mxu2 %v662_v46 }
  0x9c   :  { %476 = vmatpush.bf16.msra.mxu0 %v654_v39  ;;  %563 = vmatpush.bf16.msra.mxu3 %v666_v48 }
  0x9e   :  { %503 = vmatpush.bf16.msra.mxu1 %v690_v62 }
  0xa2   :  { %504 = vmatpush.bf16.msra.mxu1 %v674_v19 }
  0xf2   :  { %v88_v43 = vpop.xlane.xlu0 %87 }
  0xf3   :  { %v103_v49 = vmul.f32 %v88_v43, %v951_v17 }
  0xf5   :  { %v1112_v55 = vadd.f32 1e-05, %v103_v49 }
  0xf7   :  { %865 = vrsqrt.f32 %v1112_v55  ;;  %vm125_vm2 = vweird.f32 %v1112_v55 }
  0xf9   :  { %v94_v4 = vpop.xlane.xlu2 %93 }
  0xfa   :  { %v106_v8 = vmul.f32 %v94_v4, %v951_v17  ;;  %v90_v10 = vpop.xlane.xlu1 %89  ;;  %v55_v11 = vpop.xlane.xlu0 %54 }
  0xfb   :  { %v104_v16 = vmul.f32 %v90_v10, %v951_v17  ;;  %v70_v18 = vmul.f32 %v951_v17, %v55_v11 }
  0xfc   :  { %v1166_v24 = vadd.f32 1e-05, %v106_v8 }
  0xfd   :  { %v866_v26 = vpop.eup %865  ;;  %v112_v27 = vadd.f32 1e-05, %v104_v16  ;;  %v1170_v28 = vsub.f32 %v830_v33, %v70_v18  ;;  %v655_v33 = vld [vmem:[%s1254_s3 + $0x10] sm:$0xf0] }
  0xfe   :  { %v120_v34 = vmul.f32 %v866_v26, %v1112_v55  ;;  %867 = vrsqrt.f32 %v1166_v24  ;;  %v658_v44 = vor.u32 %v783_v9, %v655_v33  ;;  %vm126_vm1 = vweird.f32 %v866_v26 }
  0xff   :  { %869 = vrsqrt.f32 %v112_v27  ;;  %v86_v38 = vmul.f32 %v1170_v28, %v1170_v28  ;;  %vm127_vm3 = vmor %vm125_vm2, %vm126_vm1  ;;  %vm135_vm4 = vweird.f32 %v112_v27  ;;  %vm155_vm6 = vweird.f32 %v1166_v24 }
 0x100   :  { %v121_v43 = vmul.f32 %v866_v26, %v120_v34  ;;  %505 = vmatpush.bf16.msra.mxu1 %v658_v44 }
 0x101   :  { %101 = vadd.xlane.f32.xlu0 %v86_v38 }
 0x102   :  { %v122_v49 = vmul.f32 0.5, %v121_v43  ;;  %v92_v50 = vpop.xlane.xlu1 %91  ;;  %v96_v51 = vpop.xlane.xlu0 %95 }
 0x103   :  { %v105_v52 = vmul.f32 %v92_v50, %v951_v17  ;;  %v107_v53 = vmul.f32 %v96_v51, %v951_v17 }
 0x104   :  { %v868_v54 = vpop.eup %867  ;;  %v123_v56 = vsub.f32 1.5, %v122_v49 }
 0x105   :  { %v870_v57 = vpop.eup %869  ;;  %v150_v58 = vmul.f32 %v868_v54, %v1166_v24  ;;  %v113_v59 = vadd.f32 1e-05, %v105_v52  ;;  %v115_v60 = vadd.f32 1e-05, %v107_v53  ;;  %vm156_vm7 = vweird.f32 %v868_v54 }
 0x106   :  { %v124_v61 = vmul.f32 %v866_v26, %v123_v56  ;;  %v130_v62 = vmul.f32 %v870_v57, %v112_v27  ;;  %vm136_vm5 = vweird.f32 %v870_v57  ;;  %vm1212_vm9 = vmor %vm155_vm6, %vm156_vm7 }
 0x107   :  { %v151_v63 = vmul.f32 %v868_v54, %v150_v58  ;;  %871 = vrsqrt.f32 %v113_v59  ;;  %vm137_vm8 = vmor %vm135_vm4, %vm136_vm5  ;;  %vm145_vm10 = vweird.f32 %v113_v59  ;;  %vm165_vm12 = vweird.f32 %v115_v60 }
 0x108   :  { %v131_v0 = vmul.f32 %v870_v57, %v130_v62  ;;  %873 = vrsqrt.f32 %v115_v60  ;;  %v128_v1 = vsel %vm127_vm3, %v866_v26, %v124_v61 }
 0x109   :  { %v152_v2 = vmul.f32 0.5, %v151_v63  ;;  %v199_v55 = vmul.f32 %v128_v1, %v954_v22  ;;  %v1219_v22 = vld [vmem:[%s1253_s2] ss:$0 sm:$0xff]  ;;  %s908_s2 = smov [#allocation3]  }
 0x10a   :  { %v132_v3 = vmul.f32 0.5, %v131_v0  ;;  %v98_v4 = vpop.xlane.xlu1 %97  ;;  %s621_s18 = sshll.u32 %s908_s2, 4  ;;  %s622_s18 = int_to_ptr.vmem [resolvable:$true] %s621_s18 }
 0x10b   :  { %v153_v5 = vsub.f32 1.5, %v152_v2  ;;  %v108_v6 = vmul.f32 %v98_v4, %v951_v17  ;;  %v210_v19 = vmul.f32 %v1208_v7, %v199_v55 }
 0x10c   :  { %v133_v8 = vsub.f32 1.5, %v132_v3 }
 0x10d   :  { %v872_v10 = vpop.eup %871  ;;  %v154_v12 = vmul.f32 %v868_v54, %v153_v5  ;;  %v116_v15 = vadd.f32 1e-05, %v108_v6  ;;  %v221_v31 = vadd.f32 %v1219_v22, %v210_v19 }
 0x10e   :  { %v874_v11 = vpop.eup %873  ;;  %v134_v13 = vmul.f32 %v870_v57, %v133_v8  ;;  %v140_v14 = vmul.f32 %v872_v10, %v113_v59  ;;  %vm146_vm11 = vweird.f32 %v872_v10 }
 0x10f   :  { %v160_v18 = vmul.f32 %v874_v11, %v115_v60  ;;  %875 = vrsqrt.f32 %v116_v15  ;;  %v158_v25 = vsel %vm1212_vm9, %v868_v54, %v154_v12  ;;  %vm147_vm13 = vmor %vm145_vm10, %vm146_vm11  ;;  %vm166_vm14 = vweird.f32 %v874_v11 }
 0x110   :  { %v138_v20 = vsel %vm137_vm8, %v870_v57, %v134_v13  ;;  %v141_v21 = vmul.f32 %v872_v10, %v140_v14  ;;  %v202_v9 = vmul.f32 %v158_v25, %v960_v29  ;;  %vm167_vm15 = vmor %vm165_vm12, %vm166_vm14  ;;  %vm175_vm0 = vweird.f32 %v116_v15 }
 0x111   :  { %v200_v23 = vmul.f32 %v138_v20, %v964_v32  ;;  %v161_v24 = vmul.f32 %v874_v11, %v160_v18 }
 0x112   :  { %v142_v26 = vmul.f32 0.5, %v141_v21  ;;  %v213_v44 = vmul.f32 %v1208_v7, %v202_v9 }
 0x113   :  { %v211_v27 = vmul.f32 %v1208_v7, %v200_v23  ;;  %v162_v30 = vmul.f32 0.5, %v161_v24 }
 0x114   :  { %v143_v34 = vsub.f32 1.5, %v142_v26  ;;  %v224_v50 = vadd.f32 %v1219_v22, %v213_v44 }
 0x115   :  { %v222_v33 = vadd.f32 %v1219_v22, %v211_v27  ;;  %v163_v32 = vsub.f32 1.5, %v162_v30  ;;  %v876_v35 = vpop.eup %875 }
 0x116   :  { %v144_v38 = vmul.f32 %v872_v10, %v143_v34  ;;  %v170_v42 = vmul.f32 %v876_v35, %v116_v15  ;;  %vm176_vm1 = vweird.f32 %v876_v35 }
 0x117   :  { %v834_v39 = vpack.c.bf16 %v222_v33, %v221_v31  ;;  %v164_v41 = vmul.f32 %v874_v11, %v163_v32  ;;  %vm177_vm2 = vmor %vm175_vm0, %vm176_vm1 }
 0x118   :  { %v148_v43 = vsel %vm147_vm13, %v872_v10, %v144_v38  ;;  %v171_v47 = vmul.f32 %v876_v35, %v170_v42 }
 0x119   :  { %835 = vst [vmem:[#allocation2 + $0x10] sm:$0xff] %v834_v39   ;;  %v201_v46 = vmul.f32 %v148_v43, %v973_v37  ;;  %v168_v48 = vsel %vm167_vm15, %v874_v11, %v164_v41 }
 0x11a   :  { %v172_v49 = vmul.f32 0.5, %v171_v47  ;;  %v203_v53 = vmul.f32 %v168_v48, %v971_v36 }
 0x11b   :  { %v212_v29 = vmul.f32 %v1208_v7, %v201_v46 }
 0x11c   :  { %v173_v52 = vsub.f32 1.5, %v172_v49  ;;  %v214_v58 = vmul.f32 %v1208_v7, %v203_v53 }
 0x11d   :  { %v223_v51 = vadd.f32 %v1219_v22, %v212_v29 }
 0x11e   :  { %v174_v56 = vmul.f32 %v876_v35, %v173_v52  ;;  %v225_v61 = vadd.f32 %v1219_v22, %v214_v58 }
 0x11f   :  { %v839_v54 = vpack.c.bf16 %v224_v50, %v223_v51 }
 0x120   :  { %v779_v57 = vld [vmem:[#allocation2 + $0x10] sm:$0xff]  ;;  %v178_v37 = vsel %vm177_vm2, %v876_v35, %v174_v56 }
 0x121   :  { %854 = vst [vmem:[#allocation2] sm:$0xff] %v839_v54   ;;  %v204_v59 = vmul.f32 %v178_v37, %v987_v45  ;;  %477 = vmatmul.bf16.vlgmr.msra.gmra.mxu0 %v779_v57  ;;  %506 = vmatmul.bf16.vlgmr.msra.gmra.mxu1 %v779_v57  ;;  %v100_v45 = vpop.xlane.xlu2 %99 }
 0x122   :  { %535 = vmatmul.bf16.vlgmr.msra.gmra.mxu2 %v779_v57  ;;  %564 = vmatmul.bf16.vlgmr.msra.gmra.mxu3 %v779_v57  ;;  %v109_v1 = vmul.f32 %v100_v45, %v951_v17 }
 0x123   :  { %v215_v60 = vmul.f32 %v1208_v7, %v204_v59 }
 0x124   :  { %v117_v2 = vadd.f32 1e-05, %v109_v1 }
 0x125   :  { %v226_v36 = vadd.f32 %v1219_v22, %v215_v60 }
 0x126   :  { %877 = vrsqrt.f32 %v117_v2  ;;  %vm185_vm3 = vweird.f32 %v117_v2 }
 0x127   :  { %v844_v62 = vpack.c.bf16 %v226_v36, %v225_v61 }
 0x128   :  { %v780_v63 = vld [vmem:[#allocation2] sm:$0xff] }
 0x129   :  { %855 = vst [vmem:[#allocation2 + $0x18] sm:$0xff] %v844_v62  }
 0x12c   :  { %v878_v3 = vpop.eup %877 }
 0x12d   :  { %v180_v4 = vmul.f32 %v878_v3, %v117_v2  ;;  %vm186_vm4 = vweird.f32 %v878_v3 }
 0x12e   :  { %vm187_vm5 = vmor %vm185_vm3, %vm186_vm4 }
 0x12f   :  { %v181_v5 = vmul.f32 %v878_v3, %v180_v4 }
 0x130   :  { %v781_v0 = vld [vmem:[#allocation2 + $0x18] sm:$0xff] }
 0x131   :  { %482 = vmatmul.bf16.gmra.mxu0 %v780_v63  ;;  %511 = vmatmul.bf16.gmra.mxu1 %v780_v63  ;;  %v182_v10 = vmul.f32 0.5, %v181_v5 }
 0x132   :  { %540 = vmatmul.bf16.gmra.mxu2 %v780_v63  ;;  %569 = vmatmul.bf16.gmra.mxu3 %v780_v63 }
 0x133   :  { %v183_v11 = vsub.f32 1.5, %v182_v10 }
 0x135   :  { %v184_v13 = vmul.f32 %v878_v3, %v183_v11 }
 0x137   :  { %v188_v16 = vsel %vm187_vm5, %v878_v3, %v184_v13 }
 0x138   :  { %v205_v20 = vmul.f32 %v188_v16, %v978_v40 }
 0x13a   :  { %v216_v23 = vmul.f32 %v1208_v7, %v205_v20 }
 0x13c   :  { %v227_v26 = vadd.f32 %v1219_v22, %v216_v23 }
 0x141   :  { %487 = vmatmul.bf16.gmra.mxu0 %v781_v0  ;;  %516 = vmatmul.bf16.gmra.mxu1 %v781_v0 }
 0x142   :  { %545 = vmatmul.bf16.gmra.mxu2 %v781_v0  ;;  %574 = vmatmul.bf16.gmra.mxu3 %v781_v0 }
 0x174   :  { %v102_v6 = vpop.xlane.xlu0 %101 }
 0x175   :  { %v110_v55 = vmul.f32 %v102_v6, %v951_v17 }
 0x177   :  { %v118_v8 = vadd.f32 1e-05, %v110_v55 }
 0x179   :  { %879 = vrsqrt.f32 %v118_v8  ;;  %vm195_vm7 = vweird.f32 %v118_v8 }
 0x17f   :  { %v880_v12 = vpop.eup %879 }
 0x180   :  { %v190_v14 = vmul.f32 %v880_v12, %v118_v8  ;;  %vm196_vm6 = vweird.f32 %v880_v12 }
 0x181   :  { %vm197_vm8 = vmor %vm195_vm7, %vm196_vm6 }
 0x182   :  { %v191_v15 = vmul.f32 %v880_v12, %v190_v14 }
 0x184   :  { %v192_v18 = vmul.f32 0.5, %v191_v15 }
 0x186   :  { %v193_v19 = vsub.f32 1.5, %v192_v18 }
 0x188   :  { %v194_v21 = vmul.f32 %v880_v12, %v193_v19 }
 0x18a   :  { %v198_v17 = vsel %vm197_vm8, %v880_v12, %v194_v21 }
 0x18b   :  { %v206_v24 = vmul.f32 %v198_v17, %v1170_v28 }
 0x18d   :  { %v217_v25 = vmul.f32 %v1208_v7, %v206_v24 }
 0x18f   :  { %v228_v27 = vadd.f32 %v1219_v22, %v217_v25 }
 0x191   :  { %v849_v30 = vpack.c.bf16 %v228_v27, %v227_v26 }
 0x193   :  { %856 = vst [vmem:[#allocation2 + $0x8] sm:$0xff] %v849_v30  }
 0x19a   :  { %v782_v31 = vld [vmem:[#allocation2 + $0x8] sm:$0xff] }
 0x19b   :  { %492 = vmatmul.bf16.gmra.mxu0 %v782_v31  ;;  %521 = vmatmul.bf16.gmra.mxu1 %v782_v31 }
 0x19c   :  { %550 = vmatmul.bf16.gmra.mxu2 %v782_v31  ;;  %579 = vmatmul.bf16.gmra.mxu3 %v782_v31 }
 0x19e   :  { %v478_v40 = vpop.f32.mrf.mxu0  ;;  %v507_v34 = vpop.f32.mrf.mxu1 }
 0x19f   :  { %v585_v9 = vpack.c.bf16 %v507_v34, %v478_v40 }
 0x1a1   :  { %601 = vst [vmem:[#allocation3] sm:$0xff] %v585_v9 }
 0x1a5   :  { %v536_v33 = vpop.f32.mrf.mxu2  ;;  %v565_v32 = vpop.f32.mrf.mxu3 }
 0x1a6   :  { %v586_v28 = vpack.c.bf16 %v565_v32, %v536_v33  ;;  %v480_v35 = vpop.f32.mrf.mxu0  ;;  %v509_v7 = vpop.f32.mrf.mxu1 }
 0x1a7   :  { %v587_v38 = vpack.c.bf16 %v509_v7, %v480_v35 }
 0x1a8   :  { %602 = vst [vmem:[#allocation3 + $0x8] sm:$0xff] %v586_v28 }
 0x1a9   :  { %603 = vst [vmem:[#allocation3 + $0x10] sm:$0xff] %v587_v38 }
 0x1ad   :  { %v538_v22 = vpop.f32.mrf.mxu2  ;;  %v567_v39 = vpop.f32.mrf.mxu3 }
 0x1ae   :  { %v588_v41 = vpack.c.bf16 %v567_v39, %v538_v22  ;;  %v483_v42 = vpop.f32.mrf.mxu0  ;;  %v512_v43 = vpop.f32.mrf.mxu1 }
 0x1af   :  { %v589_v44 = vpack.c.bf16 %v512_v43, %v483_v42 }
 0x1b0   :  { %604 = vst [vmem:[#allocation3 + $0x18] sm:$0xff] %v588_v41 }
 0x1b1   :  { %605 = vst [vmem:[#allocation3 + $0x20] sm:$0xff] %v589_v44 }
 0x1b5   :  { %v541_v46 = vpop.f32.mrf.mxu2  ;;  %v570_v47 = vpop.f32.mrf.mxu3 }
 0x1b6   :  { %v590_v29 = vpack.c.bf16 %v570_v47, %v541_v46  ;;  %v485_v48 = vpop.f32.mrf.mxu0  ;;  %v514_v49 = vpop.f32.mrf.mxu1 }
 0x1b7   :  { %v591_v50 = vpack.c.bf16 %v514_v49, %v485_v48 }
 0x1b8   :  { %606 = vst [vmem:[#allocation3 + $0x28] sm:$0xff] %v590_v29 }
 0x1b9   :  { %607 = vst [vmem:[#allocation3 + $0x30] sm:$0xff] %v591_v50 }
 0x1bd   :  { %v543_v51 = vpop.f32.mrf.mxu2  ;;  %v572_v52 = vpop.f32.mrf.mxu3 }
 0x1be   :  { %v592_v53 = vpack.c.bf16 %v572_v52, %v543_v51  ;;  %v488_v54 = vpop.f32.mrf.mxu0  ;;  %v517_v56 = vpop.f32.mrf.mxu1 }
 0x1bf   :  { %v593_v57 = vpack.c.bf16 %v517_v56, %v488_v54 }
 0x1c0   :  { %608 = vst [vmem:[#allocation3 + $0x38] sm:$0xff] %v592_v53 }
 0x1c1   :  { %609 = vst [vmem:[#allocation3 + $0x40] sm:$0xff] %v593_v57 }
 0x1c5   :  { %v546_v37 = vpop.f32.mrf.mxu2  ;;  %v575_v58 = vpop.f32.mrf.mxu3 }
 0x1c6   :  { %v594_v59 = vpack.c.bf16 %v575_v58, %v546_v37  ;;  %v490_v60 = vpop.f32.mrf.mxu0  ;;  %v519_v61 = vpop.f32.mrf.mxu1 }
 0x1c7   :  { %v595_v36 = vpack.c.bf16 %v519_v61, %v490_v60 }
 0x1c8   :  { %610 = vst [vmem:[#allocation3 + $0x48] sm:$0xff] %v594_v59 }
 0x1c9   :  { %611 = vst [vmem:[#allocation3 + $0x50] sm:$0xff] %v595_v36 }
 0x1cd   :  { %v548_v62 = vpop.f32.mrf.mxu2  ;;  %v577_v63 = vpop.f32.mrf.mxu3 }
 0x1ce   :  { %v596_v0 = vpack.c.bf16 %v577_v63, %v548_v62 }
 0x1d0   :  { %612 = vst [vmem:[#allocation3 + $0x58] sm:$0xff] %v596_v0 }
 0x218   :  { %v493_v45 = vpop.f32.mrf.mxu0  ;;  %v522_v1 = vpop.f32.mrf.mxu1 }
 0x219   :  { %v597_v2 = vpack.c.bf16 %v522_v1, %v493_v45 }
 0x21b   :  { %613 = vst [vmem:[#allocation3 + $0x60] sm:$0xff] %v597_v2 }
 0x21f   :  { %v551_v3 = vpop.f32.mrf.mxu2  ;;  %v580_v4 = vpop.f32.mrf.mxu3 }
 0x220   :  { %v598_v5 = vpack.c.bf16 %v580_v4, %v551_v3  ;;  %v495_v6 = vpop.f32.mrf.mxu0  ;;  %v524_v55 = vpop.f32.mrf.mxu1 }
 0x221   :  { %v599_v8 = vpack.c.bf16 %v524_v55, %v495_v6 }
 0x222   :  { %614 = vst [vmem:[#allocation3 + $0x68] sm:$0xff] %v598_v5 }
 0x223   :  { %615 = vst [vmem:[#allocation3 + $0x70] sm:$0xff] %v599_v8 }
 0x227   :  { %v553_v10 = vpop.f32.mrf.mxu2  ;;  %v582_v11 = vpop.f32.mrf.mxu3 }
 0x228   :  { %v600_v12 = vpack.c.bf16 %v582_v11, %v553_v10 }
 0x22a   :  { %616 = vst [vmem:[#allocation3 + $0x78] sm:$0xff] %v600_v12 }
 0x22b   :  { %629 = dma.vmem_to_hbm [thread:$0]  %s622_s18, 2048, %s624_s21, [#allocation4], %s909_s22, %s909_s22, %s910_s0  }
 0x22c   :  { %905 = dma.done.wait [#allocation4], 2048  }
 0x22d   :  { %906 = vsyncadd [#allocation4], 4294965248 }
 0x22e   :  { %634 = vsyncpa [#allocation4], 1 }

// kernel: tt_gpt_forward.9
= control target key start
LH: loop header
LB: loop body
LE: loop exit
PB: predicated region body
PF: predicated region fallthrough
CT: control target
= control target key end

     0   :  { %v1934_v45 = vmov 128.0   ;;  %s2717_s2 = inlined_call_operand.vmem [shape: bf16[128,128], index: 2, kind: input, shape index: {}]   ;;  %s2718_s3 = inlined_call_operand.vmem [shape: f32[1,128], index: 3, kind: input, shape index: {}]   ;;  %s2719_s1 = inlined_call_operand.vmem [shape: bf16[64,128], index: 1, kind: input, shape index: {}]   ;;  %s2720_s0 = inlined_call_operand.vmem [shape: bf16[64,128], index: 0, kind: input, shape index: {}]   ;;  %s2721_s4 = inlined_call_operand.vmem [shape: f32[1,128], index: 4, kind: input, shape index: {}]   ;;  %s2722_s5 = inlined_call_operand.vmem [shape: f32[1,128], index: 5, kind: input, shape index: {}]   ;;  %s2723_s6 = inlined_call_operand.vmem [shape: bf16[128,512], index: 6, kind: input, shape index: {}]   ;;  %s2724_s8 = inlined_call_operand.vmem [shape: bf16[512,128], index: 8, kind: input, shape index: {}]   ;;  %s2725_s7 = inlined_call_operand.vmem [shape: f32[1,512], index: 7, kind: input, shape index: {}]   ;;  %s2726_s9 = inlined_call_operand.vmem [shape: f32[1,128], index: 9, kind: input, shape index: {}]   ;;  %s2727_s10 = inlined_call_operand.vmem [shape: bf16[64,128], index: 10, kind: output, shape index: {}]  }
   0x1   :  { %v1724_v0 = vld [vmem:[%s2717_s2 + $0x38] sm:$0xff]  ;;  %v1723_v1 = vld [vmem:[%s2717_s2 + $0x30] sm:$0xff]  ;;  %v1722_v2 = vld [vmem:[%s2717_s2 + $0x28] sm:$0xff]  ;;  %1852 = vrcp.f32 %v1934_v45 }
   0x2   :  { %135 = vmatpush.bf16.msra.mxu0 %v1724_v0  ;;  %1831 = vmatpush.bf16.msra.mxu1 %v1724_v0  ;;  %v1721_v3 = vld [vmem:[%s2717_s2 + $0x20] sm:$0xff]  ;;  %v1720_v4 = vld [vmem:[%s2717_s2 + $0x18] sm:$0xff]  ;;  %v1719_v5 = vld [vmem:[%s2717_s2 + $0x10] sm:$0xff] }
   0x3   :  { %v1718_v6 = vld [vmem:[%s2717_s2 + $0x8] sm:$0xff]  ;;  %v1717_v7 = vld [vmem:[%s2717_s2] sm:$0xff]  ;;  %v1715_v9 = vld [vmem:[%s2719_s1 + $0x10] sm:$0xff] }
   0x4   :  { %v1713_v8 = vld [vmem:[%s2719_s1] sm:$0xff]  ;;  %v1714_v10 = vld [vmem:[%s2719_s1 + $0x8] sm:$0xff]  ;;  %v1716_v11 = vld [vmem:[%s2719_s1 + $0x18] sm:$0xff] }
   0x5   :  { %v1790_v12 = vld [vmem:[%s2720_s0] sm:$0xff]   ;;  %v1826_v13 = vld [vmem:[%s2720_s0 + $0x10] sm:$0xff]   ;;  %v1825_v31 = vld [vmem:[%s2720_s0 + $0x8] sm:$0xff]  }
   0x6   :  { %136 = vmatpush.bf16.msra.mxu0 %v1723_v1  ;;  %1832 = vmatpush.bf16.msra.mxu1 %v1723_v1  ;;  %v1848_v14 = vld [vmem:[%s2718_s3] ss:$0 sm:$0xff]  ;;  %v1791_v15 = vunpack.c.l.bf16 %v1790_v12  ;;  %v1799_v16 = vunpack.c.l.bf16 %v1826_v13  ;;  %v1792_v23 = vunpack.c.h.bf16 %v1790_v12  ;;  %v1800_v24 = vunpack.c.h.bf16 %v1826_v13  ;;  %v1827_v32 = vld [vmem:[%s2720_s0 + $0x18] sm:$0xff]  }
   0x7   :  { %v1795_v33 = vunpack.c.l.bf16 %v1825_v31  ;;  %v1803_v34 = vunpack.c.l.bf16 %v1827_v32  ;;  %v1796_v41 = vunpack.c.h.bf16 %v1825_v31  ;;  %v1853_v46 = vpop.eup %1852  ;;  %v1804_v60 = vunpack.c.h.bf16 %v1827_v32  ;;  %v1752_v45 = vld [vmem:[%s2723_s6 + $0xd4] sm:$0xf0] }
   0x8   :  { %v207_v47 = vmul.f32 128.0, %v1853_v46  ;;  %vm211_vm0 = vweird.f32 %v1853_v46 }
   0xa   :  { %137 = vmatpush.bf16.msra.mxu0 %v1722_v2  ;;  %1833 = vmatpush.bf16.msra.mxu1 %v1722_v2  ;;  %v208_v48 = vsub.f32 1.0, %v207_v47 }
   0xc   :  { %v209_v49 = vmul.f32 %v1853_v46, %v208_v48  ;;  %v1750_v48 = vld [vmem:[%s2723_s6 + $0xcc] sm:$0xf] }
   0xe   :  { %138 = vmatpush.bf16.msra.mxu0 %v1721_v3  ;;  %1834 = vmatpush.bf16.msra.mxu1 %v1721_v3  ;;  %v210_v50 = vadd.f32 %v1853_v46, %v209_v49  ;;  %v1565_v49 = vld [vmem:[%s2723_s6 + $0xd8] sm:$0xf0] }
  0x10   :  { %v2062_v51 = vsel %vm211_vm0, %v1853_v46, %v210_v50  ;;  %v1568_v50 = vor.u32 %v1750_v48, %v1565_v49  ;;  %v1734_v48 = vld [vmem:[%s2723_s6 + $0x4c] sm:$0xf]  ;;  %v1501_v49 = vld [vmem:[%s2723_s6 + $0x58] sm:$0xf0] }
  0x12   :  { %139 = vmatpush.bf16.msra.mxu0 %v1720_v4  ;;  %1835 = vmatpush.bf16.msra.mxu1 %v1720_v4 }
  0x16   :  { %140 = vmatpush.bf16.msra.mxu0 %v1719_v5  ;;  %1836 = vmatpush.bf16.msra.mxu1 %v1719_v5 }
  0x1a   :  { %141 = vmatpush.bf16.msra.mxu0 %v1718_v6  ;;  %1837 = vmatpush.bf16.msra.mxu1 %v1718_v6 }
  0x1e   :  { %142 = vmatpush.bf16.msra.mxu0 %v1717_v7  ;;  %1838 = vmatpush.bf16.msra.mxu1 %v1717_v7 }
  0x21   :  { %143 = vmatmul.bf16.vlgmr.msra.gmra.mxu0 %v1713_v8  ;;  %153 = vmatmul.bf16.vlgmr.msra.gmra.mxu1 %v1715_v9 }
  0x31   :  { %148 = vmatmul.bf16.gmra.mxu0 %v1714_v10  ;;  %158 = vmatmul.bf16.gmra.mxu1 %v1716_v11 }
  0x9e   :  { %v144_v17 = vpop.f32.mrf.mxu0  ;;  %v154_v18 = vpop.f32.mrf.mxu1 }
  0x9f   :  { %v145_v19 = vadd.f32 %v1848_v14, %v144_v17  ;;  %v155_v20 = vadd.f32 %v1848_v14, %v154_v18 }
  0xa1   :  { %v2035_v21 = vadd.f32 %v1791_v15, %v145_v19  ;;  %v2037_v22 = vadd.f32 %v1799_v16, %v155_v20  ;;  %v1571_v20 = vld [vmem:[%s2723_s6 + $0xe0] sm:$0xf] }
  0xa3   :  { %198 = vadd.xlane.f32.xlu2 %v2037_v22  ;;  %190 = vadd.xlane.f32.xlu0 %v2035_v21 }
  0xa6   :  { %v146_v25 = vpop.f32.mrf.mxu0  ;;  %v156_v26 = vpop.f32.mrf.mxu1 }
  0xa7   :  { %v147_v27 = vadd.f32 %v1848_v14, %v146_v25  ;;  %v157_v28 = vadd.f32 %v1848_v14, %v156_v26  ;;  %v1573_v26 = vld [vmem:[%s2723_s6 + $0xf0] sm:$0xf0] }
  0xa9   :  { %v2041_v29 = vadd.f32 %v1792_v23, %v147_v27  ;;  %v2043_v30 = vadd.f32 %v1800_v24, %v157_v28  ;;  %v1755_v23 = vld [vmem:[%s2723_s6 + $0xec] sm:$0xf0]  ;;  %v1753_v24 = vld [vmem:[%s2723_s6 + $0xe4] sm:$0xf]  ;;  %v1579_v27 = vld [vmem:[%s2723_s6 + $0xe8] sm:$0xf] }
  0xaa   :  { %v1572_v25 = vor.u32 %v1755_v23, %v1571_v20  ;;  %v1756_v28 = vld [vmem:[%s2723_s6 + $0xf4] sm:$0xf0]  ;;  %v1576_v31 = vor.u32 %v1753_v24, %v1573_v26  ;;  %v1507_v20 = vld [vmem:[%s2723_s6 + $0x60] sm:$0xf]  ;;  %v1739_v23 = vld [vmem:[%s2723_s6 + $0x6c] sm:$0xf0] }
  0xab   :  { %200 = vadd.xlane.f32.xlu2 %v2043_v30  ;;  %192 = vadd.xlane.f32.xlu0 %v2041_v29  ;;  %v1580_v32 = vor.u32 %v1756_v28, %v1579_v27  ;;  %v1737_v24 = vld [vmem:[%s2723_s6 + $0x64] sm:$0xf]  ;;  %v1509_v26 = vld [vmem:[%s2723_s6 + $0x70] sm:$0xf0]  ;;  %v1515_v27 = vld [vmem:[%s2723_s6 + $0x68] sm:$0xf] }
  0xac   :  { %585 = vmatpush.bf16.msrb.mxu1 %v1572_v25  ;;  %614 = vmatpush.bf16.msra.mxu2 %v1576_v31  ;;  %v1508_v25 = vor.u32 %v1739_v23, %v1507_v20  ;;  %v1740_v28 = vld [vmem:[%s2723_s6 + $0x74] sm:$0xf0]  ;;  %v1512_v31 = vor.u32 %v1737_v24, %v1509_v26  ;;  %v1469_v20 = vld [vmem:[%s2723_s6 + $0x18] sm:$0xf0] }
  0xad   :  { %643 = vmatpush.bf16.msra.mxu3 %v1580_v32  ;;  %v1516_v32 = vor.u32 %v1740_v28, %v1515_v27 }
  0xae   :  { %v149_v35 = vpop.f32.mrf.mxu0  ;;  %v159_v36 = vpop.f32.mrf.mxu1 }
  0xaf   :  { %v150_v37 = vadd.f32 %v1848_v14, %v149_v35  ;;  %v160_v38 = vadd.f32 %v1848_v14, %v159_v36  ;;  %v1555_v36 = vld [vmem:[%s2723_s6 + $0xc0] sm:$0xf] }
  0xb1   :  { %v2053_v39 = vadd.f32 %v1795_v33, %v150_v37  ;;  %v2055_v40 = vadd.f32 %v1803_v34, %v160_v38  ;;  %v1754_v33 = vld [vmem:[%s2723_s6 + $0xec] sm:$0xf]  ;;  %v1581_v34 = vld [vmem:[%s2723_s6 + $0xf8] sm:$0xf0]  ;;  %v1751_v37 = vld [vmem:[%s2723_s6 + $0xcc] sm:$0xf0] }
  0xb2   :  { %v1584_v35 = vor.u32 %v1754_v33, %v1581_v34  ;;  %v1749_v38 = vld [vmem:[%s2723_s6 + $0xc4] sm:$0xf]  ;;  %v1738_v33 = vld [vmem:[%s2723_s6 + $0x6c] sm:$0xf]  ;;  %v1517_v34 = vld [vmem:[%s2723_s6 + $0x78] sm:$0xf0] }
  0xb3   :  { %202 = vadd.xlane.f32.xlu2 %v2055_v40  ;;  %194 = vadd.xlane.f32.xlu1 %v2053_v39 }
  0xb4   :  { %672 = vmatpush.bf16.msrb.mxu0 %v1584_v35  ;;  %v1520_v35 = vor.u32 %v1738_v33, %v1517_v34 }
  0xb6   :  { %v151_v42 = vpop.f32.mrf.mxu0  ;;  %v161_v57 = vpop.f32.mrf.mxu1 }
  0xb7   :  { %v152_v43 = vadd.f32 %v1848_v14, %v151_v42  ;;  %v162_v59 = vadd.f32 %v1848_v14, %v161_v57  ;;  %v1557_v42 = vld [vmem:[%s2723_s6 + $0xd0] sm:$0xf0] }
  0xb8   :  { %v1560_v46 = vor.u32 %v1749_v38, %v1557_v42  ;;  %673 = vmatpush.bf16.msrb.mxu0 %v1568_v50  ;;  %v1541_v57 = vld [vmem:[%s2723_s6 + $0xb0] sm:$0xf0]  ;;  %v1733_v38 = vld [vmem:[%s2723_s6 + $0x44] sm:$0xf]  ;;  %v1504_v50 = vor.u32 %v1734_v48, %v1501_v49 }
  0xb9   :  { %v2059_v44 = vadd.f32 %v1796_v41, %v152_v43  ;;  %v2075_v0 = vadd.f32 %v1804_v60, %v162_v59  ;;  %v1556_v41 = vor.u32 %v1751_v37, %v1555_v36  ;;  %v1563_v43 = vld [vmem:[%s2723_s6 + $0xc8] sm:$0xf]  ;;  %v1748_v59 = vld [vmem:[%s2723_s6 + $0xb4] sm:$0xf0]  ;;  %v1491_v36 = vld [vmem:[%s2723_s6 + $0x40] sm:$0xf] }
  0xba   :  { %v1564_v47 = vor.u32 %v1752_v45, %v1563_v43  ;;  %615 = vmatpush.bf16.msra.mxu2 %v1560_v46  ;;  %v1735_v37 = vld [vmem:[%s2723_s6 + $0x4c] sm:$0xf0]  ;;  %v1493_v42 = vld [vmem:[%s2723_s6 + $0x50] sm:$0xf0]  ;;  %v1499_v43 = vld [vmem:[%s2723_s6 + $0x48] sm:$0xf] }
  0xbb   :  { %196 = vadd.xlane.f32.xlu1 %v2059_v44  ;;  %586 = vmatpush.bf16.msrb.mxu1 %v1556_v41  ;;  %v1492_v41 = vor.u32 %v1735_v37, %v1491_v36  ;;  %v1736_v45 = vld [vmem:[%s2723_s6 + $0x54] sm:$0xf0]  ;;  %v1496_v46 = vor.u32 %v1733_v38, %v1493_v42 }
  0xbc   :  { %644 = vmatpush.bf16.msra.mxu3 %v1564_v47  ;;  %v1500_v47 = vor.u32 %v1736_v45, %v1499_v43 }
 0x116   :  { %v191_v52 = vpop.xlane.xlu0 %190  ;;  %v199_v56 = vpop.xlane.xlu2 %198 }
 0x117   :  { %v213_v53 = vmul.f32 %v2062_v51, %v191_v52  ;;  %v217_v63 = vmul.f32 %v2062_v51, %v199_v56  ;;  %v1539_v52 = vld [vmem:[%s2723_s6 + $0xa0] sm:$0xf] }
 0x119   :  { %v2066_v54 = vsub.f32 %v2035_v21, %v213_v53  ;;  %v2081_v4 = vsub.f32 %v2037_v22, %v217_v63  ;;  %v1747_v53 = vld [vmem:[%s2723_s6 + $0xac] sm:$0xf0]  ;;  %v1746_v63 = vld [vmem:[%s2723_s6 + $0xac] sm:$0xf] }
 0x11a   :  { %v1540_v56 = vor.u32 %v1747_v53, %v1539_v52  ;;  %v1475_v52 = vld [vmem:[%s2723_s6 + $0x20] sm:$0xf]  ;;  %v1731_v53 = vld [vmem:[%s2723_s6 + $0x2c] sm:$0xf0] }
 0x11b   :  { %v229_v55 = vmul.f32 %v2066_v54, %v2066_v54  ;;  %v233_v8 = vmul.f32 %v2081_v4, %v2081_v4 }
 0x11c   :  { %587 = vmatpush.bf16.msrb.mxu1 %v1540_v56  ;;  %v1476_v56 = vor.u32 %v1731_v53, %v1475_v52 }
 0x11d   :  { %237 = vadd.xlane.f32.xlu0 %v229_v55  ;;  %v1745_v55 = vld [vmem:[%s2723_s6 + $0xa4] sm:$0xf] }
 0x11e   :  { %v193_v58 = vpop.xlane.xlu0 %192  ;;  %v201_v2 = vpop.xlane.xlu2 %200  ;;  %v1544_v60 = vor.u32 %v1745_v55, %v1541_v57  ;;  %v1729_v55 = vld [vmem:[%s2723_s6 + $0x24] sm:$0xf]  ;;  %v1477_v57 = vld [vmem:[%s2723_s6 + $0x30] sm:$0xf0] }
 0x11f   :  { %v214_v61 = vmul.f32 %v2062_v51, %v193_v58  ;;  %v218_v7 = vmul.f32 %v2062_v51, %v201_v2  ;;  %v1547_v58 = vld [vmem:[%s2723_s6 + $0xa8] sm:$0xf] }
 0x120   :  { %616 = vmatpush.bf16.msra.mxu2 %v1544_v60 }
 0x121   :  { %v2072_v62 = vsub.f32 %v2041_v29, %v214_v61  ;;  %v2093_v11 = vsub.f32 %v2043_v30, %v218_v7  ;;  %v1548_v61 = vor.u32 %v1748_v59, %v1547_v58  ;;  %v1741_v7 = vld [vmem:[%s2723_s6 + $0x84] sm:$0xf]  ;;  %v1483_v58 = vld [vmem:[%s2723_s6 + $0x28] sm:$0xf]  ;;  %v1732_v59 = vld [vmem:[%s2723_s6 + $0x34] sm:$0xf0] }
 0x123   :  { %v230_v1 = vmul.f32 %v2072_v62, %v2072_v62  ;;  %v234_v17 = vmul.f32 %v2093_v11, %v2093_v11  ;;  %645 = vmatpush.bf16.msra.mxu3 %v1548_v61  ;;  %v1480_v61 = vor.u32 %v1729_v55, %v1477_v57 }
 0x125   :  { %204 = vadd.xlane.f32.xlu0 %v2075_v0  ;;  %239 = vadd.xlane.f32.xlu1 %v230_v1  ;;  %v1549_v1 = vld [vmem:[%s2723_s6 + $0xb8] sm:$0xf0] }
 0x126   :  { %v195_v3 = vpop.xlane.xlu1 %194  ;;  %v203_v13 = vpop.xlane.xlu2 %202  ;;  %v1552_v2 = vor.u32 %v1746_v63, %v1549_v1  ;;  %v1484_v63 = vor.u32 %v1732_v59, %v1483_v58  ;;  %v1730_v1 = vld [vmem:[%s2723_s6 + $0x2c] sm:$0xf] }
 0x127   :  { %v215_v5 = vmul.f32 %v2062_v51, %v195_v3  ;;  %v219_v15 = vmul.f32 %v2062_v51, %v203_v13  ;;  %v1523_v3 = vld [vmem:[%s2723_s6 + $0x80] sm:$0xf] }
 0x128   :  { %674 = vmatpush.bf16.msrb.mxu0 %v1552_v2  ;;  %v1485_v2 = vld [vmem:[%s2723_s6 + $0x38] sm:$0xf0] }
 0x129   :  { %v2085_v6 = vsub.f32 %v2053_v39, %v215_v5  ;;  %v2105_v18 = vsub.f32 %v2055_v40, %v219_v15  ;;  %v1743_v5 = vld [vmem:[%s2723_s6 + $0x8c] sm:$0xf0] }
 0x12b   :  { %v231_v9 = vmul.f32 %v2085_v6, %v2085_v6  ;;  %v235_v19 = vmul.f32 %v2105_v18, %v2105_v18 }
 0x12d   :  { %245 = vadd.xlane.f32.xlu0 %v233_v8  ;;  %241 = vadd.xlane.f32.xlu1 %v231_v9  ;;  %v1524_v8 = vor.u32 %v1743_v5, %v1523_v3  ;;  %v1525_v9 = vld [vmem:[%s2723_s6 + $0x90] sm:$0xf0]  ;;  %v1488_v5 = vor.u32 %v1730_v1, %v1485_v2 }
 0x12e   :  { %v197_v10 = vpop.xlane.xlu1 %196  ;;  %v1528_v13 = vor.u32 %v1741_v7, %v1525_v9  ;;  %v1459_v7 = vld [vmem:[%s2723_s6] sm:$0xf]  ;;  %v1725_v9 = vld [vmem:[%s2723_s6 + $0x4] sm:$0xf] }
 0x12f   :  { %v216_v12 = vmul.f32 %v2062_v51, %v197_v10  ;;  %v1531_v10 = vld [vmem:[%s2723_s6 + $0x88] sm:$0xf]  ;;  %588 = vmatpush.bf16.msrb.mxu1 %v1524_v8  ;;  %v1727_v8 = vld [vmem:[%s2723_s6 + $0xc] sm:$0xf0] }
 0x130   :  { %617 = vmatpush.bf16.msra.mxu2 %v1528_v13  ;;  %v1461_v13 = vld [vmem:[%s2723_s6 + $0x10] sm:$0xf0] }
 0x131   :  { %v2097_v14 = vsub.f32 %v2059_v44, %v216_v12  ;;  %v1744_v12 = vld [vmem:[%s2723_s6 + $0x94] sm:$0xf0] }
 0x132   :  { %v1532_v15 = vor.u32 %v1744_v12, %v1531_v10  ;;  %v1460_v12 = vor.u32 %v1727_v8, %v1459_v7  ;;  %v2320_v7 = vld [vmem:[%s2721_s4] ss:$0 sm:$0xff] }
 0x133   :  { %v232_v16 = vmul.f32 %v2097_v14, %v2097_v14  ;;  %589 = vmatpush.bf16.msrb.mxu1 %v1508_v25 }
 0x134   :  { %646 = vmatpush.bf16.msra.mxu3 %v1532_v15  ;;  %618 = vmatpush.bf16.msra.mxu2 %v1512_v31  ;;  %v1467_v15 = vld [vmem:[%s2723_s6 + $0x8] sm:$0xf] }
 0x135   :  { %243 = vadd.xlane.f32.xlu2 %v232_v16  ;;  %247 = vadd.xlane.f32.xlu1 %v234_v17  ;;  %v1742_v16 = vld [vmem:[%s2723_s6 + $0x8c] sm:$0xf]  ;;  %v1533_v17 = vld [vmem:[%s2723_s6 + $0x98] sm:$0xf0] }
 0x137   :  { %590 = vmatpush.bf16.msrb.mxu1 %v1492_v41 }
 0x138   :  { %647 = vmatpush.bf16.msra.mxu3 %v1516_v32  ;;  %619 = vmatpush.bf16.msra.mxu2 %v1496_v46 }
 0x13b   :  { %591 = vmatpush.bf16.msrb.mxu1 %v1476_v56 }
 0x13c   :  { %648 = vmatpush.bf16.msra.mxu3 %v1500_v47  ;;  %620 = vmatpush.bf16.msra.mxu2 %v1480_v61 }
 0x13d   :  { %249 = vadd.xlane.f32.xlu2 %v235_v19  ;;  %v1536_v19 = vor.u32 %v1742_v16, %v1533_v17  ;;  %v1464_v16 = vor.u32 %v1725_v9, %v1461_v13  ;;  %v1728_v17 = vld [vmem:[%s2723_s6 + $0x14] sm:$0xf0] }
 0x13e   :  { %v1468_v23 = vor.u32 %v1728_v17, %v1467_v15 }
 0x13f   :  { %675 = vmatpush.bf16.msrb.mxu0 %v1536_v19  ;;  %v1726_v19 = vld [vmem:[%s2723_s6 + $0xc] sm:$0xf]  ;;  %592 = vmatpush.bf16.msrb.mxu1 %v1460_v12 }
 0x140   :  { %649 = vmatpush.bf16.msra.mxu3 %v1484_v63  ;;  %v1472_v24 = vor.u32 %v1726_v19, %v1469_v20  ;;  %621 = vmatpush.bf16.msra.mxu2 %v1464_v16 }
 0x143   :  { %676 = vmatpush.bf16.msrb.mxu0 %v1520_v35 }
 0x144   :  { %650 = vmatpush.bf16.msra.mxu3 %v1468_v23 }
 0x147   :  { %677 = vmatpush.bf16.msrb.mxu0 %v1504_v50 }
 0x14b   :  { %678 = vmatpush.bf16.msrb.mxu0 %v1488_v5 }
 0x14f   :  { %679 = vmatpush.bf16.msrb.mxu0 %v1472_v24 }
 0x190   :  { %v238_v60 = vpop.xlane.xlu0 %237 }
 0x191   :  { %v253_v3 = vmul.f32 %v238_v60, %v2062_v51 }
 0x193   :  { %v261_v10 = vadd.f32 1e-05, %v253_v3 }
 0x195   :  { %1854 = vrsqrt.f32 %v261_v10  ;;  %vm275_vm2 = vweird.f32 %v261_v10 }
 0x198   :  { %v240_v25 = vpop.xlane.xlu1 %239  ;;  %v205_v26 = vpop.xlane.xlu0 %204 }
 0x199   :  { %v254_v27 = vmul.f32 %v240_v25, %v2062_v51  ;;  %v220_v28 = vmul.f32 %v2062_v51, %v205_v26 }
 0x19b   :  { %v1855_v31 = vpop.eup %1854  ;;  %v262_v32 = vadd.f32 1e-05, %v254_v27  ;;  %v2305_v33 = vsub.f32 %v2075_v0, %v220_v28 }
 0x19c   :  { %v270_v34 = vmul.f32 %v1855_v31, %v261_v10  ;;  %vm276_vm1 = vweird.f32 %v1855_v31 }
 0x19d   :  { %1856 = vrsqrt.f32 %v262_v32  ;;  %v236_v35 = vmul.f32 %v2305_v33, %v2305_v33  ;;  %vm277_vm3 = vmor %vm275_vm2, %vm276_vm1  ;;  %vm285_vm5 = vweird.f32 %v262_v32 }
 0x19e   :  { %v271_v36 = vmul.f32 %v1855_v31, %v270_v34 }
 0x19f   :  { %251 = vadd.xlane.f32.xlu0 %v236_v35 }
 0x1a0   :  { %v272_v37 = vmul.f32 0.5, %v271_v36  ;;  %v242_v38 = vpop.xlane.xlu1 %241  ;;  %v246_v42 = vpop.xlane.xlu0 %245 }
 0x1a1   :  { %v255_v41 = vmul.f32 %v242_v38, %v2062_v51  ;;  %v257_v48 = vmul.f32 %v246_v42, %v2062_v51 }
 0x1a2   :  { %v273_v43 = vsub.f32 1.5, %v272_v37 }
 0x1a3   :  { %v1857_v45 = vpop.eup %1856  ;;  %v263_v46 = vadd.f32 1e-05, %v255_v41  ;;  %v2311_v53 = vadd.f32 1e-05, %v257_v48 }
 0x1a4   :  { %v280_v47 = vmul.f32 %v1857_v45, %v262_v32  ;;  %v274_v49 = vmul.f32 %v1855_v31, %v273_v43  ;;  %vm286_vm4 = vweird.f32 %v1857_v45 }
 0x1a5   :  { %1858 = vrsqrt.f32 %v263_v46  ;;  %vm287_vm6 = vmor %vm285_vm5, %vm286_vm4  ;;  %vm295_vm8 = vweird.f32 %v263_v46  ;;  %vm315_vm1 = vweird.f32 %v2311_v53 }
 0x1a6   :  { %v281_v50 = vmul.f32 %v1857_v45, %v280_v47  ;;  %v278_v57 = vsel %vm277_vm3, %v1855_v31, %v274_v49  ;;  %1860 = vrsqrt.f32 %v2311_v53 }
 0x1a7   :  { %v349_v2 = vmul.f32 %v278_v57, %v2066_v54  ;;  %v2327_v54 = vld [vmem:[%s2722_s5] ss:$0 sm:$0xff] }
 0x1a8   :  { %v282_v52 = vmul.f32 0.5, %v281_v50  ;;  %v244_v55 = vpop.xlane.xlu2 %243  ;;  %v248_v56 = vpop.xlane.xlu1 %247 }
 0x1a9   :  { %v256_v58 = vmul.f32 %v244_v55, %v2062_v51  ;;  %v258_v59 = vmul.f32 %v248_v56, %v2062_v51  ;;  %v360_v13 = vmul.f32 %v2320_v7, %v349_v2 }
 0x1aa   :  { %v283_v60 = vsub.f32 1.5, %v282_v52 }
 0x1ab   :  { %v1859_v61 = vpop.eup %1858  ;;  %v264_v63 = vadd.f32 1e-05, %v256_v58  ;;  %v266_v1 = vadd.f32 1e-05, %v258_v59 }
 0x1ac   :  { %v284_v3 = vmul.f32 %v1857_v45, %v283_v60  ;;  %v290_v5 = vmul.f32 %v1859_v61, %v263_v46  ;;  %v1861_v16 = vpop.eup %1860  ;;  %vm296_vm7 = vweird.f32 %v1859_v61 }
 0x1ad   :  { %1862 = vrsqrt.f32 %v264_v63  ;;  %v310_v26 = vmul.f32 %v1861_v16, %v2311_v53  ;;  %vm297_vm9 = vmor %vm295_vm8, %vm296_vm7  ;;  %vm305_vm11 = vweird.f32 %v264_v63  ;;  %vm316_vm14 = vweird.f32 %v1861_v16 }
 0x1ae   :  { %v288_v8 = vsel %vm287_vm6, %v1857_v45, %v284_v3  ;;  %v291_v9 = vmul.f32 %v1859_v61, %v290_v5  ;;  %1864 = vrsqrt.f32 %v266_v1  ;;  %vm325_vm15 = vweird.f32 %v266_v1  ;;  %vm317_vm2 = vmor %vm315_vm1, %vm316_vm14 }
 0x1af   :  { %v350_v10 = vmul.f32 %v288_v8, %v2072_v62  ;;  %v371_v62 = vadd.f32 %v2327_v54, %v360_v13  ;;  %v311_v36 = vmul.f32 %v1861_v16, %v310_v26 }
 0x1b0   :  { %v292_v12 = vmul.f32 0.5, %v291_v9  ;;  %v250_v3 = vpop.xlane.xlu2 %249 }
 0x1b1   :  { %v361_v15 = vmul.f32 %v2320_v7, %v350_v10  ;;  %v312_v43 = vmul.f32 0.5, %v311_v36  ;;  %v259_v5 = vmul.f32 %v250_v3, %v2062_v51  ;;  %v1757_v3 = vld [vmem:[%s2724_s8] sm:$0xff] }
 0x1b2   :  { %v293_v17 = vsub.f32 1.5, %v292_v12 }
 0x1b3   :  { %v1863_v19 = vpop.eup %1862  ;;  %v372_v20 = vadd.f32 %v2327_v54, %v361_v15  ;;  %v313_v49 = vsub.f32 1.5, %v312_v43  ;;  %v267_v8 = vadd.f32 1e-05, %v259_v5  ;;  %v1770_v43 = vld [vmem:[%s2724_s8 + $0x68] sm:$0xff]  ;;  %v2466_v5 = vld [vmem:[%s2724_s8 + $0xc0] sm:$0xff] }
 0x1b4   :  { %v1865_v23 = vpop.eup %1864  ;;  %v294_v24 = vmul.f32 %v1859_v61, %v293_v17  ;;  %v300_v25 = vmul.f32 %v1863_v19, %v264_v63  ;;  %vm306_vm10 = vweird.f32 %v1863_v19  ;;  %v2354_v17 = vld [vmem:[%s2724_s8 + $0xf8] sm:$0xff] }
 0x1b5   :  { %v320_v27 = vmul.f32 %v1865_v23, %v266_v1  ;;  %v379_v31 = vpack.c.bf16 %v372_v20, %v371_v62  ;;  %vm307_vm12 = vmor %vm305_vm11, %vm306_vm10  ;;  %vm326_vm13 = vweird.f32 %v1865_v23  ;;  %v314_v56 = vmul.f32 %v1861_v16, %v313_v49  ;;  %1352 = vmatpush.bf16.msra.mxu0 %v2354_v17  ;;  %v2363_v20 = vld [vmem:[%s2724_s8 + $0xf0] sm:$0xff] }
 0x1b6   :  { %v301_v28 = vmul.f32 %v1863_v19, %v300_v25  ;;  %v298_v34 = vsel %vm297_vm9, %v1859_v61, %v294_v24  ;;  %vm327_vm0 = vmor %vm325_vm15, %vm326_vm13  ;;  %1866 = vrsqrt.f32 %v267_v8  ;;  %v1772_v24 = vld [vmem:[%s2724_s8 + $0x78] sm:$0xff]  ;;  %vm335_vm4 = vweird.f32 %v267_v8 }
 0x1b7   :  { %v321_v32 = vmul.f32 %v1865_v23, %v320_v27  ;;  %593 = vmatmul.bf16.vlgmr.msrb.gmra.mxu1 %v379_v31  ;;  %622 = vmatmul.bf16.vlgmr.msra.gmra.mxu2 %v379_v31  ;;  %v351_v38 = vmul.f32 %v298_v34, %v2085_v6  ;;  %v318_v58 = vsel %vm317_vm2, %v1861_v16, %v314_v56  ;;  %v1764_v16 = vld [vmem:[%s2724_s8 + $0x38] sm:$0xff]  ;;  %v1762_v27 = vld [vmem:[%s2724_s8 + $0x28] sm:$0xff]  ;;  %v1779_v34 = vld [vmem:[%s2724_s8 + $0xb0] sm:$0xff] }
 0x1b8   :  { %v302_v35 = vmul.f32 0.5, %v301_v28  ;;  %651 = vmatmul.bf16.vlgmr.msra.gmra.mxu3 %v379_v31  ;;  %680 = vmatmul.bf16.vlgmr.msrb.gmra.mxu0 %v379_v31  ;;  %v353_v60 = vmul.f32 %v318_v58, %v2081_v4  ;;  %v1780_v25 = vld [vmem:[%s2724_s8 + $0xb8] sm:$0xff]  ;;  %v2378_v28 = vld [vmem:[%s2724_s8 + $0xe8] sm:$0xff]  ;;  %v2427_v56 = vld [vmem:[%s2724_s8 + $0xd0] sm:$0xff] }
 0x1b9   :  { %v322_v41 = vmul.f32 0.5, %v321_v32  ;;  %v362_v48 = vmul.f32 %v2320_v7, %v351_v38  ;;  %1265 = vmatpush.bf16.msra.mxu1 %v1764_v16  ;;  %1353 = vmatpush.bf16.msra.mxu0 %v2363_v20  ;;  %v1771_v32 = vld [vmem:[%s2724_s8 + $0x70] sm:$0xff]  ;;  %v2393_v38 = vld [vmem:[%s2724_s8 + $0xe0] sm:$0xff]  ;;  %v1776_v58 = vld [vmem:[%s2724_s8 + $0x98] sm:$0xff] }
 0x1ba   :  { %v303_v37 = vsub.f32 1.5, %v302_v35  ;;  %v364_v63 = vmul.f32 %v2320_v7, %v353_v60  ;;  %1294 = vmatpush.bf16.msrb.mxu2 %v1772_v24  ;;  %1323 = vmatpush.bf16.msrb.mxu3 %v1780_v25  ;;  %v415_v60 = vld [vmem:[%s2725_s7] sm:$0xf] }
 0x1bb   :  { %v323_v47 = vsub.f32 1.5, %v322_v41  ;;  %v373_v55 = vadd.f32 %v2327_v54, %v362_v48 }
 0x1bc   :  { %v304_v42 = vmul.f32 %v1863_v19, %v303_v37  ;;  %v375_v2 = vadd.f32 %v2327_v54, %v364_v63  ;;  %v1761_v37 = vld [vmem:[%s2724_s8 + $0x20] sm:$0xff]  ;;  %v1767_v63 = vld [vmem:[%s2724_s8 + $0x50] sm:$0xff] }
 0x1bd   :  { %v324_v52 = vmul.f32 %v1865_v23, %v323_v47  ;;  %1354 = vmatpush.bf16.msra.mxu0 %v2378_v28  ;;  %v2409_v47 = vld [vmem:[%s2724_s8 + $0xd8] sm:$0xff] }
 0x1be   :  { %v308_v45 = vsel %vm307_vm12, %v1863_v19, %v304_v42  ;;  %1295 = vmatpush.bf16.msrb.mxu2 %v1771_v32  ;;  %1324 = vmatpush.bf16.msrb.mxu3 %v1779_v34 }
 0x1bf   :  { %v352_v46 = vmul.f32 %v308_v45, %v2097_v14  ;;  %v328_v14 = vsel %vm327_vm0, %v1865_v23, %v324_v52  ;;  %v1778_v45 = vld [vmem:[%s2724_s8 + $0xa8] sm:$0xff]  ;;  %v1769_v52 = vld [vmem:[%s2724_s8 + $0x60] sm:$0xff] }
 0x1c0   :  { %v354_v59 = vmul.f32 %v328_v14, %v2093_v11  ;;  %v1867_v11 = vpop.eup %1866 }
 0x1c1   :  { %v363_v50 = vmul.f32 %v2320_v7, %v352_v46  ;;  %v330_v4 = vmul.f32 %v1867_v11, %v267_v8  ;;  %vm336_vm3 = vweird.f32 %v1867_v11  ;;  %1355 = vmatpush.bf16.msra.mxu0 %v2393_v38 }
 0x1c2   :  { %v365_v61 = vmul.f32 %v2320_v7, %v354_v59  ;;  %vm337_vm5 = vmor %vm335_vm4, %vm336_vm3  ;;  %1296 = vmatpush.bf16.msrb.mxu2 %v1770_v43  ;;  %1325 = vmatpush.bf16.msrb.mxu3 %v1778_v45 }
 0x1c3   :  { %v374_v6 = vadd.f32 %v2327_v54, %v363_v50  ;;  %v331_v9 = vmul.f32 %v1867_v11, %v330_v4  ;;  %v1774_v4 = vld [vmem:[%s2724_s8 + $0x88] sm:$0xff] }
 0x1c4   :  { %v376_v1 = vadd.f32 %v2327_v54, %v365_v61  ;;  %v2447_v61 = vld [vmem:[%s2724_s8 + $0xc8] sm:$0xff] }
 0x1c5   :  { %v380_v57 = vpack.c.bf16 %v374_v6, %v373_v55  ;;  %v332_v15 = vmul.f32 0.5, %v331_v9  ;;  %1356 = vmatpush.bf16.msra.mxu0 %v2409_v47  ;;  %v1777_v55 = vld [vmem:[%s2724_s8 + $0xa0] sm:$0xff] }
 0x1c6   :  { %v381_v53 = vpack.c.bf16 %v376_v1, %v375_v2  ;;  %1297 = vmatpush.bf16.msrb.mxu2 %v1769_v52  ;;  %1326 = vmatpush.bf16.msrb.mxu3 %v1777_v55  ;;  %v1775_v1 = vld [vmem:[%s2724_s8 + $0x90] sm:$0xff]  ;;  %v2455_v2 = vperm.slane %v415_v60, 0 }
 0x1c7   :  { %598 = vmatmul.bf16.gmra.mxu1 %v380_v57  ;;  %627 = vmatmul.bf16.gmra.mxu2 %v380_v57  ;;  %v333_v19 = vsub.f32 1.5, %v332_v15  ;;  %v2479_v15 = vperm.slane %v415_v60, 1 }
 0x1c8   :  { %656 = vmatmul.bf16.gmra.mxu3 %v380_v57  ;;  %685 = vmatmul.bf16.gmra.mxu0 %v380_v57 }
 0x1c9   :  { %v334_v62 = vmul.f32 %v1867_v11, %v333_v19  ;;  %1357 = vmatpush.bf16.msra.mxu0 %v2427_v56  ;;  %v2482_v19 = vperm.slane %v415_v60, 2 }
 0x1ca   :  { %1327 = vmatpush.bf16.msrb.mxu3 %v1776_v58 }
 0x1cb   :  { %v338_v35 = vsel %vm337_vm5, %v1867_v11, %v334_v62  ;;  %v1766_v11 = vld [vmem:[%s2724_s8 + $0x48] sm:$0xff] }
 0x1cc   :  { %v355_v42 = vmul.f32 %v338_v35, %v2105_v18  ;;  %v1760_v18 = vld [vmem:[%s2724_s8 + $0x18] sm:$0xff] }
 0x1cd   :  { %1358 = vmatpush.bf16.msra.mxu0 %v2447_v61 }
 0x1ce   :  { %v366_v50 = vmul.f32 %v2320_v7, %v355_v42  ;;  %1328 = vmatpush.bf16.msrb.mxu3 %v1775_v1 }
 0x1d0   :  { %v377_v57 = vadd.f32 %v2327_v54, %v366_v50 }
 0x1d1   :  { %1359 = vmatpush.bf16.msra.mxu0 %v2466_v5 }
 0x1d2   :  { %1329 = vmatpush.bf16.msrb.mxu3 %v1774_v4 }
 0x1d7   :  { %603 = vmatmul.bf16.gmra.mxu1 %v381_v53  ;;  %632 = vmatmul.bf16.gmra.mxu2 %v381_v53 }
 0x1d8   :  { %661 = vmatmul.bf16.gmra.mxu3 %v381_v53  ;;  %690 = vmatmul.bf16.gmra.mxu0 %v381_v53  ;;  %v2457_v53 = vperm.slane %v415_v60, 3 }
 0x212   :  { %v252_v10 = vpop.xlane.xlu0 %251 }
 0x213   :  { %v260_v12 = vmul.f32 %v252_v10, %v2062_v51  ;;  %v1763_v51 = vld [vmem:[%s2724_s8 + $0x30] sm:$0xff] }
 0x214   :  { %1266 = vmatpush.bf16.msra.mxu1 %v1763_v51  ;;  %v1765_v51 = vld [vmem:[%s2724_s8 + $0x40] sm:$0xff] }
 0x215   :  { %v268_v13 = vadd.f32 1e-05, %v260_v12 }
 0x217   :  { %1868 = vrsqrt.f32 %v268_v13  ;;  %vm345_vm7 = vweird.f32 %v268_v13 }
 0x218   :  { %1267 = vmatpush.bf16.msra.mxu1 %v1762_v27 }
 0x21c   :  { %1268 = vmatpush.bf16.msra.mxu1 %v1761_v37 }
 0x21d   :  { %v1869_v23 = vpop.eup %1868 }
 0x21e   :  { %v340_v26 = vmul.f32 %v1869_v23, %v268_v13  ;;  %vm346_vm6 = vweird.f32 %v1869_v23 }
 0x21f   :  { %vm347_vm8 = vmor %vm345_vm7, %vm346_vm6 }
 0x220   :  { %v341_v31 = vmul.f32 %v1869_v23, %v340_v26  ;;  %1269 = vmatpush.bf16.msra.mxu1 %v1760_v18 }
 0x222   :  { %v342_v36 = vmul.f32 0.5, %v341_v31 }
 0x224   :  { %v343_v41 = vsub.f32 1.5, %v342_v36 }
 0x226   :  { %v344_v46 = vmul.f32 %v1869_v23, %v343_v41 }
 0x228   :  { %v348_v48 = vsel %vm347_vm8, %v1869_v23, %v344_v46  ;;  %v1773_v23 = vld [vmem:[%s2724_s8 + $0x80] sm:$0xff] }
 0x229   :  { %v356_v49 = vmul.f32 %v348_v48, %v2305_v33  ;;  %v1759_v33 = vld [vmem:[%s2724_s8 + $0x10] sm:$0xff]  ;;  %1330 = vmatpush.bf16.msrb.mxu3 %v1773_v23 }
 0x22a   :  { %1270 = vmatpush.bf16.msra.mxu1 %v1759_v33 }
 0x22b   :  { %v367_v6 = vmul.f32 %v2320_v7, %v356_v49  ;;  %v1768_v7 = vld [vmem:[%s2724_s8 + $0x58] sm:$0xff] }
 0x22c   :  { %1298 = vmatpush.bf16.msrb.mxu2 %v1768_v7 }
 0x22d   :  { %v378_v14 = vadd.f32 %v2327_v54, %v367_v6  ;;  %v1758_v54 = vld [vmem:[%s2724_s8 + $0x8] sm:$0xff] }
 0x22e   :  { %1271 = vmatpush.bf16.msra.mxu1 %v1758_v54 }
 0x22f   :  { %v382_v59 = vpack.c.bf16 %v378_v14, %v377_v57 }
 0x230   :  { %1299 = vmatpush.bf16.msrb.mxu2 %v1767_v63 }
 0x231   :  { %608 = vmatmul.bf16.gmra.mxu1 %v382_v59  ;;  %637 = vmatmul.bf16.gmra.mxu2 %v382_v59 }
 0x232   :  { %666 = vmatmul.bf16.gmra.mxu3 %v382_v59  ;;  %695 = vmatmul.bf16.gmra.mxu0 %v382_v59 }
 0x233   :  { %1272 = vmatpush.bf16.msra.mxu1 %v1757_v3 }
 0x234   :  { %v594_v8 = vpop.f32.mrf.mxu1  ;;  %1300 = vmatpush.bf16.msrb.mxu2 %v1766_v11 }
 0x235   :  { %v595_v9 = vadd.f32 %v594_v8, %v2455_v2  ;;  %v681_v10 = vpop.f32.mrf.mxu0 }
 0x236   :  { %v2476_v12 = vadd.f32 %v681_v10, %v2457_v53 }
 0x237   :  { %v733_v13 = vmul.f32 0.044715, %v595_v9 }
 0x238   :  { %v736_v16 = vmul.f32 0.044715, %v2476_v12  ;;  %1301 = vmatpush.bf16.msrb.mxu2 %v1765_v51 }
 0x239   :  { %v765_v24 = vmul.f32 %v733_v13, %v595_v9 }
 0x23a   :  { %v768_v25 = vmul.f32 %v736_v16, %v2476_v12  ;;  %v623_v62 = vpop.f32.mrf.mxu2  ;;  %v701_v16 = vmul.f32 0.5, %v595_v9 }
 0x23b   :  { %v797_v26 = vmul.f32 %v765_v24, %v595_v9  ;;  %v624_v27 = vadd.f32 %v623_v62, %v2479_v15  ;;  %v652_v31 = vpop.f32.mrf.mxu3 }
 0x23c   :  { %v800_v32 = vmul.f32 %v768_v25, %v2476_v12  ;;  %v653_v34 = vadd.f32 %v652_v31, %v2482_v19  ;;  %v596_v35 = vpop.f32.mrf.mxu1  ;;  %1839 = vmatpush.bf16.msra.mxu2 %v2354_v17 }
 0x23d   :  { %v829_v36 = vadd.f32 %v797_v26, %v595_v9  ;;  %v734_v37 = vmul.f32 0.044715, %v624_v27  ;;  %v597_v41 = vadd.f32 %v596_v35, %v2455_v2  ;;  %v683_v42 = vpop.f32.mrf.mxu0  ;;  %v2511_v35 = vmul.f32 0.5, %v624_v27 }
 0x23e   :  { %v832_v43 = vadd.f32 %v800_v32, %v2476_v12  ;;  %v735_v45 = vmul.f32 0.044715, %v653_v34  ;;  %v684_v46 = vadd.f32 %v683_v42, %v2457_v53  ;;  %v704_v32 = vmul.f32 0.5, %v2476_v12 }
 0x23f   :  { %v861_v18 = vmul.f32 0.7978846, %v829_v36  ;;  %v766_v48 = vmul.f32 %v734_v37, %v624_v27  ;;  %v737_v49 = vmul.f32 0.044715, %v597_v41 }
 0x240   :  { %v864_v50 = vmul.f32 0.7978846, %v832_v43  ;;  %v767_v52 = vmul.f32 %v735_v45, %v653_v34  ;;  %v740_v55 = vmul.f32 0.044715, %v684_v46  ;;  %1840 = vmatpush.bf16.msra.mxu2 %v2363_v20  ;;  %v705_v43 = vmul.f32 0.5, %v597_v41 }
 0x241   :  { %v769_v6 = vmul.f32 %v737_v49, %v597_v41  ;;  %v798_v17 = vmul.f32 %v766_v48, %v624_v27  ;;  %1870 = vtanh.f32 %v861_v18  ;;  %v2513_v45 = vmul.f32 0.5, %v653_v34 }
 0x242   :  { %v772_v33 = vmul.f32 %v740_v55, %v684_v46  ;;  %v625_v57 = vpop.f32.mrf.mxu2  ;;  %v799_v14 = vmul.f32 %v767_v52, %v653_v34  ;;  %1872 = vtanh.f32 %v864_v50 }
 0x243   :  { %v801_v7 = vmul.f32 %v769_v6, %v597_v41  ;;  %v626_v58 = vadd.f32 %v625_v57, %v2479_v15  ;;  %v654_v59 = vpop.f32.mrf.mxu3  ;;  %v830_v60 = vadd.f32 %v798_v17, %v624_v27 }
 0x244   :  { %v804_v54 = vmul.f32 %v772_v33, %v684_v46  ;;  %v655_v63 = vadd.f32 %v654_v59, %v2482_v19  ;;  %v599_v1 = vpop.f32.mrf.mxu1  ;;  %1841 = vmatpush.bf16.msra.mxu2 %v2378_v28  ;;  %v831_v4 = vadd.f32 %v799_v14, %v653_v34 }
 0x245   :  { %v833_v3 = vadd.f32 %v801_v7, %v597_v41  ;;  %v738_v20 = vmul.f32 0.044715, %v626_v58  ;;  %v2503_v8 = vadd.f32 %v599_v1, %v2455_v2  ;;  %v686_v11 = vpop.f32.mrf.mxu0  ;;  %v862_v25 = vmul.f32 0.7978846, %v830_v60 }
 0x246   :  { %v836_v10 = vadd.f32 %v804_v54, %v684_v46  ;;  %v739_v13 = vmul.f32 0.044715, %v655_v63  ;;  %v2506_v24 = vadd.f32 %v686_v11, %v2457_v53  ;;  %v863_v9 = vmul.f32 0.7978846, %v831_v4 }
 0x247   :  { %v865_v51 = vmul.f32 0.7978846, %v833_v3  ;;  %v770_v23 = vmul.f32 %v738_v20, %v626_v58  ;;  %v1871_v62 = vpop.eup %1870  ;;  %v741_v28 = vmul.f32 0.044715, %v2503_v8  ;;  %v706_v17 = vmul.f32 0.5, %v626_v58 }
 0x248   :  { %v868_v26 = vmul.f32 0.7978846, %v836_v10  ;;  %v771_v31 = vmul.f32 %v739_v13, %v655_v63  ;;  %1842 = vmatpush.bf16.msra.mxu2 %v2393_v38  ;;  %v1873_v37 = vpop.eup %1872  ;;  %v744_v48 = vmul.f32 0.044715, %v2506_v24  ;;  %v925_v50 = vadd.f32 1.0, %v1871_v62 }
 0x249   :  { %1874 = vtanh.f32 %v865_v51  ;;  %v802_v36 = vmul.f32 %v770_v23, %v626_v58  ;;  %v708_v38 = vmul.f32 0.5, %v684_v46  ;;  %v773_v27 = vmul.f32 %v741_v28, %v2503_v8 }
 0x24a   :  { %v628_v42 = vpop.f32.mrf.mxu2  ;;  %1876 = vtanh.f32 %v868_v26  ;;  %v803_v18 = vmul.f32 %v771_v31, %v655_v63  ;;  %v928_v6 = vadd.f32 1.0, %v1873_v37  ;;  %v707_v14 = vmul.f32 0.5, %v655_v63 }
 0x24b   :  { %v657_v49 = vpop.f32.mrf.mxu3  ;;  %v834_v52 = vadd.f32 %v802_v36, %v626_v58  ;;  %1878 = vtanh.f32 %v862_v25  ;;  %v805_v46 = vmul.f32 %v773_v27, %v2503_v8  ;;  %v957_v54 = vmul.f32 %v925_v50, %v701_v16 }
 0x24c   :  { %v601_v12 = vpop.f32.mrf.mxu1  ;;  %v835_v55 = vadd.f32 %v803_v18, %v655_v63  ;;  %1880 = vtanh.f32 %v863_v9  ;;  %1843 = vmatpush.bf16.msra.mxu2 %v2409_v47  ;;  %v776_v47 = vmul.f32 %v744_v48, %v2506_v24  ;;  %v2531_v11 = vadd.f32 %v628_v42, %v2479_v15 }
 0x24d   :  { %v2519_v41 = vadd.f32 %v601_v12, %v2455_v2  ;;  %v688_v34 = vpop.f32.mrf.mxu0  ;;  %v866_v33 = vmul.f32 0.7978846, %v834_v52  ;;  %v837_v58 = vadd.f32 %v805_v46, %v2503_v8  ;;  %v960_v10 = vmul.f32 %v928_v6, %v704_v32 }
 0x24e   :  { %v2522_v57 = vadd.f32 %v688_v34, %v2457_v53  ;;  %v867_v7 = vmul.f32 0.7978846, %v835_v55  ;;  %v808_v26 = vmul.f32 %v776_v47, %v2506_v24  ;;  %v2541_v18 = vmul.f32 0.5, %v2503_v8 }
 0x24f   :  { %v1875_v59 = vpop.eup %1874  ;;  %v745_v60 = vmul.f32 0.044715, %v2519_v41  ;;  %1882 = vtanh.f32 %v866_v33  ;;  %v869_v62 = vmul.f32 0.7978846, %v837_v58  ;;  %v742_v48 = vmul.f32 0.044715, %v2531_v11 }
 0x250   :  { %v1877_v1 = vpop.eup %1876  ;;  %v748_v3 = vmul.f32 0.044715, %v2522_v57  ;;  %v929_v20 = vadd.f32 1.0, %v1875_v59  ;;  %1884 = vtanh.f32 %v867_v7  ;;  %1844 = vmatpush.bf16.msra.mxu2 %v2427_v56  ;;  %v2546_v50 = vadd.f32 %v657_v49, %v2482_v19 }
 0x251   :  { %v1879_v63 = vpop.eup %1878  ;;  %v932_v4 = vadd.f32 1.0, %v1877_v1  ;;  %v777_v13 = vmul.f32 %v745_v60, %v2519_v41  ;;  %1886 = vtanh.f32 %v869_v62  ;;  %v840_v7 = vadd.f32 %v808_v26, %v2506_v24 }
 0x252   :  { %v1881_v16 = vpop.eup %1880  ;;  %v630_v51 = vpop.f32.mrf.mxu2  ;;  %v961_v23 = vmul.f32 %v929_v20, %v705_v43  ;;  %v926_v25 = vadd.f32 1.0, %v1879_v63  ;;  %v780_v9 = vmul.f32 %v748_v3, %v2522_v57 }
 0x253   :  { %v2536_v31 = vadd.f32 %v630_v51, %v2479_v15  ;;  %v659_v28 = vpop.f32.mrf.mxu3  ;;  %v964_v56 = vmul.f32 %v932_v4, %v708_v38  ;;  %v809_v36 = vmul.f32 %v777_v13, %v2519_v41  ;;  %v927_v42 = vadd.f32 1.0, %v1881_v16 }
 0x254   :  { %v604_v37 = vpop.f32.mrf.mxu1  ;;  %v989_v32 = vpack.c.bf16 %v961_v23, %v957_v54  ;;  %1845 = vmatpush.bf16.msra.mxu2 %v2447_v61  ;;  %v2549_v38 = vmul.f32 0.5, %v2506_v24  ;;  %v2553_v8 = vadd.f32 %v659_v28, %v2482_v19  ;;  %v958_v6 = vmul.f32 %v926_v25, %v2511_v35 }
 0x255   :  { %v1883_v43 = vpop.eup %1882  ;;  %v691_v52 = vpop.f32.mrf.mxu0  ;;  %v992_v12 = vpack.c.bf16 %v964_v56, %v960_v10  ;;  %v746_v27 = vmul.f32 0.044715, %v2536_v31  ;;  %v841_v61 = vadd.f32 %v809_v36, %v2519_v41  ;;  %v812_v33 = vmul.f32 %v780_v9, %v2522_v57 }
 0x256   :  { %v1885_v55 = vpop.eup %1884  ;;  %1273 = vmatmul.bf16.vlgmr.msra.gmra.mxu1 %v989_v32  ;;  %v930_v34 = vadd.f32 1.0, %v1883_v43  ;;  %v2560_v46 = vadd.f32 %v604_v37, %v2455_v2  ;;  %v959_v60 = vmul.f32 %v927_v42, %v2513_v45  ;;  %v2565_v47 = vadd.f32 %v691_v52, %v2457_v53 }
 0x257   :  { %1360 = vmatmul.bf16.vlgmr.msra.gmra.mxu0 %v992_v12  ;;  %v931_v49 = vadd.f32 1.0, %v1885_v55  ;;  %v873_v54 = vmul.f32 0.7978846, %v841_v61  ;;  %v844_v35 = vadd.f32 %v812_v33, %v2522_v57  ;;  %v872_v3 = vmul.f32 0.7978846, %v840_v7  ;;  %v1887_v20 = vpop.eup %1886 }
 0x258   :  { %v962_v59 = vmul.f32 %v930_v34, %v706_v17  ;;  %1846 = vmatpush.bf16.msra.mxu2 %v2466_v5  ;;  %v774_v24 = vmul.f32 %v742_v48, %v2531_v11  ;;  %v778_v17 = vmul.f32 %v746_v27, %v2536_v31  ;;  %v743_v45 = vmul.f32 0.044715, %v2546_v50 }
 0x259   :  { %v963_v1 = vmul.f32 %v931_v49, %v707_v14  ;;  %1888 = vtanh.f32 %v873_v54  ;;  %v713_v5 = vmul.f32 0.5, %v2519_v41  ;;  %v876_v13 = vmul.f32 0.7978846, %v844_v35 }
 0x25a   :  { %v633_v58 = vpop.f32.mrf.mxu2  ;;  %v990_v63 = vpack.c.bf16 %v962_v59, %v958_v6  ;;  %v747_v14 = vmul.f32 0.044715, %v2553_v8  ;;  %1890 = vtanh.f32 %v872_v3  ;;  %v806_v51 = vmul.f32 %v774_v24, %v2531_v11 }
 0x25b   :  { %v662_v4 = vpop.f32.mrf.mxu3  ;;  %v991_v10 = vpack.c.bf16 %v963_v1, %v959_v60  ;;  %v810_v23 = vmul.f32 %v778_v17, %v2536_v31  ;;  %v933_v26 = vadd.f32 1.0, %v1887_v20  ;;  %v716_v28 = vmul.f32 0.5, %v2522_v57 }
 0x25c   :  { %v606_v16 = vpop.f32.mrf.mxu1  ;;  %1302 = vmatmul.bf16.vlgmr.msrb.gmra.mxu2 %v990_v63  ;;  %1892 = vtanh.f32 %v876_v13  ;;  %v749_v41 = vmul.f32 0.044715, %v2560_v46  ;;  %v752_v56 = vmul.f32 0.044715, %v2565_v47  ;;  %v838_v36 = vadd.f32 %v806_v51, %v2531_v11 }
 0x25d   :  { %v2576_v25 = vadd.f32 %v606_v16, %v2455_v2  ;;  %v693_v62 = vpop.f32.mrf.mxu0  ;;  %1331 = vmatmul.bf16.vlgmr.msrb.gmra.mxu3 %v991_v10  ;;  %v842_v9 = vadd.f32 %v810_v23, %v2536_v31  ;;  %v710_v32 = vmul.f32 0.5, %v2531_v11  ;;  %v714_v42 = vmul.f32 0.5, %v2536_v31 }
 0x25e   :  { %v775_v43 = vmul.f32 %v743_v45, %v2546_v50  ;;  %v2588_v57 = vadd.f32 %v693_v62, %v2457_v53  ;;  %v870_v52 = vmul.f32 0.7978846, %v838_v36  ;;  %v779_v55 = vmul.f32 %v747_v14, %v2553_v8 }
 0x25f   :  { %v753_v37 = vmul.f32 0.044715, %v2576_v25  ;;  %v1889_v48 = vpop.eup %1888  ;;  %v874_v12 = vmul.f32 0.7978846, %v842_v9  ;;  %v2592_v27 = vadd.f32 %v633_v58, %v2479_v15  ;;  %v965_v61 = vmul.f32 %v933_v26, %v2541_v18 }
 0x260   :  { %v937_v34 = vadd.f32 1.0, %v1889_v48  ;;  %v807_v11 = vmul.f32 %v775_v43, %v2546_v50  ;;  %v1891_v6 = vpop.eup %1890  ;;  %1894 = vtanh.f32 %v870_v52  ;;  %v811_v49 = vmul.f32 %v779_v55, %v2553_v8 }
 0x261   :  { %v781_v33 = vmul.f32 %v749_v41, %v2560_v46  ;;  %v785_v7 = vmul.f32 %v753_v37, %v2576_v25  ;;  %v936_v1 = vadd.f32 1.0, %v1891_v6  ;;  %1896 = vtanh.f32 %v874_v12 }
 0x262   :  { %v635_v31 = vpop.f32.mrf.mxu2  ;;  %v1893_v59 = vpop.eup %1892  ;;  %v969_v54 = vmul.f32 %v937_v34, %v713_v5  ;;  %v756_v18 = vmul.f32 0.044715, %v2588_v57  ;;  %v839_v20 = vadd.f32 %v807_v11, %v2546_v50  ;;  %v843_v58 = vadd.f32 %v811_v49, %v2553_v8 }
 0x263   :  { %v2600_v60 = vadd.f32 %v635_v31, %v2479_v15  ;;  %v664_v35 = vpop.f32.mrf.mxu3  ;;  %v940_v3 = vadd.f32 1.0, %v1893_v59  ;;  %v750_v63 = vmul.f32 0.044715, %v2592_v27  ;;  %v2607_v24 = vadd.f32 %v662_v4, %v2482_v19 }
 0x264   :  { %v993_v17 = vpack.c.bf16 %v969_v54, %v965_v61  ;;  %v813_v45 = vmul.f32 %v781_v33, %v2560_v46  ;;  %v968_v10 = vmul.f32 %v936_v1, %v2549_v38  ;;  %v871_v13 = vmul.f32 0.7978846, %v839_v20 }
 0x265   :  { %v972_v5 = vmul.f32 %v940_v3, %v716_v28  ;;  %v875_v14 = vmul.f32 0.7978846, %v843_v58  ;;  %v754_v16 = vmul.f32 0.044715, %v2600_v60  ;;  %v2613_v51 = vadd.f32 %v664_v35, %v2482_v19 }
 0x266   :  { %1278 = vmatmul.bf16.gmra.mxu1 %v993_v17  ;;  %v817_v23 = vmul.f32 %v785_v7, %v2576_v25  ;;  %v845_v62 = vadd.f32 %v813_v45, %v2560_v46  ;;  %v1895_v4 = vpop.eup %1894  ;;  %1898 = vtanh.f32 %v871_v13  ;;  %v784_v41 = vmul.f32 %v752_v56, %v2565_v47 }
 0x267   :  { %v996_v26 = vpack.c.bf16 %v972_v5, %v968_v10  ;;  %v788_v38 = vmul.f32 %v756_v18, %v2588_v57  ;;  %v1897_v28 = vpop.eup %1896  ;;  %v934_v36 = vadd.f32 1.0, %v1895_v4  ;;  %1900 = vtanh.f32 %v875_v14 }
 0x268   :  { %v849_v9 = vadd.f32 %v817_v23, %v2576_v25  ;;  %v877_v37 = vmul.f32 0.7978846, %v845_v62  ;;  %v751_v43 = vmul.f32 0.044715, %v2607_v24  ;;  %v938_v48 = vadd.f32 1.0, %v1897_v28 }
 0x269   :  { %1365 = vmatmul.bf16.gmra.mxu0 %v996_v26  ;;  %v816_v52 = vmul.f32 %v784_v41, %v2565_v47  ;;  %v820_v12 = vmul.f32 %v788_v38, %v2588_v57  ;;  %v755_v55 = vmul.f32 0.044715, %v2613_v51  ;;  %v966_v34 = vmul.f32 %v934_v36, %v710_v32 }
 0x26a   :  { %v881_v56 = vmul.f32 0.7978846, %v849_v9  ;;  %1902 = vtanh.f32 %v877_v37  ;;  %v970_v61 = vmul.f32 %v938_v48, %v714_v42  ;;  %v782_v31 = vmul.f32 %v750_v63, %v2592_v27 }
 0x26b   :  { %v848_v11 = vadd.f32 %v816_v52, %v2565_v47  ;;  %v852_v6 = vadd.f32 %v820_v12, %v2588_v57  ;;  %v711_v49 = vmul.f32 0.5, %v2546_v50  ;;  %v786_v33 = vmul.f32 %v754_v16, %v2600_v60 }
 0x26c   :  { %1904 = vtanh.f32 %v881_v56  ;;  %v1899_v7 = vpop.eup %1898  ;;  %v994_v59 = vpack.c.bf16 %v970_v61, %v966_v34  ;;  %v814_v32 = vmul.f32 %v782_v31, %v2592_v27  ;;  %v783_v3 = vmul.f32 %v751_v43, %v2607_v24 }
 0x26d   :  { %v880_v54 = vmul.f32 0.7978846, %v848_v11  ;;  %v884_v1 = vmul.f32 0.7978846, %v852_v6  ;;  %v1901_v18 = vpop.eup %1900  ;;  %v935_v35 = vadd.f32 1.0, %v1899_v7  ;;  %v818_v42 = vmul.f32 %v786_v33, %v2600_v60 }
 0x26e   :  { %v787_v20 = vmul.f32 %v755_v55, %v2613_v51  ;;  %1307 = vmatmul.bf16.gmra.mxu2 %v994_v59  ;;  %v715_v50 = vmul.f32 0.5, %v2553_v8  ;;  %v939_v58 = vadd.f32 1.0, %v1901_v18  ;;  %v846_v63 = vadd.f32 %v814_v32, %v2592_v27 }
 0x26f   :  { %1906 = vtanh.f32 %v880_v54  ;;  %v967_v45 = vmul.f32 %v935_v35, %v711_v49  ;;  %v850_v10 = vadd.f32 %v818_v42, %v2600_v60  ;;  %v815_v5 = vmul.f32 %v783_v3, %v2607_v24 }
 0x270   :  { %v1903_v17 = vpop.eup %1902  ;;  %1908 = vtanh.f32 %v884_v1  ;;  %v971_v13 = vmul.f32 %v939_v58, %v715_v50  ;;  %v878_v16 = vmul.f32 0.7978846, %v846_v63  ;;  %v819_v23 = vmul.f32 %v787_v20, %v2613_v51 }
 0x271   :  { %v941_v14 = vadd.f32 1.0, %v1903_v17  ;;  %v717_v4 = vmul.f32 0.5, %v2560_v46  ;;  %v882_v8 = vmul.f32 0.7978846, %v850_v10  ;;  %v847_v26 = vadd.f32 %v815_v5, %v2607_v24 }
 0x272   :  { %v1905_v62 = vpop.eup %1904  ;;  %v995_v41 = vpack.c.bf16 %v971_v13, %v967_v45  ;;  %v721_v38 = vmul.f32 0.5, %v2576_v25  ;;  %1910 = vtanh.f32 %v878_v16  ;;  %v851_v36 = vadd.f32 %v819_v23, %v2613_v51 }
 0x273   :  { %v945_v28 = vadd.f32 1.0, %v1905_v62  ;;  %1912 = vtanh.f32 %v882_v8  ;;  %v879_v9 = vmul.f32 0.7978846, %v847_v26  ;;  %v973_v43 = vmul.f32 %v941_v14, %v717_v4 }
 0x274   :  { %1336 = vmatmul.bf16.gmra.mxu3 %v995_v41  ;;  %v883_v55 = vmul.f32 0.7978846, %v851_v36  ;;  %v720_v34 = vmul.f32 0.5, %v2565_v47  ;;  %v724_v56 = vmul.f32 0.5, %v2588_v57  ;;  %v718_v7 = vmul.f32 0.5, %v2592_v27 }
 0x275   :  { %v1907_v37 = vpop.eup %1906  ;;  %v977_v48 = vmul.f32 %v945_v28, %v721_v38  ;;  %1914 = vtanh.f32 %v879_v9  ;;  %v722_v59 = vmul.f32 0.5, %v2600_v60  ;;  %v719_v42 = vmul.f32 0.5, %v2607_v24 }
 0x276   :  { %v1909_v52 = vpop.eup %1908  ;;  %v944_v12 = vadd.f32 1.0, %v1907_v37  ;;  %1916 = vtanh.f32 %v883_v55  ;;  %v723_v3 = vmul.f32 0.5, %v2613_v51 }
 0x277   :  { %v997_v46 = vpack.c.bf16 %v977_v48, %v973_v43  ;;  %v948_v25 = vadd.f32 1.0, %v1909_v52 }
 0x278   :  { %v1911_v61 = vpop.eup %1910  ;;  %v976_v11 = vmul.f32 %v944_v12, %v720_v34 }
 0x279   :  { %1283 = vmatmul.bf16.gmra.mxu1 %v997_v46  ;;  %v980_v6 = vmul.f32 %v948_v25, %v724_v56  ;;  %v1913_v31 = vpop.eup %1912  ;;  %v942_v49 = vadd.f32 1.0, %v1911_v61 }
 0x27a   :  { %v946_v54 = vadd.f32 1.0, %v1913_v31 }
 0x27b   :  { %v1000_v33 = vpack.c.bf16 %v980_v6, %v976_v11  ;;  %v1915_v1 = vpop.eup %1914  ;;  %v974_v32 = vmul.f32 %v942_v49, %v718_v7 }
 0x27c   :  { %v978_v47 = vmul.f32 %v946_v54, %v722_v59  ;;  %v943_v18 = vadd.f32 1.0, %v1915_v1  ;;  %v1917_v57 = vpop.eup %1916 }
 0x27d   :  { %1370 = vmatmul.bf16.gmra.mxu0 %v1000_v33  ;;  %v947_v20 = vadd.f32 1.0, %v1917_v57 }
 0x27e   :  { %v998_v35 = vpack.c.bf16 %v978_v47, %v974_v32  ;;  %v975_v50 = vmul.f32 %v943_v18, %v719_v42 }
 0x27f   :  { %v979_v58 = vmul.f32 %v947_v20, %v723_v3 }
 0x280   :  { %1312 = vmatmul.bf16.gmra.mxu2 %v998_v35 }
 0x281   :  { %v999_v63 = vpack.c.bf16 %v979_v58, %v975_v50 }
 0x284   :  { %1341 = vmatmul.bf16.gmra.mxu3 %v999_v63 }
 0x2ae   :  { %v609_v27 = vpop.f32.mrf.mxu1 }
 0x2af   :  { %v610_v60 = vadd.f32 %v609_v27, %v2455_v2  ;;  %v696_v17 = vpop.f32.mrf.mxu0 }
 0x2b1   :  { %v757_v45 = vmul.f32 0.044715, %v610_v60  ;;  %v725_v63 = vmul.f32 0.5, %v610_v60 }
 0x2b3   :  { %v789_v10 = vmul.f32 %v757_v45, %v610_v60 }
 0x2b4   :  { %v638_v5 = vpop.f32.mrf.mxu2 }
 0x2b5   :  { %v2650_v13 = vadd.f32 %v638_v5, %v2479_v15  ;;  %v667_v14 = vpop.f32.mrf.mxu3  ;;  %v821_v24 = vmul.f32 %v789_v10, %v610_v60 }
 0x2b6   :  { %v2653_v51 = vadd.f32 %v667_v14, %v2482_v19  ;;  %v611_v16 = vpop.f32.mrf.mxu1 }
 0x2b7   :  { %v758_v23 = vmul.f32 0.044715, %v2650_v13  ;;  %v612_v62 = vadd.f32 %v611_v16, %v2455_v2  ;;  %v853_v4 = vadd.f32 %v821_v24, %v610_v60  ;;  %v698_v26 = vpop.f32.mrf.mxu0  ;;  %v2666_v2 = vadd.f32 %v696_v17, %v2457_v53 }
 0x2b8   :  { %v759_v8 = vmul.f32 0.044715, %v2653_v51  ;;  %v2661_v36 = vadd.f32 %v698_v26, %v2457_v53  ;;  %v726_v60 = vmul.f32 0.5, %v2650_v13 }
 0x2b9   :  { %v761_v41 = vmul.f32 0.044715, %v612_v62  ;;  %v790_v38 = vmul.f32 %v758_v23, %v2650_v13  ;;  %v885_v37 = vmul.f32 0.7978846, %v853_v4  ;;  %v760_v49 = vmul.f32 0.044715, %v2666_v2 }
 0x2ba   :  { %v791_v28 = vmul.f32 %v759_v8, %v2653_v51  ;;  %v764_v61 = vmul.f32 0.044715, %v2661_v36  ;;  %v729_v27 = vmul.f32 0.5, %v612_v62 }
 0x2bb   :  { %v793_v9 = vmul.f32 %v761_v41, %v612_v62  ;;  %v822_v43 = vmul.f32 %v790_v38, %v2650_v13  ;;  %1918 = vtanh.f32 %v885_v37  ;;  %v792_v47 = vmul.f32 %v760_v49, %v2666_v2 }
 0x2bc   :  { %v640_v48 = vpop.f32.mrf.mxu2  ;;  %v823_v52 = vmul.f32 %v791_v28, %v2653_v51  ;;  %v796_v54 = vmul.f32 %v764_v61, %v2661_v36  ;;  %v727_v37 = vmul.f32 0.5, %v2653_v51 }
 0x2bd   :  { %v641_v12 = vadd.f32 %v640_v48, %v2479_v15  ;;  %v669_v55 = vpop.f32.mrf.mxu3  ;;  %v825_v46 = vmul.f32 %v793_v9, %v612_v62  ;;  %v854_v34 = vadd.f32 %v822_v43, %v2650_v13  ;;  %v824_v58 = vmul.f32 %v792_v47, %v2666_v2 }
 0x2be   :  { %v670_v56 = vadd.f32 %v669_v55, %v2482_v19  ;;  %v855_v25 = vadd.f32 %v823_v52, %v2653_v51  ;;  %v828_v35 = vmul.f32 %v796_v54, %v2661_v36  ;;  %v2685_v51 = vld [vmem:[%s2726_s9] ss:$0 sm:$0xff] }
 0x2bf   :  { %v762_v11 = vmul.f32 0.044715, %v641_v12  ;;  %v857_v6 = vadd.f32 %v825_v46, %v612_v62  ;;  %v886_v7 = vmul.f32 0.7978846, %v854_v34  ;;  %v856_v16 = vadd.f32 %v824_v58, %v2666_v2 }
 0x2c0   :  { %v763_v31 = vmul.f32 0.044715, %v670_v56  ;;  %v887_v59 = vmul.f32 0.7978846, %v855_v25  ;;  %v860_v10 = vadd.f32 %v828_v35, %v2661_v36  ;;  %v730_v62 = vmul.f32 0.5, %v641_v12 }
 0x2c1   :  { %v889_v53 = vmul.f32 0.7978846, %v857_v6  ;;  %v794_v33 = vmul.f32 %v762_v11, %v641_v12  ;;  %v1919_v32 = vpop.eup %1918  ;;  %v888_v9 = vmul.f32 0.7978846, %v856_v16  ;;  %v731_v43 = vmul.f32 0.5, %v670_v56 }
 0x2c2   :  { %v795_v15 = vmul.f32 %v763_v31, %v670_v56  ;;  %v949_v3 = vadd.f32 1.0, %v1919_v32  ;;  %v892_v26 = vmul.f32 0.7978846, %v860_v10 }
 0x2c3   :  { %1920 = vtanh.f32 %v889_v53  ;;  %v826_v1 = vmul.f32 %v794_v33, %v641_v12  ;;  %v728_v53 = vmul.f32 0.5, %v2666_v2 }
 0x2c4   :  { %v827_v19 = vmul.f32 %v795_v15, %v670_v56  ;;  %1922 = vtanh.f32 %v886_v7  ;;  %v981_v14 = vmul.f32 %v949_v3, %v725_v63 }
 0x2c5   :  { %v858_v18 = vadd.f32 %v826_v1, %v641_v12  ;;  %1924 = vtanh.f32 %v887_v59 }
 0x2c6   :  { %v859_v57 = vadd.f32 %v827_v19, %v670_v56  ;;  %v732_v56 = vmul.f32 0.5, %v2661_v36 }
 0x2c7   :  { %v890_v42 = vmul.f32 0.7978846, %v858_v18 }
 0x2c8   :  { %v891_v20 = vmul.f32 0.7978846, %v859_v57 }
 0x2c9   :  { %v1921_v50 = vpop.eup %1920  ;;  %1926 = vtanh.f32 %v890_v42 }
 0x2ca   :  { %v953_v17 = vadd.f32 1.0, %v1921_v50  ;;  %1928 = vtanh.f32 %v891_v20  ;;  %v1923_v45 = vpop.eup %1922 }
 0x2cb   :  { %v1925_v5 = vpop.eup %1924  ;;  %v950_v4 = vadd.f32 1.0, %v1923_v45  ;;  %1930 = vtanh.f32 %v892_v26 }
 0x2cc   :  { %v985_v24 = vmul.f32 %v953_v17, %v729_v27  ;;  %v951_v41 = vadd.f32 1.0, %v1925_v5  ;;  %1932 = vtanh.f32 %v888_v9 }
 0x2cd   :  { %v982_v52 = vmul.f32 %v950_v4, %v726_v60 }
 0x2ce   :  { %v1001_v23 = vpack.c.bf16 %v985_v24, %v981_v14  ;;  %v983_v46 = vmul.f32 %v951_v41, %v727_v37 }
 0x2cf   :  { %v1927_v8 = vpop.eup %1926 }
 0x2d0   :  { %v1929_v38 = vpop.eup %1928  ;;  %1288 = vmatmul.bf16.gmra.mxu1 %v1001_v23  ;;  %v954_v28 = vadd.f32 1.0, %v1927_v8 }
 0x2d1   :  { %v955_v48 = vadd.f32 1.0, %v1929_v38  ;;  %v1931_v6 = vpop.eup %1930 }
 0x2d2   :  { %v986_v55 = vmul.f32 %v954_v28, %v730_v62  ;;  %v1933_v13 = vpop.eup %1932  ;;  %v956_v12 = vadd.f32 1.0, %v1931_v6 }
 0x2d3   :  { %v987_v34 = vmul.f32 %v955_v48, %v731_v43  ;;  %v1274_v11 = vpop.f32.mrf.mxu1  ;;  %v952_v31 = vadd.f32 1.0, %v1933_v13 }
 0x2d4   :  { %v1002_v25 = vpack.c.bf16 %v986_v55, %v982_v52  ;;  %v988_v33 = vmul.f32 %v956_v12, %v732_v56  ;;  %v1275_v7 = vadd.f32 %v2685_v51, %v1274_v11  ;;  %v1361_v15 = vpop.f32.mrf.mxu0 }
 0x2d5   :  { %v1003_v61 = vpack.c.bf16 %v987_v34, %v983_v46  ;;  %v984_v1 = vmul.f32 %v952_v31, %v728_v53 }
 0x2d6   :  { %1317 = vmatmul.bf16.gmra.mxu2 %v1002_v25 }
 0x2d7   :  { %1346 = vmatmul.bf16.gmra.mxu3 %v1003_v61  ;;  %v1004_v32 = vpack.c.bf16 %v988_v33, %v984_v1 }
 0x2db   :  { %v1276_v54 = vpop.f32.mrf.mxu1 }
 0x2dc   :  { %v1277_v47 = vadd.f32 %v2685_v51, %v1276_v54  ;;  %v1363_v42 = vpop.f32.mrf.mxu0 }
 0x2df   :  { %v1303_v49 = vpop.f32.mrf.mxu2 }
 0x2e0   :  { %v1332_v59 = vpop.f32.mrf.mxu3  ;;  %v1304_v19 = vadd.f32 %v1303_v49, %v1275_v7 }
 0x2e2   :  { %v1333_v18 = vadd.f32 %v1332_v59, %v1304_v19 }
 0x2e3   :  { %v1279_v2 = vpop.f32.mrf.mxu1 }
 0x2e4   :  { %v1362_v3 = vadd.f32 %v1361_v15, %v1333_v18  ;;  %v1280_v5 = vadd.f32 %v2685_v51, %v1279_v2 }
 0x2e6   :  { %1375 = vmatmul.bf16.vlgmr.msra.gmra.mxu2 %v1004_v32  ;;  %v1381_v58 = vadd.f32 %v1362_v3, %v2035_v21  ;;  %v1366_v45 = vpop.f32.mrf.mxu0 }
 0x2e7   :  { %v1305_v57 = vpop.f32.mrf.mxu2 }
 0x2e8   :  { %v1306_v35 = vadd.f32 %v1305_v57, %v1277_v47  ;;  %v1334_v36 = vpop.f32.mrf.mxu3 }
 0x2ea   :  { %v1335_v20 = vadd.f32 %v1334_v36, %v1306_v35 }
 0x2eb   :  { %v1281_v10 = vpop.f32.mrf.mxu1 }
 0x2ec   :  { %v1364_v50 = vadd.f32 %v1363_v42, %v1335_v20  ;;  %v1282_v23 = vadd.f32 %v2685_v51, %v1281_v10 }
 0x2ee   :  { %v1382_v63 = vadd.f32 %v1364_v50, %v2041_v29  ;;  %v1368_v4 = vpop.f32.mrf.mxu0 }
 0x2f0   :  { %v1808_v27 = vpack.c.bf16 %v1382_v63, %v1381_v58 }
 0x2f1   :  { %v1308_v17 = vpop.f32.mrf.mxu2 }
 0x2f2   :  { %1809 = vst [vmem:[%s2727_s10] sm:$0xff] %v1808_v27   ;;  %v1309_v24 = vadd.f32 %v1308_v17, %v1280_v5 }
 0x2f6   :  { %v1284_v26 = vpop.f32.mrf.mxu1 }
 0x2f7   :  { %v1337_v14 = vpop.f32.mrf.mxu3  ;;  %v1285_v37 = vadd.f32 %v2685_v51, %v1284_v26 }
 0x2f8   :  { %v1338_v8 = vadd.f32 %v1337_v14, %v1309_v24 }
 0x2f9   :  { %v1310_v16 = vpop.f32.mrf.mxu2 }
 0x2fa   :  { %v1311_v21 = vadd.f32 %v1310_v16, %v1282_v23  ;;  %v1367_v41 = vadd.f32 %v1366_v45, %v1338_v8  ;;  %v1371_v43 = vpop.f32.mrf.mxu0 }
 0x2fc   :  { %v1383_v28 = vadd.f32 %v1367_v41, %v2053_v39 }
 0x2fe   :  { %v1286_v52 = vpop.f32.mrf.mxu1 }
 0x2ff   :  { %v1339_v29 = vpop.f32.mrf.mxu3  ;;  %v1287_v34 = vadd.f32 %v2685_v51, %v1286_v52 }
 0x300   :  { %v1340_v38 = vadd.f32 %v1339_v29, %v1311_v21 }
 0x302   :  { %v1369_v60 = vadd.f32 %v1368_v4, %v1340_v38 }
 0x303   :  { %v1313_v62 = vpop.f32.mrf.mxu2 }
 0x304   :  { %v1384_v9 = vadd.f32 %v1369_v60, %v2059_v44  ;;  %v1314_v46 = vadd.f32 %v1313_v62, %v1285_v37  ;;  %v1373_v44 = vpop.f32.mrf.mxu0 }
 0x306   :  { %v1813_v48 = vpack.c.bf16 %v1384_v9, %v1383_v28 }
 0x307   :  { %v1342_v55 = vpop.f32.mrf.mxu3 }
 0x308   :  { %1828 = vst [vmem:[%s2727_s10 + $0x8] sm:$0xff] %v1813_v48   ;;  %v1343_v61 = vadd.f32 %v1342_v55, %v1314_v46 }
 0x30a   :  { %v1372_v39 = vadd.f32 %v1371_v43, %v1343_v61 }
 0x30b   :  { %v1315_v25 = vpop.f32.mrf.mxu2 }
 0x30c   :  { %v1316_v11 = vadd.f32 %v1315_v25, %v1287_v34  ;;  %v1385_v56 = vadd.f32 %v1372_v39, %v2037_v22 }
 0x30f   :  { %v1344_v6 = vpop.f32.mrf.mxu3 }
 0x310   :  { %v1345_v13 = vadd.f32 %v1344_v6, %v1316_v11 }
 0x312   :  { %v1374_v12 = vadd.f32 %v1373_v44, %v1345_v13 }
 0x314   :  { %v1386_v31 = vadd.f32 %v1374_v12, %v2043_v30 }
 0x316   :  { %v1818_v49 = vpack.c.bf16 %v1386_v31, %v1385_v56 }
 0x318   :  { %1829 = vst [vmem:[%s2727_s10 + $0x10] sm:$0xff] %v1818_v49  }
 0x34d   :  { %v1289_v33 = vpop.f32.mrf.mxu1 }
 0x34e   :  { %v1290_v54 = vadd.f32 %v2685_v51, %v1289_v33 }
 0x355   :  { %v1291_v59 = vpop.f32.mrf.mxu1 }
 0x356   :  { %v1292_v19 = vadd.f32 %v2685_v51, %v1291_v59 }
 0x359   :  { %v1318_v53 = vpop.f32.mrf.mxu2 }
 0x35a   :  { %v1347_v15 = vpop.f32.mrf.mxu3  ;;  %v1319_v32 = vadd.f32 %v1318_v53, %v1290_v54 }
 0x35c   :  { %v1348_v22 = vadd.f32 %v1347_v15, %v1319_v32 }
 0x361   :  { %v1320_v7 = vpop.f32.mrf.mxu2 }
 0x362   :  { %v1321_v47 = vadd.f32 %v1320_v7, %v1292_v19  ;;  %v1349_v18 = vpop.f32.mrf.mxu3 }
 0x364   :  { %v1350_v30 = vadd.f32 %v1349_v18, %v1321_v47 }
 0x369   :  { %v1376_v1 = vpop.f32.mrf.mxu2 }
 0x36a   :  { %v1377_v57 = vadd.f32 %v1376_v1, %v1348_v22 }
 0x36c   :  { %v1387_v42 = vadd.f32 %v1377_v57, %v2055_v40 }
 0x371   :  { %v1378_v35 = vpop.f32.mrf.mxu2 }
 0x372   :  { %v1379_v36 = vadd.f32 %v1378_v35, %v1350_v30 }
 0x374   :  { %v1388_v3 = vadd.f32 %v1379_v36, %v2075_v0 }
 0x376   :  { %v1823_v20 = vpack.c.bf16 %v1388_v3, %v1387_v42 }
 0x378   :  { %1830 = vst [vmem:[%s2727_s10 + $0x18] sm:$0xff] %v1823_v20  }

</bundles_post_ra>
